<compile_context>
chip_gen: v5e
topology: v5e:2x2
jax: 0.10.0
libtpu: 0.0.40
codegen_flags: <defaults>
</compile_context>

<pallas_src>
import functools
import itertools

import jax
import jax.numpy as jnp
from jax.experimental import pallas as pl
from jax.experimental.pallas import tpu as pltpu

# ----------------------------- small config ---------------------------------
N_FFT = 64          # (whisper: 400)
HOP = 32            # (whisper: 160)
N_SAMPLES = 2048    # padded audio length (whisper: 480000)
N_MELS = 16         # (whisper: 80)
D_MODEL = 128       # (whisper medium: 1024) - lane-dense synthetic width
N_HEADS = 2
N_LAYERS = 2
N_CTX = N_SAMPLES // HOP // 2   # 32 encoder positions
F_PAD = 128                     # padded #freq bins (real F = N_FFT//2+1 = 33)
LN_EPS = 1e-5


# ------------------------------ small helpers --------------------------------
def _gelu(x):
    # TODO(synk): PyTorch F.gelu uses the exact erf form; tanh approximation is
    # used here for guaranteed Mosaic lowering.
    return 0.5 * x * (1.0 + jnp.tanh(0.7978845608028654 * (x + 0.044715 * x * x * x)))


def _bf16_dot(a, b):
    # bf16 MXU operands, f32 accumulation (native path on v6e/v7x; harmless on v5e).
    return jnp.dot(a.astype(jnp.bfloat16), b.astype(jnp.bfloat16),
                   preferred_element_type=jnp.float32)


def _layernorm_val(x, g, b, eps):
    mu = jnp.mean(x, axis=-1, keepdims=True)
    xc = x - mu
    var = jnp.mean(xc * xc, axis=-1, keepdims=True)
    return xc * jax.lax.rsqrt(var + eps) * g + b


def _vmem():
    return pl.BlockSpec(memory_space=pltpu.MemorySpace.VMEM)


# ------------------------------- kernels -------------------------------------
def _logmel_kernel(f_ref, dft_ref, fb_ref, o_ref, *, f_pad):
    """STFT power + mel projection + log10 + per-item clamp + scale, fused."""
    f = f_ref[0]                                                    # (NF, N_FFT)
    spec = jnp.dot(f, dft_ref[...], preferred_element_type=jnp.float32)  # (NF, 2*f_pad)
    re = spec[:, :f_pad]
    im = spec[:, f_pad:]
    power = re * re + im * im                                       # (NF, f_pad)
    power = power[:-1, :]                                           # drop last frame
    mel = jnp.dot(power, fb_ref[...], preferred_element_type=jnp.float32)  # (T, n_mels)
    mel = jnp.maximum(mel, 1e-10)
    logmel = jnp.log(mel) * (1.0 / jnp.log(10.0))                   # log10
    mmax = jnp.max(logmel, axis=(0, 1), keepdims=True)              # per-item clamp
    logmel = jnp.maximum(logmel, mmax - 8.0)
    o_ref[0] = (logmel + 4.0) / 4.0


def _matmul_bias_kernel(x_ref, w_ref, b_ref, o_ref, *, act):
    y = _bf16_dot(x_ref[...], w_ref[...]) + b_ref[...]
    if act == "gelu":
        y = _gelu(y)
    o_ref[...] = y


def _conv2_pos_kernel(p_ref, w_ref, b_ref, pos_ref, o_ref):
    """conv2 (as im2col matmul) + gelu + positional-embedding add, fused."""
    y = _bf16_dot(p_ref[0], w_ref[...]) + b_ref[...]
    o_ref[0] = _gelu(y) + pos_ref[...]


def _ln_matmul_kernel(x_ref, g_ref, b_ref, w_ref, wb_ref, o_ref, *, eps):
    """pre-LN + fused QKV projection."""
    h = _layernorm_val(x_ref[...], g_ref[...], b_ref[...], eps)
    o_ref[...] = _bf16_dot(h, w_ref[...]) + wb_ref[...]


def _attn_oproj_res_kernel(qkv_ref, xres_ref, ow_ref, ob_ref, o_ref,
                           *, n_heads, d_head, scale):
    """All-heads MHSA + output projection + residual add, one kernel per batch item.
    Heads are isolated with column masks (lane-aligned, no sub-128 slices)."""
    qkv = qkv_ref[0]                                 # (T, 3D)
    D = n_heads * d_head
    q = qkv[:, :D] * scale
    k = qkv[:, D:2 * D] * scale
    v = qkv[:, 2 * D:3 * D]
    col = jax.lax.broadcasted_iota(jnp.int32, (1, D), 1)
    attn = jnp.zeros((q.shape[0], D), jnp.float32)
    for h in range(n_heads):                         # static, small
        mask = ((col >= h * d_head) & (col < (h + 1) * d_head)).astype(jnp.float32)
        s = jax.lax.dot_general((q * mask).astype(jnp.bfloat16),
                                k.astype(jnp.bfloat16),
                                (((1,), (1,)), ((), ())),
                                preferred_element_type=jnp.float32)   # (T, T)
        m = jnp.max(s, axis=-1, keepdims=True)
        p = jnp.exp(s - m)
        p = p * pl.reciprocal(jnp.sum(p, axis=-1, keepdims=True), approx=True)
        attn = attn + jnp.dot(p.astype(jnp.bfloat16),
                              (v * mask).astype(jnp.bfloat16),
                              preferred_element_type=jnp.float32)     # (T, D)
    y = _bf16_dot(attn, ow_ref[...]) + ob_ref[...]
    o_ref[0] = xres_ref[0] + y


def _ln_mlp_res_kernel(x_ref, g_ref, b_ref, w1_ref, b1_ref, w2_ref, b2_ref, o_ref, *, eps):
    """pre-LN + MLP(up, gelu, down) + residual add, fused."""
    x = x_ref[...]
    h = _layernorm_val(x, g_ref[...], b_ref[...], eps)
    h = _gelu(_bf16_dot(h, w1_ref[...]) + b1_ref[...])
    o_ref[...] = x + _bf16_dot(h, w2_ref[...]) + b2_ref[...]


def _layernorm_kernel(x_ref, g_ref, b_ref, o_ref, *, eps):
    o_ref[...] = _layernorm_val(x_ref[...], g_ref[...], b_ref[...], eps)


# ------------------------------ wrappers --------------------------------------
def pallas_matmul(x, w, b, act=None):
    M, _ = x.shape
    N = w.shape[1]
    return pl.pallas_call(
        functools.partial(_matmul_bias_kernel, act=act),
        out_shape=jax.ShapeDtypeStruct((M, N), jnp.float32),
        in_specs=[_vmem(), _vmem(), _vmem()],
        out_specs=_vmem(),
    )(x.astype(jnp.float32), w, b.reshape(1, N).astype(jnp.float32))


def pallas_ln_matmul(x, g, b, w, wb, eps=LN_EPS):
    M, D = x.shape
    N = w.shape[1]
    return pl.pallas_call(
        functools.partial(_ln_matmul_kernel, eps=eps),
        out_shape=jax.ShapeDtypeStruct((M, N), jnp.float32),
        in_specs=[_vmem()] * 5,
        out_specs=_vmem(),
    )(x, g.reshape(1, D), b.reshape(1, D), w, wb.reshape(1, N))


def pallas_attn_oproj(qkv, xres, ow, ob, n_heads, scale):
    B, T, D3 = qkv.shape
    D = D3 // 3
    d_head = D // n_heads
    return pl.pallas_call(
        functools.partial(_attn_oproj_res_kernel, n_heads=n_heads,
                          d_head=d_head, scale=scale),
        out_shape=jax.ShapeDtypeStruct((B, T, D), jnp.float32),
        grid=(B,),
        in_specs=[pl.BlockSpec((1, T, D3), lambda b: (b, 0, 0)),
                  pl.BlockSpec((1, T, D), lambda b: (b, 0, 0)),
                  pl.BlockSpec((D, D), lambda b: (0, 0)),
                  pl.BlockSpec((1, D), lambda b: (0, 0))],
        out_specs=pl.BlockSpec((1, T, D), lambda b: (b, 0, 0)),
        compiler_params=pltpu.CompilerParams(dimension_semantics=("parallel",)),
    )(qkv, xres, ow, ob.reshape(1, D))


def pallas_ln_mlp_residual(x, g, b, w1, b1, w2, b2, eps=LN_EPS):
    M, D = x.shape
    H = w1.shape[1]
    return pl.pallas_call(
        functools.partial(_ln_mlp_res_kernel, eps=eps),
        out_shape=jax.ShapeDtypeStruct((M, D), jnp.float32),
        in_specs=[_vmem()] * 7,
        out_specs=_vmem(),
    )(x, g.reshape(1, D), b.reshape(1, D), w1, b1.reshape(1, H), w2, b2.reshape(1, D))


def pallas_layernorm(x, g, b, eps=LN_EPS):
    M, D = x.shape
    return pl.pallas_call(
        functools.partial(_layernorm_kernel, eps=eps),
        out_shape=jax.ShapeDtypeStruct((M, D), jnp.float32),
        in_specs=[_vmem(), _vmem(), _vmem()],
        out_specs=_vmem(),
    )(x, g.reshape(1, D), b.reshape(1, D))


# ------------------------ whisper encoder (glue) -----------------------------
def sinusoids(length, channels, max_timescale=10000.0):
    log_ts_inc = jnp.log(max_timescale) / (channels // 2 - 1)
    inv_ts = jnp.exp(-log_ts_inc * jnp.arange(channels // 2, dtype=jnp.float32))
    scaled = jnp.arange(length, dtype=jnp.float32)[:, None] * inv_ts[None, :]
    return jnp.concatenate([jnp.sin(scaled), jnp.cos(scaled)], axis=1)


def mel_filterbank(n_mels, n_freq):
    # simple triangular filterbank (synthetic stand-in for whisper mel filters)
    pts = jnp.linspace(0.0, n_freq - 1.0, n_mels + 2)
    bins = jnp.arange(n_freq, dtype=jnp.float32)
    left, center, right = pts[:-2], pts[1:-1], pts[2:]
    up = (bins[None, :] - left[:, None]) / (center - left)[:, None]
    down = (right[:, None] - bins[None, :]) / (right - center)[:, None]
    return jnp.clip(jnp.minimum(up, down), 0.0, None)  # (n_mels, n_freq)


def dft_matrices(n_fft):
    n = jnp.arange(n_fft, dtype=jnp.float32)
    f = jnp.arange(n_fft // 2 + 1, dtype=jnp.float32)
    window = 0.5 - 0.5 * jnp.cos(2.0 * jnp.pi * n / n_fft)   # periodic hann
    ang = 2.0 * jnp.pi * n[:, None] * f[None, :] / n_fft
    wr = window[:, None] * jnp.cos(ang)
    wi = -window[:, None] * jnp.sin(ang)
    return wr, wi


def pad_or_trim(audio, length):
    n = audio.shape[-1]
    if n > length:
        return audio[..., :length]
    if n < length:
        return jnp.pad(audio, ((0, 0), (0, length - n)))
    return audio


def log_mel_spectrogram(audio, params):
    # audio: (B, N_SAMPLES) -> (B, T, n_mels) channels-last mel (fully fused kernel)
    B, N = audio.shape
    pad = N_FFT // 2
    xp = jnp.pad(audio, ((0, 0), (pad, pad)), mode="reflect")
    n_frames = 1 + N // HOP
    idx = (jnp.arange(n_frames) * HOP)[:, None] + jnp.arange(N_FFT)[None, :]
    frames = xp[:, idx].astype(jnp.float32)                  # (B, n_frames, N_FFT)
    T = n_frames - 1
    return pl.pallas_call(
        functools.partial(_logmel_kernel, f_pad=F_PAD),
        out_shape=jax.ShapeDtypeStruct((B, T, N_MELS), jnp.float32),
        grid=(B,),
        in_specs=[pl.BlockSpec((1, n_frames, N_FFT), lambda b: (b, 0, 0)),
                  pl.BlockSpec((N_FFT, 2 * F_PAD), lambda b: (0, 0)),
                  pl.BlockSpec((F_PAD, N_MELS), lambda b: (0, 0))],
        out_specs=pl.BlockSpec((1, T, N_MELS), lambda b: (b, 0, 0)),
        compiler_params=pltpu.CompilerParams(dimension_semantics=("parallel",)),
    )(frames, params["dft_ri"], params["mel_fb_T"])


def conv1(mel, w, b):
    # k=3, pad=1, stride=1 im2col + matmul + gelu
    B, T, Cin = mel.shape
    xp = jnp.pad(mel, ((0, 0), (1, 1), (0, 0)))
    idx = jnp.arange(T)[:, None] + jnp.arange(3)[None, :]
    patches = xp[:, idx, :].reshape(B * T, 3 * Cin)
    return pallas_matmul(patches, w, b, act="gelu").reshape(B, T, -1)


def conv2_pos(x, w, b, pos):
    # k=3, pad=1, stride=2 im2col + matmul + gelu + pos-emb add (fused)
    B, T, C = x.shape
    xp = jnp.pad(x, ((0, 0), (1, 1), (0, 0)))
    T_out = (T - 1) // 2 + 1
    idx = (jnp.arange(T_out) * 2)[:, None] + jnp.arange(3)[None, :]
    patches = xp[:, idx, :].reshape(B, T_out, 3 * C)
    D = w.shape[1]
    return pl.pallas_call(
        _conv2_pos_kernel,
        out_shape=jax.ShapeDtypeStruct((B, T_out, D), jnp.float32),
        grid=(B,),
        in_specs=[pl.BlockSpec((1, T_out, 3 * C), lambda i: (i, 0, 0)),
                  pl.BlockSpec((3 * C, D), lambda i: (0, 0)),
                  pl.BlockSpec((1, D), lambda i: (0, 0)),
                  pl.BlockSpec((T_out, D), lambda i: (0, 0))],
        out_specs=pl.BlockSpec((1, T_out, D), lambda i: (i, 0, 0)),
        compiler_params=pltpu.CompilerParams(dimension_semantics=("parallel",)),
    )(patches, w, b.reshape(1, D), pos)


def residual_block(x, p):
    B, T, D = x.shape
    x_flat = x.reshape(B * T, D)
    qkv = pallas_ln_matmul(x_flat, p["ln1_g"], p["ln1_b"], p["qkv_w"], p["qkv_b"])
    scale = float(D // N_HEADS) ** -0.25
    x = pallas_attn_oproj(qkv.reshape(B, T, 3 * D), x, p["o_w"], p["o_b"],
                          n_heads=N_HEADS, scale=scale)
    x_flat = pallas_ln_mlp_residual(x.reshape(B * T, D), p["ln2_g"], p["ln2_b"],
                                    p["mlp_w1"], p["mlp_b1"],
                                    p["mlp_w2"], p["mlp_b2"])
    return x_flat.reshape(B, T, D)


def audio_encoder(mel, params):
    x = conv1(mel, params["conv1_w"], params["conv1_b"])
    x = conv2_pos(x, params["conv2_w"], params["conv2_b"], params["pos_emb"])
    B, T, D = x.shape
    assert T == N_CTX, "incorrect audio shape"
    for blk in params["blocks"]:
        x = residual_block(x, blk)
    x = pallas_layernorm(x.reshape(B * T, D), params["lnp_g"], params["lnp_b"])
    return x.reshape(B, T, D)


def whisper_ppg_forward(params, audio, squeeze_out=True):
    # mirrors WhisperPPG.forward / pred_ppg_infer_t_batch
    if audio.ndim == 1:
        audio = audio[None, :]
    elif audio.ndim == 3:
        assert audio.shape[1] == 1
        audio = audio[:, 0, :]
    audln = audio.shape[-1]
    ppgln = audln // (2 * HOP)          # analogue of audln // 320 in whisper
    audio = pad_or_trim(audio, N_SAMPLES)
    mel = log_mel_spectrogram(audio, params)
    enc = audio_encoder(mel, params)
    out = enc[:, :ppgln, :]
    if out.shape[0] == 1 and squeeze_out:
        return out[0]
    return out


# ------------------------------ parameters -----------------------------------
def init_params(key):
    cnt = itertools.count()

    def rnd(shape, scale=0.02):
        return scale * jax.random.normal(jax.random.fold_in(key, next(cnt)),
                                         shape, jnp.float32)

    p = {}
    # Conv weights generated in PyTorch layout (Cout, Cin, K) then reshaped for im2col.
    w1 = rnd((D_MODEL, N_MELS, 3))
    p["conv1_w"] = jnp.transpose(w1, (2, 1, 0)).reshape(3 * N_MELS, D_MODEL)
    p["conv1_b"] = rnd((D_MODEL,))
    w2 = rnd((D_MODEL, D_MODEL, 3))
    p["conv2_w"] = jnp.transpose(w2, (2, 1, 0)).reshape(3 * D_MODEL, D_MODEL)
    p["conv2_b"] = rnd((D_MODEL,))
    p["pos_emb"] = sinusoids(N_CTX, D_MODEL)

    blocks = []
    for _ in range(N_LAYERS):
        q_w, k_w, v_w = rnd((D_MODEL, D_MODEL)), rnd((D_MODEL, D_MODEL)), rnd((D_MODEL, D_MODEL))
        q_b, v_b = rnd((D_MODEL,)), rnd((D_MODEL,))
        blocks.append(dict(
            ln1_g=jnp.ones((D_MODEL,), jnp.float32), ln1_b=jnp.zeros((D_MODEL,), jnp.float32),
            qkv_w=jnp.concatenate([q_w, k_w, v_w], axis=1),        # (D, 3D)
            qkv_b=jnp.concatenate([q_b, jnp.zeros((D_MODEL,), jnp.float32), v_b]),  # key: no bias
            o_w=rnd((D_MODEL, D_MODEL)), o_b=rnd((D_MODEL,)),
            ln2_g=jnp.ones((D_MODEL,), jnp.float32), ln2_b=jnp.zeros((D_MODEL,), jnp.float32),
            mlp_w1=rnd((D_MODEL, 4 * D_MODEL)), mlp_b1=rnd((4 * D_MODEL,)),
            mlp_w2=rnd((4 * D_MODEL, D_MODEL)), mlp_b2=rnd((D_MODEL,)),
        ))
    p["blocks"] = blocks
    p["lnp_g"] = jnp.ones((D_MODEL,), jnp.float32)
    p["lnp_b"] = jnp.zeros((D_MODEL,), jnp.float32)

    # fixed (non-trainable) buffers: DFT (re|im concatenated, freq padded to F_PAD)
    wr, wi = dft_matrices(N_FFT)                         # (N_FFT, 33) each
    wr = jnp.pad(wr, ((0, 0), (0, F_PAD - wr.shape[1])))
    wi = jnp.pad(wi, ((0, 0), (0, F_PAD - wi.shape[1])))
    p["dft_ri"] = jnp.concatenate([wr, wi], axis=1)      # (N_FFT, 2*F_PAD)
    fb = mel_filterbank(N_MELS, N_FFT // 2 + 1)          # (n_mels, 33)
    p["mel_fb_T"] = jnp.pad(fb.T, ((0, F_PAD - fb.shape[1]), (0, 0)))  # (F_PAD, n_mels)
    return p


# --------------------------------- main ---------------------------------------
if __name__ == "__main__":
    root = jax.random.PRNGKey(0)
    params = init_params(jax.random.fold_in(root, 1))
    # batched waveform input (B, L); L not a multiple of N_SAMPLES on purpose
    audio = 0.1 * jax.random.normal(jax.random.fold_in(root, 2), (2, 1600), jnp.float32)

    fwd = jax.jit(functools.partial(whisper_ppg_forward, params))
    out = jax.block_until_ready(fwd(audio))

    expected = (2, 1600 // (2 * HOP), D_MODEL)   # (2, 25, 128)
    assert out.shape == expected, (out.shape, expected)
    assert out.dtype == jnp.float32
    assert bool(jnp.all(jnp.isfinite(out)))
    print("KERNEL_OK")
</pallas_src>

<mosaic_0001>
module attributes {stable_mosaic.version = 11 : i64} {
  func.func @_logmel_kernel(%arg0: i32, %arg1: memref<1x65x64xf32, #tpu.memory_space<vmem>>, %arg2: memref<64x256xf32, #tpu.memory_space<vmem>>, %arg3: memref<128x16xf32, #tpu.memory_space<vmem>>, %arg4: memref<1x64x16xf32, #tpu.memory_space<vmem>>) attributes {dimension_semantics = [#tpu.dimension_semantics<parallel>], iteration_bounds = array<i64: 2>, scalar_prefetch = 0 : i64, scratch_operands = 0 : i64, tpu.core_type = #tpu.core_type<tc>, window_params = [{transform_indices = @transform_0, window_bounds = array<i64: 1, 65, 64>}, {pipeline_mode = #tpu.pipeline_mode<synchronous>, transform_indices = @transform_1, window_bounds = array<i64: 64, 256>}, {pipeline_mode = #tpu.pipeline_mode<synchronous>, transform_indices = @transform_2, window_bounds = array<i64: 128, 16>}, {transform_indices = @transform_3, window_bounds = array<i64: 1, 64, 16>}]} {
    %c0 = arith.constant 0 : index
    %c0_0 = arith.constant 0 : index
    %c0_1 = arith.constant 0 : index
    %0 = vector.load %arg1[%c0, %c0_0, %c0_1] : memref<1x65x64xf32, #tpu.memory_space<vmem>>, vector<1x65x64xf32>
    %1 = vector.shape_cast %0 : vector<1x65x64xf32> to vector<65x64xf32>
    %c0_2 = arith.constant 0 : index
    %c0_3 = arith.constant 0 : index
    %2 = vector.load %arg2[%c0_2, %c0_3] : memref<64x256xf32, #tpu.memory_space<vmem>>, vector<64x256xf32>
    %cst = arith.constant dense<0.000000e+00> : vector<65x256xf32>
    %3 = tpu.matmul %1, %2, %cst {dimension_numbers = #tpu.dot_dimension_numbers<[1], [0], [0], [1], [0, 0, 1, 1], [], []>} : vector<65x64xf32>, vector<64x256xf32>, vector<65x256xf32> -> vector<65x256xf32>
    %4 = vector.extract_strided_slice %3 {offsets = [0, 0], sizes = [65, 128], strides = [1, 1]} : vector<65x256xf32> to vector<65x128xf32>
    %5 = vector.extract_strided_slice %3 {offsets = [0, 128], sizes = [65, 128], strides = [1, 1]} : vector<65x256xf32> to vector<65x128xf32>
    %6 = arith.mulf %4, %4 : vector<65x128xf32>
    %7 = arith.mulf %5, %5 : vector<65x128xf32>
    %8 = arith.addf %6, %7 : vector<65x128xf32>
    %9 = vector.extract_strided_slice %8 {offsets = [0, 0], sizes = [64, 128], strides = [1, 1]} : vector<65x128xf32> to vector<64x128xf32>
    %c0_4 = arith.constant 0 : index
    %c0_5 = arith.constant 0 : index
    %10 = vector.load %arg3[%c0_4, %c0_5] : memref<128x16xf32, #tpu.memory_space<vmem>>, vector<128x16xf32>
    %cst_6 = arith.constant dense<0.000000e+00> : vector<64x16xf32>
    %11 = tpu.matmul %9, %10, %cst_6 {dimension_numbers = #tpu.dot_dimension_numbers<[1], [0], [0], [1], [0, 0, 1, 1], [], []>} : vector<64x128xf32>, vector<128x16xf32>, vector<64x16xf32> -> vector<64x16xf32>
    %cst_7 = arith.constant 1.000000e-10 : f32
    %12 = vector.broadcast %cst_7 : f32 to vector<64x16xf32>
    %13 = arith.maximumf %11, %12 : vector<64x16xf32>
    %14 = math.log %13 : vector<64x16xf32>
    %cst_8 = arith.constant 1.000000e+01 : f32
    %15 = math.log %cst_8 : f32
    %cst_9 = arith.constant 1.000000e+00 : f32
    %16 = arith.divf %cst_9, %15 : f32
    %17 = vector.broadcast %16 : f32 to vector<64x16xf32>
    %18 = arith.mulf %14, %17 : vector<64x16xf32>
    %19 = vector.shape_cast %18 : vector<64x16xf32> to vector<1x64x16xf32>
    %cst_10 = arith.constant dense<0xFF800000> : vector<1xf32>
    %20 = vector.multi_reduction <maximumf>, %19, %cst_10 [1, 2] : vector<1x64x16xf32> to vector<1xf32>
    %21 = vector.shape_cast %20 : vector<1xf32> to vector<1x1x1xf32>
    %22 = vector.extract %21[0, 0, 0] : f32 from vector<1x1x1xf32>
    %23 = vector.broadcast %22 : f32 to vector<1x1xf32>
    %cst_11 = arith.constant 8.000000e+00 : f32
    %24 = vector.broadcast %cst_11 : f32 to vector<1x1xf32>
    %25 = arith.subf %23, %24 : vector<1x1xf32>
    %26 = vector.broadcast %25 : vector<1x1xf32> to vector<64x16xf32>
    %27 = arith.maximumf %18, %26 : vector<64x16xf32>
    %cst_12 = arith.constant 4.000000e+00 : f32
    %28 = vector.broadcast %cst_12 : f32 to vector<64x16xf32>
    %29 = arith.addf %27, %28 : vector<64x16xf32>
    %cst_13 = arith.constant 4.000000e+00 : f32
    %30 = vector.broadcast %cst_13 : f32 to vector<64x16xf32>
    %31 = arith.divf %29, %30 : vector<64x16xf32>
    %c0_14 = arith.constant 0 : index
    %c0_15 = arith.constant 0 : index
    %c0_16 = arith.constant 0 : index
    %32 = vector.load %arg4[%c0_14, %c0_15, %c0_16] : memref<1x64x16xf32, #tpu.memory_space<vmem>>, vector<1x64x16xf32>
    %33 = vector.shape_cast %32 : vector<1x64x16xf32> to vector<64x16xf32>
    %34 = vector.shape_cast %31 : vector<64x16xf32> to vector<1x64x16xf32>
    tpu.vector_store %arg4[%c0_14, %c0_15, %c0_16], %34 {strides = array<i32>} : memref<1x64x16xf32, #tpu.memory_space<vmem>>, vector<1x64x16xf32>,
    return
  }
  func.func @transform_0(%arg0: i32) -> (i32, i32, i32) {
    %c0_i32 = arith.constant 0 : i32
    %c0_i32_0 = arith.constant 0 : i32
    %c0_i32_1 = arith.constant 0 : i32
    return %arg0, %c0_i32, %c0_i32_0 : i32, i32, i32
  }
  func.func @transform_1(%arg0: i32) -> (i32, i32) {
    %c0_i32 = arith.constant 0 : i32
    %c0_i32_0 = arith.constant 0 : i32
    %c0_i32_1 = arith.constant 0 : i32
    return %c0_i32, %c0_i32_0 : i32, i32
  }
  func.func @transform_2(%arg0: i32) -> (i32, i32) {
    %c0_i32 = arith.constant 0 : i32
    %c0_i32_0 = arith.constant 0 : i32
    %c0_i32_1 = arith.constant 0 : i32
    return %c0_i32, %c0_i32_0 : i32, i32
  }
  func.func @transform_3(%arg0: i32) -> (i32, i32, i32) {
    %c0_i32 = arith.constant 0 : i32
    %c0_i32_0 = arith.constant 0 : i32
    %c0_i32_1 = arith.constant 0 : i32
    return %arg0, %c0_i32, %c0_i32_0 : i32, i32, i32
  }
}

module attributes {stable_mosaic.version = 11 : i64} {
  func.func @_matmul_bias_kernel(%arg0: memref<128x48xf32, #tpu.memory_space<vmem>>, %arg1: memref<48x128xf32, #tpu.memory_space<vmem>>, %arg2: memref<1x128xf32, #tpu.memory_space<vmem>>, %arg3: memref<128x128xf32, #tpu.memory_space<vmem>>) attributes {dimension_semantics = [], scalar_prefetch = 0 : i64, scratch_operands = 0 : i64, tpu.core_type = #tpu.core_type<tc>} {
    %c0 = arith.constant 0 : index
    %c0_0 = arith.constant 0 : index
    %0 = vector.load %arg0[%c0, %c0_0] : memref<128x48xf32, #tpu.memory_space<vmem>>, vector<128x48xf32>
    %c0_1 = arith.constant 0 : index
    %c0_2 = arith.constant 0 : index
    %1 = vector.load %arg1[%c0_1, %c0_2] : memref<48x128xf32, #tpu.memory_space<vmem>>, vector<48x128xf32>
    %2 = arith.truncf %0 : vector<128x48xf32> to vector<128x48xbf16>
    %3 = arith.truncf %1 : vector<48x128xf32> to vector<48x128xbf16>
    %cst = arith.constant dense<0.000000e+00> : vector<128x128xf32>
    %4 = tpu.matmul %2, %3, %cst {dimension_numbers = #tpu.dot_dimension_numbers<[1], [0], [0], [1], [0, 0, 1, 1], [], []>} : vector<128x48xbf16>, vector<48x128xbf16>, vector<128x128xf32> -> vector<128x128xf32>
    %c0_3 = arith.constant 0 : index
    %c0_4 = arith.constant 0 : index
    %5 = vector.load %arg2[%c0_3, %c0_4] : memref<1x128xf32, #tpu.memory_space<vmem>>, vector<1x128xf32>
    %6 = vector.broadcast %5 : vector<1x128xf32> to vector<128x128xf32>
    %7 = arith.addf %4, %6 : vector<128x128xf32>
    %cst_5 = arith.constant 5.000000e-01 : f32
    %8 = vector.broadcast %cst_5 : f32 to vector<128x128xf32>
    %9 = arith.mulf %8, %7 : vector<128x128xf32>
    %cst_6 = arith.constant 4.471500e-02 : f32
    %10 = vector.broadcast %cst_6 : f32 to vector<128x128xf32>
    %11 = arith.mulf %10, %7 : vector<128x128xf32>
    %12 = arith.mulf %11, %7 : vector<128x128xf32>
    %13 = arith.mulf %12, %7 : vector<128x128xf32>
    %14 = arith.addf %7, %13 : vector<128x128xf32>
    %cst_7 = arith.constant 0.797884583 : f32
    %15 = vector.broadcast %cst_7 : f32 to vector<128x128xf32>
    %16 = arith.mulf %15, %14 : vector<128x128xf32>
    %17 = math.tanh %16 : vector<128x128xf32>
    %cst_8 = arith.constant 1.000000e+00 : f32
    %18 = vector.broadcast %cst_8 : f32 to vector<128x128xf32>
    %19 = arith.addf %18, %17 : vector<128x128xf32>
    %20 = arith.mulf %9, %19 : vector<128x128xf32>
    %c0_9 = arith.constant 0 : index
    %c0_10 = arith.constant 0 : index
    %21 = vector.load %arg3[%c0_9, %c0_10] : memref<128x128xf32, #tpu.memory_space<vmem>>, vector<128x128xf32>
    tpu.vector_store %arg3[%c0_9, %c0_10], %20 {strides = array<i32>} : memref<128x128xf32, #tpu.memory_space<vmem>>, vector<128x128xf32>,
    return
  }
}

module attributes {stable_mosaic.version = 11 : i64} {
  func.func @_conv2_pos_kernel(%arg0: i32, %arg1: memref<1x32x384xf32, #tpu.memory_space<vmem>>, %arg2: memref<384x128xf32, #tpu.memory_space<vmem>>, %arg3: memref<1x128xf32, #tpu.memory_space<vmem>>, %arg4: memref<32x128xf32, #tpu.memory_space<vmem>>, %arg5: memref<1x32x128xf32, #tpu.memory_space<vmem>>) attributes {dimension_semantics = [#tpu.dimension_semantics<parallel>], iteration_bounds = array<i64: 2>, scalar_prefetch = 0 : i64, scratch_operands = 0 : i64, tpu.core_type = #tpu.core_type<tc>, window_params = [{transform_indices = @transform_0, window_bounds = array<i64: 1, 32, 384>}, {pipeline_mode = #tpu.pipeline_mode<synchronous>, transform_indices = @transform_1, window_bounds = array<i64: 384, 128>}, {pipeline_mode = #tpu.pipeline_mode<synchronous>, transform_indices = @transform_2, window_bounds = array<i64: 1, 128>}, {pipeline_mode = #tpu.pipeline_mode<synchronous>, transform_indices = @transform_3, window_bounds = array<i64: 32, 128>}, {transform_indices = @transform_4, window_bounds = array<i64: 1, 32, 128>}]} {
    %c0 = arith.constant 0 : index
    %c0_0 = arith.constant 0 : index
    %c0_1 = arith.constant 0 : index
    %0 = vector.load %arg1[%c0, %c0_0, %c0_1] : memref<1x32x384xf32, #tpu.memory_space<vmem>>, vector<1x32x384xf32>
    %1 = vector.shape_cast %0 : vector<1x32x384xf32> to vector<32x384xf32>
    %c0_2 = arith.constant 0 : index
    %c0_3 = arith.constant 0 : index
    %2 = vector.load %arg2[%c0_2, %c0_3] : memref<384x128xf32, #tpu.memory_space<vmem>>, vector<384x128xf32>
    %3 = arith.truncf %1 : vector<32x384xf32> to vector<32x384xbf16>
    %4 = arith.truncf %2 : vector<384x128xf32> to vector<384x128xbf16>
    %cst = arith.constant dense<0.000000e+00> : vector<32x128xf32>
    %5 = tpu.matmul %3, %4, %cst {dimension_numbers = #tpu.dot_dimension_numbers<[1], [0], [0], [1], [0, 0, 1, 1], [], []>} : vector<32x384xbf16>, vector<384x128xbf16>, vector<32x128xf32> -> vector<32x128xf32>
    %c0_4 = arith.constant 0 : index
    %c0_5 = arith.constant 0 : index
    %6 = vector.load %arg3[%c0_4, %c0_5] : memref<1x128xf32, #tpu.memory_space<vmem>>, vector<1x128xf32>
    %7 = vector.broadcast %6 : vector<1x128xf32> to vector<32x128xf32>
    %8 = arith.addf %5, %7 : vector<32x128xf32>
    %cst_6 = arith.constant 5.000000e-01 : f32
    %9 = vector.broadcast %cst_6 : f32 to vector<32x128xf32>
    %10 = arith.mulf %9, %8 : vector<32x128xf32>
    %cst_7 = arith.constant 4.471500e-02 : f32
    %11 = vector.broadcast %cst_7 : f32 to vector<32x128xf32>
    %12 = arith.mulf %11, %8 : vector<32x128xf32>
    %13 = arith.mulf %12, %8 : vector<32x128xf32>
    %14 = arith.mulf %13, %8 : vector<32x128xf32>
    %15 = arith.addf %8, %14 : vector<32x128xf32>
    %cst_8 = arith.constant 0.797884583 : f32
    %16 = vector.broadcast %cst_8 : f32 to vector<32x128xf32>
    %17 = arith.mulf %16, %15 : vector<32x128xf32>
    %18 = math.tanh %17 : vector<32x128xf32>
    %cst_9 = arith.constant 1.000000e+00 : f32
    %19 = vector.broadcast %cst_9 : f32 to vector<32x128xf32>
    %20 = arith.addf %19, %18 : vector<32x128xf32>
    %21 = arith.mulf %10, %20 : vector<32x128xf32>
    %c0_10 = arith.constant 0 : index
    %c0_11 = arith.constant 0 : index
    %22 = vector.load %arg4[%c0_10, %c0_11] : memref<32x128xf32, #tpu.memory_space<vmem>>, vector<32x128xf32>
    %23 = arith.addf %21, %22 : vector<32x128xf32>
    %c0_12 = arith.constant 0 : index
    %c0_13 = arith.constant 0 : index
    %c0_14 = arith.constant 0 : index
    %24 = vector.load %arg5[%c0_12, %c0_13, %c0_14] : memref<1x32x128xf32, #tpu.memory_space<vmem>>, vector<1x32x128xf32>
    %25 = vector.shape_cast %24 : vector<1x32x128xf32> to vector<32x128xf32>
    %26 = vector.shape_cast %23 : vector<32x128xf32> to vector<1x32x128xf32>
    tpu.vector_store %arg5[%c0_12, %c0_13, %c0_14], %26 {strides = array<i32>} : memref<1x32x128xf32, #tpu.memory_space<vmem>>, vector<1x32x128xf32>,
    return
  }
  func.func @transform_0(%arg0: i32) -> (i32, i32, i32) {
    %c0_i32 = arith.constant 0 : i32
    %c0_i32_0 = arith.constant 0 : i32
    %c0_i32_1 = arith.constant 0 : i32
    return %arg0, %c0_i32, %c0_i32_0 : i32, i32, i32
  }
  func.func @transform_1(%arg0: i32) -> (i32, i32) {
    %c0_i32 = arith.constant 0 : i32
    %c0_i32_0 = arith.constant 0 : i32
    %c0_i32_1 = arith.constant 0 : i32
    return %c0_i32, %c0_i32_0 : i32, i32
  }
  func.func @transform_2(%arg0: i32) -> (i32, i32) {
    %c0_i32 = arith.constant 0 : i32
    %c0_i32_0 = arith.constant 0 : i32
    %c0_i32_1 = arith.constant 0 : i32
    return %c0_i32, %c0_i32_0 : i32, i32
  }
  func.func @transform_3(%arg0: i32) -> (i32, i32) {
    %c0_i32 = arith.constant 0 : i32
    %c0_i32_0 = arith.constant 0 : i32
    %c0_i32_1 = arith.constant 0 : i32
    return %c0_i32, %c0_i32_0 : i32, i32
  }
  func.func @transform_4(%arg0: i32) -> (i32, i32, i32) {
    %c0_i32 = arith.constant 0 : i32
    %c0_i32_0 = arith.constant 0 : i32
    %c0_i32_1 = arith.constant 0 : i32
    return %arg0, %c0_i32, %c0_i32_0 : i32, i32, i32
  }
}

module attributes {stable_mosaic.version = 11 : i64} {
  func.func @_ln_matmul_kernel(%arg0: memref<64x128xf32, #tpu.memory_space<vmem>>, %arg1: memref<1x128xf32, #tpu.memory_space<vmem>>, %arg2: memref<1x128xf32, #tpu.memory_space<vmem>>, %arg3: memref<128x384xf32, #tpu.memory_space<vmem>>, %arg4: memref<1x384xf32, #tpu.memory_space<vmem>>, %arg5: memref<64x384xf32, #tpu.memory_space<vmem>>) attributes {dimension_semantics = [], scalar_prefetch = 0 : i64, scratch_operands = 0 : i64, tpu.core_type = #tpu.core_type<tc>} {
    %c0 = arith.constant 0 : index
    %c0_0 = arith.constant 0 : index
    %0 = vector.load %arg0[%c0, %c0_0] : memref<64x128xf32, #tpu.memory_space<vmem>>, vector<64x128xf32>
    %c0_1 = arith.constant 0 : index
    %c0_2 = arith.constant 0 : index
    %1 = vector.load %arg1[%c0_1, %c0_2] : memref<1x128xf32, #tpu.memory_space<vmem>>, vector<1x128xf32>
    %c0_3 = arith.constant 0 : index
    %c0_4 = arith.constant 0 : index
    %2 = vector.load %arg2[%c0_3, %c0_4] : memref<1x128xf32, #tpu.memory_space<vmem>>, vector<1x128xf32>
    %cst = arith.constant dense<0.000000e+00> : vector<64xf32>
    %3 = vector.multi_reduction <add>, %0, %cst [1] : vector<64x128xf32> to vector<64xf32>
    %4 = vector.shape_cast %3 : vector<64xf32> to vector<64x1xf32>
    %cst_5 = arith.constant 1.280000e+02 : f32
    %5 = vector.broadcast %cst_5 : f32 to vector<64x1xf32>
    %6 = arith.divf %4, %5 : vector<64x1xf32>
    %7 = vector.broadcast %6 : vector<64x1xf32> to vector<64x128xf32>
    %8 = arith.subf %0, %7 : vector<64x128xf32>
    %9 = arith.mulf %8, %8 : vector<64x128xf32>
    %cst_6 = arith.constant dense<0.000000e+00> : vector<64xf32>
    %10 = vector.multi_reduction <add>, %9, %cst_6 [1] : vector<64x128xf32> to vector<64xf32>
    %11 = vector.shape_cast %10 : vector<64xf32> to vector<64x1xf32>
    %cst_7 = arith.constant 1.280000e+02 : f32
    %12 = vector.broadcast %cst_7 : f32 to vector<64x1xf32>
    %13 = arith.divf %11, %12 : vector<64x1xf32>
    %cst_8 = arith.constant 9.99999974E-6 : f32
    %14 = vector.broadcast %cst_8 : f32 to vector<64x1xf32>
    %15 = arith.addf %13, %14 : vector<64x1xf32>
    %16 = math.rsqrt %15 : vector<64x1xf32>
    %17 = vector.broadcast %16 : vector<64x1xf32> to vector<64x128xf32>
    %18 = arith.mulf %8, %17 : vector<64x128xf32>
    %19 = vector.broadcast %1 : vector<1x128xf32> to vector<64x128xf32>
    %20 = arith.mulf %18, %19 : vector<64x128xf32>
    %21 = vector.broadcast %2 : vector<1x128xf32> to vector<64x128xf32>
    %22 = arith.addf %20, %21 : vector<64x128xf32>
    %c0_9 = arith.constant 0 : index
    %c0_10 = arith.constant 0 : index
    %23 = vector.load %arg3[%c0_9, %c0_10] : memref<128x384xf32, #tpu.memory_space<vmem>>, vector<128x384xf32>
    %24 = arith.truncf %22 : vector<64x128xf32> to vector<64x128xbf16>
    %25 = arith.truncf %23 : vector<128x384xf32> to vector<128x384xbf16>
    %cst_11 = arith.constant dense<0.000000e+00> : vector<64x384xf32>
    %26 = tpu.matmul %24, %25, %cst_11 {dimension_numbers = #tpu.dot_dimension_numbers<[1], [0], [0], [1], [0, 0, 1, 1], [], []>} : vector<64x128xbf16>, vector<128x384xbf16>, vector<64x384xf32> -> vector<64x384xf32>
    %c0_12 = arith.constant 0 : index
    %c0_13 = arith.constant 0 : index
    %27 = vector.load %arg4[%c0_12, %c0_13] : memref<1x384xf32, #tpu.memory_space<vmem>>, vector<1x384xf32>
    %28 = vector.broadcast %27 : vector<1x384xf32> to vector<64x384xf32>
    %29 = arith.addf %26, %28 : vector<64x384xf32>
    %c0_14 = arith.constant 0 : index
    %c0_15 = arith.constant 0 : index
    %30 = vector.load %arg5[%c0_14, %c0_15] : memref<64x384xf32, #tpu.memory_space<vmem>>, vector<64x384xf32>
    tpu.vector_store %arg5[%c0_14, %c0_15], %29 {strides = array<i32>} : memref<64x384xf32, #tpu.memory_space<vmem>>, vector<64x384xf32>,
    return
  }
}

module attributes {stable_mosaic.version = 11 : i64} {
  func.func @_attn_oproj_res_kernel(%arg0: i32, %arg1: memref<1x32x384xf32, #tpu.memory_space<vmem>>, %arg2: memref<1x32x128xf32, #tpu.memory_space<vmem>>, %arg3: memref<128x128xf32, #tpu.memory_space<vmem>>, %arg4: memref<1x128xf32, #tpu.memory_space<vmem>>, %arg5: memref<1x32x128xf32, #tpu.memory_space<vmem>>) attributes {dimension_semantics = [#tpu.dimension_semantics<parallel>], iteration_bounds = array<i64: 2>, scalar_prefetch = 0 : i64, scratch_operands = 0 : i64, tpu.core_type = #tpu.core_type<tc>, window_params = [{transform_indices = @transform_0, window_bounds = array<i64: 1, 32, 384>}, {transform_indices = @transform_1, window_bounds = array<i64: 1, 32, 128>}, {pipeline_mode = #tpu.pipeline_mode<synchronous>, transform_indices = @transform_2, window_bounds = array<i64: 128, 128>}, {pipeline_mode = #tpu.pipeline_mode<synchronous>, transform_indices = @transform_3, window_bounds = array<i64: 1, 128>}, {transform_indices = @transform_4, window_bounds = array<i64: 1, 32, 128>}]} {
    %c0 = arith.constant 0 : index
    %c0_0 = arith.constant 0 : index
    %c0_1 = arith.constant 0 : index
    %0 = vector.load %arg1[%c0, %c0_0, %c0_1] : memref<1x32x384xf32, #tpu.memory_space<vmem>>, vector<1x32x384xf32>
    %1 = vector.shape_cast %0 : vector<1x32x384xf32> to vector<32x384xf32>
    %2 = vector.extract_strided_slice %1 {offsets = [0, 0], sizes = [32, 128], strides = [1, 1]} : vector<32x384xf32> to vector<32x128xf32>
    %cst = arith.constant 0.353553385 : f32
    %3 = vector.broadcast %cst : f32 to vector<32x128xf32>
    %4 = arith.mulf %2, %3 : vector<32x128xf32>
    %5 = vector.extract_strided_slice %1 {offsets = [0, 128], sizes = [32, 128], strides = [1, 1]} : vector<32x384xf32> to vector<32x128xf32>
    %cst_2 = arith.constant 0.353553385 : f32
    %6 = vector.broadcast %cst_2 : f32 to vector<32x128xf32>
    %7 = arith.mulf %5, %6 : vector<32x128xf32>
    %8 = vector.extract_strided_slice %1 {offsets = [0, 256], sizes = [32, 128], strides = [1, 1]} : vector<32x384xf32> to vector<32x128xf32>
    %9 = tpu.iota {dimensions = array<i32: 1>} : vector<1x128xi32>
    %cst_3 = arith.constant 0.000000e+00 : f32
    %10 = vector.broadcast %cst_3 : f32 to vector<32x128xf32>
    %c0_i32 = arith.constant 0 : i32
    %11 = vector.broadcast %c0_i32 : i32 to vector<1x128xi32>
    %12 = arith.cmpi sge, %9, %11 : vector<1x128xi32>
    %c64_i32 = arith.constant 64 : i32
    %13 = vector.broadcast %c64_i32 : i32 to vector<1x128xi32>
    %14 = arith.cmpi slt, %9, %13 : vector<1x128xi32>
    %15 = arith.andi %12, %14 : vector<1x128xi1>
    %16 = arith.extui %15 : vector<1x128xi1> to vector<1x128xi32>
    %17 = arith.sitofp %16 : vector<1x128xi32> to vector<1x128xf32>
    %18 = vector.broadcast %17 : vector<1x128xf32> to vector<32x128xf32>
    %19 = arith.mulf %4, %18 : vector<32x128xf32>
    %20 = arith.truncf %19 : vector<32x128xf32> to vector<32x128xbf16>
    %21 = arith.truncf %7 : vector<32x128xf32> to vector<32x128xbf16>
    %cst_4 = arith.constant dense<0.000000e+00> : vector<32x32xf32>
    %22 = tpu.matmul %20, %21, %cst_4 {dimension_numbers = #tpu.dot_dimension_numbers<[1], [1], [0], [0], [0, 0, 1, 0], [], []>} : vector<32x128xbf16>, vector<32x128xbf16>, vector<32x32xf32> -> vector<32x32xf32>
    %cst_5 = arith.constant dense<0xFF800000> : vector<32xf32>
    %23 = vector.multi_reduction <maximumf>, %22, %cst_5 [1] : vector<32x32xf32> to vector<32xf32>
    %24 = vector.shape_cast %23 : vector<32xf32> to vector<32x1xf32>
    %25 = vector.broadcast %24 : vector<32x1xf32> to vector<32x32xf32>
    %26 = arith.subf %22, %25 : vector<32x32xf32>
    %27 = math.exp %26 : vector<32x32xf32>
    %cst_6 = arith.constant dense<0.000000e+00> : vector<32xf32>
    %28 = vector.multi_reduction <add>, %27, %cst_6 [1] : vector<32x32xf32> to vector<32xf32>
    %29 = vector.shape_cast %28 : vector<32xf32> to vector<32x1xf32>
    %30 = tpu.reciprocal %29 {approx = true} : vector<32x1xf32> -> vector<32x1xf32>
    %31 = vector.broadcast %30 : vector<32x1xf32> to vector<32x32xf32>
    %32 = arith.mulf %27, %31 : vector<32x32xf32>
    %33 = arith.truncf %32 : vector<32x32xf32> to vector<32x32xbf16>
    %34 = vector.broadcast %17 : vector<1x128xf32> to vector<32x128xf32>
    %35 = arith.mulf %8, %34 : vector<32x128xf32>
    %36 = arith.truncf %35 : vector<32x128xf32> to vector<32x128xbf16>
    %cst_7 = arith.constant dense<0.000000e+00> : vector<32x128xf32>
    %37 = tpu.matmul %33, %36, %cst_7 {dimension_numbers = #tpu.dot_dimension_numbers<[1], [0], [0], [1], [0, 0, 1, 1], [], []>} : vector<32x32xbf16>, vector<32x128xbf16>, vector<32x128xf32> -> vector<32x128xf32>
    %38 = arith.addf %10, %37 : vector<32x128xf32>
    %c64_i32_8 = arith.constant 64 : i32
    %39 = vector.broadcast %c64_i32_8 : i32 to vector<1x128xi32>
    %40 = arith.cmpi sge, %9, %39 : vector<1x128xi32>
    %c128_i32 = arith.constant 128 : i32
    %41 = vector.broadcast %c128_i32 : i32 to vector<1x128xi32>
    %42 = arith.cmpi slt, %9, %41 : vector<1x128xi32>
    %43 = arith.andi %40, %42 : vector<1x128xi1>
    %44 = arith.extui %43 : vector<1x128xi1> to vector<1x128xi32>
    %45 = arith.sitofp %44 : vector<1x128xi32> to vector<1x128xf32>
    %46 = vector.broadcast %45 : vector<1x128xf32> to vector<32x128xf32>
    %47 = arith.mulf %4, %46 : vector<32x128xf32>
    %48 = arith.truncf %47 : vector<32x128xf32> to vector<32x128xbf16>
    %49 = arith.truncf %7 : vector<32x128xf32> to vector<32x128xbf16>
    %cst_9 = arith.constant dense<0.000000e+00> : vector<32x32xf32>
    %50 = tpu.matmul %48, %49, %cst_9 {dimension_numbers = #tpu.dot_dimension_numbers<[1], [1], [0], [0], [0, 0, 1, 0], [], []>} : vector<32x128xbf16>, vector<32x128xbf16>, vector<32x32xf32> -> vector<32x32xf32>
    %cst_10 = arith.constant dense<0xFF800000> : vector<32xf32>
    %51 = vector.multi_reduction <maximumf>, %50, %cst_10 [1] : vector<32x32xf32> to vector<32xf32>
    %52 = vector.shape_cast %51 : vector<32xf32> to vector<32x1xf32>
    %53 = vector.broadcast %52 : vector<32x1xf32> to vector<32x32xf32>
    %54 = arith.subf %50, %53 : vector<32x32xf32>
    %55 = math.exp %54 : vector<32x32xf32>
    %cst_11 = arith.constant dense<0.000000e+00> : vector<32xf32>
    %56 = vector.multi_reduction <add>, %55, %cst_11 [1] : vector<32x32xf32> to vector<32xf32>
    %57 = vector.shape_cast %56 : vector<32xf32> to vector<32x1xf32>
    %58 = tpu.reciprocal %57 {approx = true} : vector<32x1xf32> -> vector<32x1xf32>
    %59 = vector.broadcast %58 : vector<32x1xf32> to vector<32x32xf32>
    %60 = arith.mulf %55, %59 : vector<32x32xf32>
    %61 = arith.truncf %60 : vector<32x32xf32> to vector<32x32xbf16>
    %62 = vector.broadcast %45 : vector<1x128xf32> to vector<32x128xf32>
    %63 = arith.mulf %8, %62 : vector<32x128xf32>
    %64 = arith.truncf %63 : vector<32x128xf32> to vector<32x128xbf16>
    %cst_12 = arith.constant dense<0.000000e+00> : vector<32x128xf32>
    %65 = tpu.matmul %61, %64, %cst_12 {dimension_numbers = #tpu.dot_dimension_numbers<[1], [0], [0], [1], [0, 0, 1, 1], [], []>} : vector<32x32xbf16>, vector<32x128xbf16>, vector<32x128xf32> -> vector<32x128xf32>
    %66 = arith.addf %38, %65 : vector<32x128xf32>
    %c0_13 = arith.constant 0 : index
    %c0_14 = arith.constant 0 : index
    %67 = vector.load %arg3[%c0_13, %c0_14] : memref<128x128xf32, #tpu.memory_space<vmem>>, vector<128x128xf32>
    %68 = arith.truncf %66 : vector<32x128xf32> to vector<32x128xbf16>
    %69 = arith.truncf %67 : vector<128x128xf32> to vector<128x128xbf16>
    %cst_15 = arith.constant dense<0.000000e+00> : vector<32x128xf32>
    %70 = tpu.matmul %68, %69, %cst_15 {dimension_numbers = #tpu.dot_dimension_numbers<[1], [0], [0], [1], [0, 0, 1, 1], [], []>} : vector<32x128xbf16>, vector<128x128xbf16>, vector<32x128xf32> -> vector<32x128xf32>
    %c0_16 = arith.constant 0 : index
    %c0_17 = arith.constant 0 : index
    %71 = vector.load %arg4[%c0_16, %c0_17] : memref<1x128xf32, #tpu.memory_space<vmem>>, vector<1x128xf32>
    %72 = vector.broadcast %71 : vector<1x128xf32> to vector<32x128xf32>
    %73 = arith.addf %70, %72 : vector<32x128xf32>
    %c0_18 = arith.constant 0 : index
    %c0_19 = arith.constant 0 : index
    %c0_20 = arith.constant 0 : index
    %74 = vector.load %arg2[%c0_18, %c0_19, %c0_20] : memref<1x32x128xf32, #tpu.memory_space<vmem>>, vector<1x32x128xf32>
    %75 = vector.shape_cast %74 : vector<1x32x128xf32> to vector<32x128xf32>
    %76 = arith.addf %75, %73 : vector<32x128xf32>
    %c0_21 = arith.constant 0 : index
    %c0_22 = arith.constant 0 : index
    %c0_23 = arith.constant 0 : index
    %77 = vector.load %arg5[%c0_21, %c0_22, %c0_23] : memref<1x32x128xf32, #tpu.memory_space<vmem>>, vector<1x32x128xf32>
    %78 = vector.shape_cast %77 : vector<1x32x128xf32> to vector<32x128xf32>
    %79 = vector.shape_cast %76 : vector<32x128xf32> to vector<1x32x128xf32>
    tpu.vector_store %arg5[%c0_21, %c0_22, %c0_23], %79 {strides = array<i32>} : memref<1x32x128xf32, #tpu.memory_space<vmem>>, vector<1x32x128xf32>,
    return
  }
  func.func @transform_0(%arg0: i32) -> (i32, i32, i32) {
    %c0_i32 = arith.constant 0 : i32
    %c0_i32_0 = arith.constant 0 : i32
    %c0_i32_1 = arith.constant 0 : i32
    return %arg0, %c0_i32, %c0_i32_0 : i32, i32, i32
  }
  func.func @transform_1(%arg0: i32) -> (i32, i32, i32) {
    %c0_i32 = arith.constant 0 : i32
    %c0_i32_0 = arith.constant 0 : i32
    %c0_i32_1 = arith.constant 0 : i32
    return %arg0, %c0_i32, %c0_i32_0 : i32, i32, i32
  }
  func.func @transform_2(%arg0: i32) -> (i32, i32) {
    %c0_i32 = arith.constant 0 : i32
    %c0_i32_0 = arith.constant 0 : i32
    %c0_i32_1 = arith.constant 0 : i32
    return %c0_i32, %c0_i32_0 : i32, i32
  }
  func.func @transform_3(%arg0: i32) -> (i32, i32) {
    %c0_i32 = arith.constant 0 : i32
    %c0_i32_0 = arith.constant 0 : i32
    %c0_i32_1 = arith.constant 0 : i32
    return %c0_i32, %c0_i32_0 : i32, i32
  }
  func.func @transform_4(%arg0: i32) -> (i32, i32, i32) {
    %c0_i32 = arith.constant 0 : i32
    %c0_i32_0 = arith.constant 0 : i32
    %c0_i32_1 = arith.constant 0 : i32
    return %arg0, %c0_i32, %c0_i32_0 : i32, i32, i32
  }
}

module attributes {stable_mosaic.version = 11 : i64} {
  func.func @_ln_mlp_res_kernel(%arg0: memref<64x128xf32, #tpu.memory_space<vmem>>, %arg1: memref<1x128xf32, #tpu.memory_space<vmem>>, %arg2: memref<1x128xf32, #tpu.memory_space<vmem>>, %arg3: memref<128x512xf32, #tpu.memory_space<vmem>>, %arg4: memref<1x512xf32, #tpu.memory_space<vmem>>, %arg5: memref<512x128xf32, #tpu.memory_space<vmem>>, %arg6: memref<1x128xf32, #tpu.memory_space<vmem>>, %arg7: memref<64x128xf32, #tpu.memory_space<vmem>>) attributes {dimension_semantics = [], scalar_prefetch = 0 : i64, scratch_operands = 0 : i64, tpu.core_type = #tpu.core_type<tc>} {
    %c0 = arith.constant 0 : index
    %c0_0 = arith.constant 0 : index
    %0 = vector.load %arg0[%c0, %c0_0] : memref<64x128xf32, #tpu.memory_space<vmem>>, vector<64x128xf32>
    %c0_1 = arith.constant 0 : index
    %c0_2 = arith.constant 0 : index
    %1 = vector.load %arg1[%c0_1, %c0_2] : memref<1x128xf32, #tpu.memory_space<vmem>>, vector<1x128xf32>
    %c0_3 = arith.constant 0 : index
    %c0_4 = arith.constant 0 : index
    %2 = vector.load %arg2[%c0_3, %c0_4] : memref<1x128xf32, #tpu.memory_space<vmem>>, vector<1x128xf32>
    %cst = arith.constant dense<0.000000e+00> : vector<64xf32>
    %3 = vector.multi_reduction <add>, %0, %cst [1] : vector<64x128xf32> to vector<64xf32>
    %4 = vector.shape_cast %3 : vector<64xf32> to vector<64x1xf32>
    %cst_5 = arith.constant 1.280000e+02 : f32
    %5 = vector.broadcast %cst_5 : f32 to vector<64x1xf32>
    %6 = arith.divf %4, %5 : vector<64x1xf32>
    %7 = vector.broadcast %6 : vector<64x1xf32> to vector<64x128xf32>
    %8 = arith.subf %0, %7 : vector<64x128xf32>
    %9 = arith.mulf %8, %8 : vector<64x128xf32>
    %cst_6 = arith.constant dense<0.000000e+00> : vector<64xf32>
    %10 = vector.multi_reduction <add>, %9, %cst_6 [1] : vector<64x128xf32> to vector<64xf32>
    %11 = vector.shape_cast %10 : vector<64xf32> to vector<64x1xf32>
    %cst_7 = arith.constant 1.280000e+02 : f32
    %12 = vector.broadcast %cst_7 : f32 to vector<64x1xf32>
    %13 = arith.divf %11, %12 : vector<64x1xf32>
    %cst_8 = arith.constant 9.99999974E-6 : f32
    %14 = vector.broadcast %cst_8 : f32 to vector<64x1xf32>
    %15 = arith.addf %13, %14 : vector<64x1xf32>
    %16 = math.rsqrt %15 : vector<64x1xf32>
    %17 = vector.broadcast %16 : vector<64x1xf32> to vector<64x128xf32>
    %18 = arith.mulf %8, %17 : vector<64x128xf32>
    %19 = vector.broadcast %1 : vector<1x128xf32> to vector<64x128xf32>
    %20 = arith.mulf %18, %19 : vector<64x128xf32>
    %21 = vector.broadcast %2 : vector<1x128xf32> to vector<64x128xf32>
    %22 = arith.addf %20, %21 : vector<64x128xf32>
    %c0_9 = arith.constant 0 : index
    %c0_10 = arith.constant 0 : index
    %23 = vector.load %arg3[%c0_9, %c0_10] : memref<128x512xf32, #tpu.memory_space<vmem>>, vector<128x512xf32>
    %24 = arith.truncf %22 : vector<64x128xf32> to vector<64x128xbf16>
    %25 = arith.truncf %23 : vector<128x512xf32> to vector<128x512xbf16>
    %cst_11 = arith.constant dense<0.000000e+00> : vector<64x512xf32>
    %26 = tpu.matmul %24, %25, %cst_11 {dimension_numbers = #tpu.dot_dimension_numbers<[1], [0], [0], [1], [0, 0, 1, 1], [], []>} : vector<64x128xbf16>, vector<128x512xbf16>, vector<64x512xf32> -> vector<64x512xf32>
    %c0_12 = arith.constant 0 : index
    %c0_13 = arith.constant 0 : index
    %27 = vector.load %arg4[%c0_12, %c0_13] : memref<1x512xf32, #tpu.memory_space<vmem>>, vector<1x512xf32>
    %28 = vector.broadcast %27 : vector<1x512xf32> to vector<64x512xf32>
    %29 = arith.addf %26, %28 : vector<64x512xf32>
    %cst_14 = arith.constant 5.000000e-01 : f32
    %30 = vector.broadcast %cst_14 : f32 to vector<64x512xf32>
    %31 = arith.mulf %30, %29 : vector<64x512xf32>
    %cst_15 = arith.constant 4.471500e-02 : f32
    %32 = vector.broadcast %cst_15 : f32 to vector<64x512xf32>
    %33 = arith.mulf %32, %29 : vector<64x512xf32>
    %34 = arith.mulf %33, %29 : vector<64x512xf32>
    %35 = arith.mulf %34, %29 : vector<64x512xf32>
    %36 = arith.addf %29, %35 : vector<64x512xf32>
    %cst_16 = arith.constant 0.797884583 : f32
    %37 = vector.broadcast %cst_16 : f32 to vector<64x512xf32>
    %38 = arith.mulf %37, %36 : vector<64x512xf32>
    %39 = math.tanh %38 : vector<64x512xf32>
    %cst_17 = arith.constant 1.000000e+00 : f32
    %40 = vector.broadcast %cst_17 : f32 to vector<64x512xf32>
    %41 = arith.addf %40, %39 : vector<64x512xf32>
    %42 = arith.mulf %31, %41 : vector<64x512xf32>
    %c0_18 = arith.constant 0 : index
    %c0_19 = arith.constant 0 : index
    %43 = vector.load %arg5[%c0_18, %c0_19] : memref<512x128xf32, #tpu.memory_space<vmem>>, vector<512x128xf32>
    %44 = arith.truncf %42 : vector<64x512xf32> to vector<64x512xbf16>
    %45 = arith.truncf %43 : vector<512x128xf32> to vector<512x128xbf16>
    %cst_20 = arith.constant dense<0.000000e+00> : vector<64x128xf32>
    %46 = tpu.matmul %44, %45, %cst_20 {dimension_numbers = #tpu.dot_dimension_numbers<[1], [0], [0], [1], [0, 0, 1, 1], [], []>} : vector<64x512xbf16>, vector<512x128xbf16>, vector<64x128xf32> -> vector<64x128xf32>
    %47 = arith.addf %0, %46 : vector<64x128xf32>
    %c0_21 = arith.constant 0 : index
    %c0_22 = arith.constant 0 : index
    %48 = vector.load %arg6[%c0_21, %c0_22] : memref<1x128xf32, #tpu.memory_space<vmem>>, vector<1x128xf32>
    %49 = vector.broadcast %48 : vector<1x128xf32> to vector<64x128xf32>
    %50 = arith.addf %47, %49 : vector<64x128xf32>
    %c0_23 = arith.constant 0 : index
    %c0_24 = arith.constant 0 : index
    %51 = vector.load %arg7[%c0_23, %c0_24] : memref<64x128xf32, #tpu.memory_space<vmem>>, vector<64x128xf32>
    tpu.vector_store %arg7[%c0_23, %c0_24], %50 {strides = array<i32>} : memref<64x128xf32, #tpu.memory_space<vmem>>, vector<64x128xf32>,
    return
  }
}

module attributes {stable_mosaic.version = 11 : i64} {
  func.func @_layernorm_kernel(%arg0: memref<64x128xf32, #tpu.memory_space<vmem>>, %arg1: memref<1x128xf32, #tpu.memory_space<vmem>>, %arg2: memref<1x128xf32, #tpu.memory_space<vmem>>, %arg3: memref<64x128xf32, #tpu.memory_space<vmem>>) attributes {dimension_semantics = [], scalar_prefetch = 0 : i64, scratch_operands = 0 : i64, tpu.core_type = #tpu.core_type<tc>} {
    %c0 = arith.constant 0 : index
    %c0_0 = arith.constant 0 : index
    %0 = vector.load %arg0[%c0, %c0_0] : memref<64x128xf32, #tpu.memory_space<vmem>>, vector<64x128xf32>
    %c0_1 = arith.constant 0 : index
    %c0_2 = arith.constant 0 : index
    %1 = vector.load %arg1[%c0_1, %c0_2] : memref<1x128xf32, #tpu.memory_space<vmem>>, vector<1x128xf32>
    %c0_3 = arith.constant 0 : index
    %c0_4 = arith.constant 0 : index
    %2 = vector.load %arg2[%c0_3, %c0_4] : memref<1x128xf32, #tpu.memory_space<vmem>>, vector<1x128xf32>
    %cst = arith.constant dense<0.000000e+00> : vector<64xf32>
    %3 = vector.multi_reduction <add>, %0, %cst [1] : vector<64x128xf32> to vector<64xf32>
    %4 = vector.shape_cast %3 : vector<64xf32> to vector<64x1xf32>
    %cst_5 = arith.constant 1.280000e+02 : f32
    %5 = vector.broadcast %cst_5 : f32 to vector<64x1xf32>
    %6 = arith.divf %4, %5 : vector<64x1xf32>
    %7 = vector.broadcast %6 : vector<64x1xf32> to vector<64x128xf32>
    %8 = arith.subf %0, %7 : vector<64x128xf32>
    %9 = arith.mulf %8, %8 : vector<64x128xf32>
    %cst_6 = arith.constant dense<0.000000e+00> : vector<64xf32>
    %10 = vector.multi_reduction <add>, %9, %cst_6 [1] : vector<64x128xf32> to vector<64xf32>
    %11 = vector.shape_cast %10 : vector<64xf32> to vector<64x1xf32>
    %cst_7 = arith.constant 1.280000e+02 : f32
    %12 = vector.broadcast %cst_7 : f32 to vector<64x1xf32>
    %13 = arith.divf %11, %12 : vector<64x1xf32>
    %cst_8 = arith.constant 9.99999974E-6 : f32
    %14 = vector.broadcast %cst_8 : f32 to vector<64x1xf32>
    %15 = arith.addf %13, %14 : vector<64x1xf32>
    %16 = math.rsqrt %15 : vector<64x1xf32>
    %17 = vector.broadcast %16 : vector<64x1xf32> to vector<64x128xf32>
    %18 = arith.mulf %8, %17 : vector<64x128xf32>
    %19 = vector.broadcast %1 : vector<1x128xf32> to vector<64x128xf32>
    %20 = arith.mulf %18, %19 : vector<64x128xf32>
    %21 = vector.broadcast %2 : vector<1x128xf32> to vector<64x128xf32>
    %22 = arith.addf %20, %21 : vector<64x128xf32>
    %c0_9 = arith.constant 0 : index
    %c0_10 = arith.constant 0 : index
    %23 = vector.load %arg3[%c0_9, %c0_10] : memref<64x128xf32, #tpu.memory_space<vmem>>, vector<64x128xf32>
    tpu.vector_store %arg3[%c0_9, %c0_10], %22 {strides = array<i32>} : memref<64x128xf32, #tpu.memory_space<vmem>>, vector<64x128xf32>,
    return
  }
}

</mosaic_0001>

<bundles_post_ra>
// kernel: whisper_ppg_forward.10
= control target key start
LH: loop header
LB: loop body
LE: loop exit
PB: predicated region body
PF: predicated region fallthrough
CT: control target
= control target key end

     0   :  { %s649_s12 = smov 0   ;;  %s815_s0 = inlined_call_operand.vmem [shape: f32[2,65,64], index: 0, kind: input, shape index: {}]   ;;  %s816_s1 = inlined_call_operand.vmem [shape: f32[64,256], index: 1, kind: input, shape index: {}]   ;;  %s817_s2 = inlined_call_operand.vmem [shape: f32[128,16], index: 2, kind: input, shape index: {}]   ;;  %s818_s3 = inlined_call_operand.vmem [shape: f32[2,64,16], index: 3, kind: output, shape index: {}]  }
   0x1 LB: > { %s544_s13 = sadd.s32 4294967295, %s626_s12   ;;  %p548_p0 = scmp.ge.s32.totalorder %s626_s12, 1  ;;  %s626_s12 = sphi %s649_s12, %s13_s12  }
   0x2   : > { %p137_p1 = scmp.lt.s32.totalorder %s626_s12, 3 }
   0x4   : > { %p138_p2 = pnand %p548_p0, %p137_p1 }
   0x5   : > { %p161_p3 = scmp.lt.s32.totalorder (!%p138_p2), %s544_s13, 1 }
   0x6   : > { %141 = sbr.rel (%p138_p2) target bundleno = 560 (0x230), region = 32 }
   0xb   : > { %v194_v0 = vld [vmem:[%s816_s1 + $0x70] sm:$0xff]  ;;  %v195_v1 = vld [vmem:[%s816_s1 + $0x78] sm:$0xff]  ;;  %v192_v2 = vld [vmem:[%s816_s1 + $0x60] sm:$0xff]  ;;  %s820_s13 = smov (!%p161_p3, %s544_s13), 1  ;;  %vm196_vm0 = vcmask 523264   ;;  %vm423_vm1 = vcmask 130048  }
   0xc   : > { %232 = vmatpush.msra.mxu0 %v194_v0  ;;  %275 = vmatpush.msra.mxu1 %v195_v1  ;;  %v193_v3 = vld [vmem:[%s816_s1 + $0x68] sm:$0xff]  ;;  %v190_v4 = vld [vmem:[%s816_s1 + $0x50] sm:$0xff]  ;;  %v191_v5 = vld [vmem:[%s816_s1 + $0x58] sm:$0xff]  ;;  %s590_s7 = smul.u32 72, %s820_s13  ;;  %s573_s6 = sshll.u32 %s820_s13, 6 }
   0xd   : > { %v188_v6 = vld [vmem:[%s816_s1 + $0x40] sm:$0xff]  ;;  %v189_v7 = vld [vmem:[%s816_s1 + $0x48] sm:$0xff]  ;;  %v186_v8 = vld [vmem:[%s816_s1 + $0x30] sm:$0xff]  ;;  %s170_s9 = scalar_lea.vmem %s818_s3, %s573_s6 }
   0xe   : > { %233 = vmatpush.msra.mxu0 %v192_v2  ;;  %276 = vmatpush.msra.mxu1 %v193_v3  ;;  %v187_v9 = vld [vmem:[%s816_s1 + $0x38] sm:$0xff]  ;;  %v184_v10 = vld [vmem:[%s816_s1 + $0x20] sm:$0xff]  ;;  %v185_v11 = vld [vmem:[%s816_s1 + $0x28] sm:$0xff]  ;;  %s705_s20 = scalar_lea.vmem %s815_s0, %s590_s7 }
   0xf   : > { %v182_v12 = vld [vmem:[%s816_s1 + $0x10] sm:$0xff]  ;;  %v183_v13 = vld [vmem:[%s816_s1 + $0x18] sm:$0xff]  ;;  %v180_v14 = vld [vmem:[%s816_s1] sm:$0xff] }
  0x10   : > { %234 = vmatpush.msra.mxu0 %v190_v4  ;;  %277 = vmatpush.msra.mxu1 %v191_v5  ;;  %v181_v15 = vld [vmem:[%s816_s1 + $0x8] sm:$0xff]  ;;  %v171_v16 = vld [vmem:[%s705_s20] sm:$0xff]  ;;  %v173_v18 = vld [vmem:[%s705_s20 + $0x10] sm:$0xff] }
  0x11   : > { %v172_v17 = vld [vmem:[%s705_s20 + $0x8] sm:$0xff]  ;;  %v174_v19 = vld [vmem:[%s705_s20 + $0x18] sm:$0xff]  ;;  %v348_v21 = vld [vmem:[%s817_s2 + $0x70] sm:$0xff] }
  0x12   : > { %235 = vmatpush.msra.mxu0 %v188_v6  ;;  %278 = vmatpush.msra.mxu1 %v189_v7  ;;  %v349_v20 = vld [vmem:[%s817_s2 + $0x78] sm:$0xff]  ;;  %v347_v22 = vld [vmem:[%s817_s2 + $0x68] sm:$0xff]  ;;  %v346_v23 = vld [vmem:[%s817_s2 + $0x60] sm:$0xff] }
  0x13   : > { %350 = vmatpush.msra.mxu2 %v349_v20  ;;  %574 = vmatpush.msra.mxu3 %v349_v20  ;;  %v175_v24 = vld [vmem:[%s705_s20 + $0x20] sm:$0xff]  ;;  %v345_v25 = vld [vmem:[%s817_s2 + $0x58] sm:$0xff]  ;;  %v344_v26 = vld [vmem:[%s817_s2 + $0x50] sm:$0xff] }
  0x14   : > { %236 = vmatpush.msra.mxu0 %v186_v8  ;;  %279 = vmatpush.msra.mxu1 %v187_v9  ;;  %v343_v27 = vld [vmem:[%s817_s2 + $0x48] sm:$0xff]  ;;  %v342_v28 = vld [vmem:[%s817_s2 + $0x40] sm:$0xff]  ;;  %v341_v30 = vld [vmem:[%s817_s2 + $0x38] sm:$0xff] }
  0x15   : > { %351 = vmatpush.msra.mxu2 %v348_v21  ;;  %575 = vmatpush.msra.mxu3 %v348_v21  ;;  %v176_v29 = vld [vmem:[%s705_s20 + $0x28] sm:$0xff]  ;;  %v340_v31 = vld [vmem:[%s817_s2 + $0x30] sm:$0xff]  ;;  %v338_v33 = vld [vmem:[%s817_s2 + $0x20] sm:$0xff] }
  0x16   : > { %237 = vmatpush.msra.mxu0 %v184_v10  ;;  %280 = vmatpush.msra.mxu1 %v185_v11  ;;  %v339_v32 = vld [vmem:[%s817_s2 + $0x28] sm:$0xff]  ;;  %v177_v34 = vld [vmem:[%s705_s20 + $0x30] sm:$0xff]  ;;  %v337_v35 = vld [vmem:[%s817_s2 + $0x18] sm:$0xff] }
  0x17   : > { %352 = vmatpush.msra.mxu2 %v347_v22  ;;  %576 = vmatpush.msra.mxu3 %v347_v22  ;;  %v178_v36 = vld [vmem:[%s705_s20 + $0x38] sm:$0xff]  ;;  %v336_v37 = vld [vmem:[%s817_s2 + $0x10] sm:$0xff]  ;;  %v335_v38 = vld [vmem:[%s817_s2 + $0x8] sm:$0xff] }
  0x18   : > { %238 = vmatpush.msra.mxu0 %v182_v12  ;;  %281 = vmatpush.msra.mxu1 %v183_v13  ;;  %v334_v39 = vld [vmem:[%s817_s2] sm:$0xff] }
  0x19   : > { %353 = vmatpush.msra.mxu2 %v346_v23  ;;  %577 = vmatpush.msra.mxu3 %v346_v23 }
  0x1a   : > { %239 = vmatpush.msra.mxu0 %v180_v14  ;;  %282 = vmatpush.msra.mxu1 %v181_v15 }
  0x1b   : > { %552 = vmatmul.msk.f32.vlgmr.msra.gmra.mxu0 %vm196_vm0, %v171_v16  ;;  %561 = vmatmul.msk.f32.vlgmr.msra.gmra.mxu1 %vm196_vm0, %v171_v16 }
  0x1c   : > { %354 = vmatpush.msra.mxu2 %v345_v25  ;;  %578 = vmatpush.msra.mxu3 %v345_v25  ;;  %v179_v25 = vld [vmem:[%s705_s20 + $0x40] sm:$0x1] }
  0x1e   : > { %355 = vmatpush.msra.mxu2 %v344_v26  ;;  %579 = vmatpush.msra.mxu3 %v344_v26 }
  0x20   : > { %356 = vmatpush.msra.mxu2 %v343_v27  ;;  %580 = vmatpush.msra.mxu3 %v343_v27 }
  0x22   : > { %357 = vmatpush.msra.mxu2 %v342_v28  ;;  %581 = vmatpush.msra.mxu3 %v342_v28 }
  0x23   : > { %553 = vmatmul.msk.f32.gmra.mxu0 %vm196_vm0, %v172_v17  ;;  %562 = vmatmul.msk.f32.gmra.mxu1 %vm196_vm0, %v172_v17 }
  0x24   : > { %358 = vmatpush.msra.mxu2 %v341_v30  ;;  %582 = vmatpush.msra.mxu3 %v341_v30 }
  0x26   : > { %359 = vmatpush.msra.mxu2 %v340_v31  ;;  %583 = vmatpush.msra.mxu3 %v340_v31 }
  0x28   : > { %360 = vmatpush.msra.mxu2 %v339_v32  ;;  %584 = vmatpush.msra.mxu3 %v339_v32 }
  0x2a   : > { %361 = vmatpush.msra.mxu2 %v338_v33  ;;  %585 = vmatpush.msra.mxu3 %v338_v33 }
  0x2b   : > { %554 = vmatmul.msk.f32.gmra.mxu0 %vm196_vm0, %v173_v18  ;;  %563 = vmatmul.msk.f32.gmra.mxu1 %vm196_vm0, %v173_v18 }
  0x2c   : > { %362 = vmatpush.msra.mxu2 %v337_v35  ;;  %586 = vmatpush.msra.mxu3 %v337_v35 }
  0x2e   : > { %363 = vmatpush.msra.mxu2 %v336_v37  ;;  %587 = vmatpush.msra.mxu3 %v336_v37 }
  0x30   : > { %364 = vmatpush.msra.mxu2 %v335_v38  ;;  %588 = vmatpush.msra.mxu3 %v335_v38 }
  0x32   : > { %365 = vmatpush.msra.mxu2 %v334_v39  ;;  %589 = vmatpush.msra.mxu3 %v334_v39 }
  0x33   : > { %555 = vmatmul.msk.f32.gmra.mxu0 %vm196_vm0, %v174_v19  ;;  %564 = vmatmul.msk.f32.gmra.mxu1 %vm196_vm0, %v174_v19 }
  0x3b   : > { %556 = vmatmul.msk.f32.gmra.mxu0 %vm196_vm0, %v175_v24  ;;  %565 = vmatmul.msk.f32.gmra.mxu1 %vm196_vm0, %v175_v24 }
  0x43   : > { %557 = vmatmul.msk.f32.gmra.mxu0 %vm196_vm0, %v176_v29  ;;  %566 = vmatmul.msk.f32.gmra.mxu1 %vm196_vm0, %v176_v29 }
  0x4b   : > { %558 = vmatmul.msk.f32.gmra.mxu0 %vm196_vm0, %v177_v34  ;;  %567 = vmatmul.msk.f32.gmra.mxu1 %vm196_vm0, %v177_v34 }
  0x53   : > { %559 = vmatmul.msk.f32.gmra.mxu0 %vm196_vm0, %v178_v36  ;;  %568 = vmatmul.msk.f32.gmra.mxu1 %vm196_vm0, %v178_v36 }
  0x5b   : > { %560 = vmatmul.msk.f32.gmra.mxu0 %vm196_vm0, %v179_v25  ;;  %569 = vmatmul.msk.f32.gmra.mxu1 %vm196_vm0, %v179_v25 }
  0x98   : > { %v241_v40 = vpop.f32.mrf.mxu0  ;;  %v284_v41 = vpop.f32.mrf.mxu1 }
  0x99   : > { %v310_v42 = vmul.f32 %v241_v40, %v241_v40  ;;  %v318_v43 = vmul.f32 %v284_v41, %v284_v41 }
  0x9b   : > { %v326_v44 = vadd.f32 %v318_v43, %v310_v42 }
  0x9d   : > { %366 = vmatmul.f32.vlgmr.msra.gmra.mxu2 %v326_v44 }
  0xa0   : > { %v244_v45 = vpop.f32.mrf.mxu0  ;;  %v287_v46 = vpop.f32.mrf.mxu1 }
  0xa1   : > { %v311_v47 = vmul.f32 %v244_v45, %v244_v45  ;;  %v319_v48 = vmul.f32 %v287_v46, %v287_v46 }
  0xa3   : > { %v327_v49 = vadd.f32 %v319_v48, %v311_v47 }
  0xa5   : > { %369 = vmatmul.f32.gmra.mxu2 %v327_v49 }
  0xa8   : > { %v247_v50 = vpop.f32.mrf.mxu0  ;;  %v290_v51 = vpop.f32.mrf.mxu1 }
  0xa9   : > { %v312_v52 = vmul.f32 %v247_v50, %v247_v50  ;;  %v320_v53 = vmul.f32 %v290_v51, %v290_v51 }
  0xab   : > { %v328_v54 = vadd.f32 %v320_v53, %v312_v52 }
  0xad   : > { %372 = vmatmul.f32.gmra.mxu2 %v328_v54 }
  0xb0   : > { %v250_v55 = vpop.f32.mrf.mxu0  ;;  %v293_v56 = vpop.f32.mrf.mxu1 }
  0xb1   : > { %v313_v57 = vmul.f32 %v250_v55, %v250_v55  ;;  %v321_v58 = vmul.f32 %v293_v56, %v293_v56 }
  0xb3   : > { %v329_v59 = vadd.f32 %v321_v58, %v313_v57 }
  0xb5   : > { %375 = vmatmul.f32.gmra.mxu2 %v329_v59 }
  0xb8   : > { %v253_v60 = vpop.f32.mrf.mxu0  ;;  %v296_v61 = vpop.f32.mrf.mxu1 }
  0xb9   : > { %v314_v62 = vmul.f32 %v253_v60, %v253_v60  ;;  %v322_v63 = vmul.f32 %v296_v61, %v296_v61 }
  0xbb   : > { %v330_v0 = vadd.f32 %v322_v63, %v314_v62 }
  0xbd   : > { %378 = vmatmul.f32.gmra.mxu2 %v330_v0 }
  0xc0   : > { %v256_v1 = vpop.f32.mrf.mxu0  ;;  %v299_v2 = vpop.f32.mrf.mxu1 }
  0xc1   : > { %v315_v3 = vmul.f32 %v256_v1, %v256_v1  ;;  %v323_v4 = vmul.f32 %v299_v2, %v299_v2 }
  0xc3   : > { %v331_v5 = vadd.f32 %v323_v4, %v315_v3 }
  0xc5   : > { %381 = vmatmul.f32.gmra.mxu2 %v331_v5 }
  0xc8   : > { %v259_v6 = vpop.f32.mrf.mxu0  ;;  %v302_v7 = vpop.f32.mrf.mxu1 }
  0xc9   : > { %v316_v8 = vmul.f32 %v259_v6, %v259_v6  ;;  %v324_v9 = vmul.f32 %v302_v7, %v302_v7 }
  0xcb   : > { %v332_v10 = vadd.f32 %v324_v9, %v316_v8 }
  0xcd   : > { %384 = vmatmul.f32.vlgmr.msra.gmra.mxu3 %v332_v10 }
  0xd0   : > { %v262_v11 = vpop.f32.mrf.mxu0  ;;  %v305_v12 = vpop.f32.mrf.mxu1 }
  0xd1   : > { %v317_v13 = vmul.f32 %v262_v11, %v262_v11  ;;  %v325_v14 = vmul.f32 %v305_v12, %v305_v12 }
  0xd3   : > { %v333_v15 = vadd.f32 %v325_v14, %v317_v13 }
  0xd5   : > { %387 = vmatmul.f32.gmra.mxu3 %v333_v15 }
  0xd8   : > { %v265_v8 = vpop.f32.mrf.mxu0  ;;  %v308_v9 = vpop.f32.mrf.mxu1 }
 0x120   : > { %v367_v16 = vpop.f32.mrf.mxu2 }
 0x121   : > { %v391_v22 = vmax.f32 %v367_v16, 1e-10 }
 0x123   : > { %602 = vlog2.f32 %v391_v22 }
 0x128   : > { %v370_v17 = vpop.f32.mrf.mxu2 }
 0x129   : > { %v392_v23 = vmax.f32 %v370_v17, 1e-10  ;;  %v603_v31 = vpop.eup %602  ;;  %v628_v17 = vmov 4.0  }
 0x12a   : > { %v400_v44 = vmul.f32 0.6931472, %v603_v31 }
 0x12b   : > { %604 = vlog2.f32 %v392_v23 }
 0x12c   : > { %v415_v52 = vmul.f32 0.43429446, %v400_v44 }
 0x12e   : > { %v424_v63 = vsel %vm423_vm1, %v415_v52, -inf }
 0x130   : > { %v373_v18 = vpop.f32.mrf.mxu2 }
 0x131   : > { %v393_v27 = vmax.f32 %v373_v18, 1e-10  ;;  %v605_v32 = vpop.eup %604 }
 0x132   : > { %v402_v41 = vmul.f32 0.6931472, %v605_v32 }
 0x134   : > { %v416_v48 = vmul.f32 0.43429446, %v402_v41 }
 0x136   : > { %v425_v58 = vsel %vm423_vm1, %v416_v48, -inf }
 0x138   : > { %v376_v19 = vpop.f32.mrf.mxu2 }
 0x139   : > { %v394_v29 = vmax.f32 %v376_v19, 1e-10 }
 0x140   : > { %v379_v20 = vpop.f32.mrf.mxu2 }
 0x141   : > { %v395_v26 = vmax.f32 %v379_v20, 1e-10 }
 0x148   : > { %v382_v21 = vpop.f32.mrf.mxu2 }
 0x149   : > { %v396_v24 = vmax.f32 %v382_v21, 1e-10 }
 0x14b   : > { %606 = vlog2.f32 %v396_v24 }
 0x14c   : > { %608 = vlog2.f32 %v395_v26 }
 0x150   : > { %v385_v28 = vpop.f32.mrf.mxu3 }
 0x151   : > { %v397_v30 = vmax.f32 %v385_v28, 1e-10  ;;  %v607_v33 = vpop.eup %606 }
 0x152   : > { %v609_v34 = vpop.eup %608  ;;  %v410_v39 = vmul.f32 0.6931472, %v607_v33 }
 0x153   : > { %610 = vlog2.f32 %v397_v30  ;;  %v408_v42 = vmul.f32 0.6931472, %v609_v34 }
 0x154   : > { %612 = vlog2.f32 %v393_v27  ;;  %v788_v47 = vmul.f32 0.43429446, %v410_v39 }
 0x155   : > { %614 = vlog2.f32 %v394_v29  ;;  %v419_v49 = vmul.f32 0.43429446, %v408_v42 }
 0x156   : > { %v430_v55 = vsel %vm423_vm1, %v788_v47, -inf }
 0x157   : > { %v428_v59 = vsel %vm423_vm1, %v419_v49, -inf  ;;  %v431_v61 = vmax.f32 %v425_v58, %v430_v55 }
 0x158   : > { %v388_v35 = vpop.f32.mrf.mxu3  ;;  %v429_v2 = vmax.f32 %v424_v63, %v428_v59 }
 0x159   : > { %v611_v36 = vpop.eup %610  ;;  %v398_v37 = vmax.f32 %v388_v35, 1e-10 }
 0x15a   : > { %v613_v38 = vpop.eup %612  ;;  %v412_v43 = vmul.f32 0.6931472, %v611_v36  ;;  %v436_v5 = vmax.f32 %v429_v2, %v431_v61 }
 0x15b   : > { %v615_v40 = vpop.eup %614  ;;  %616 = vlog2.f32 %v398_v37  ;;  %v404_v45 = vmul.f32 0.6931472, %v613_v38 }
 0x15c   : > { %v406_v46 = vmul.f32 0.6931472, %v615_v40  ;;  %v421_v50 = vmul.f32 0.43429446, %v412_v43  ;;  %618 = vrcp.f32 %v628_v17 }
 0x15d   : > { %v417_v53 = vmul.f32 0.43429446, %v404_v45 }
 0x15e   : > { %v418_v54 = vmul.f32 0.43429446, %v406_v46  ;;  %v432_v60 = vsel %vm423_vm1, %v421_v50, -inf }
 0x15f   : > { %v426_v0 = vsel %vm423_vm1, %v417_v53, -inf }
 0x160   : > { %v427_v1 = vsel %vm423_vm1, %v418_v54, -inf  ;;  %v433_v3 = vmax.f32 %v426_v0, %v432_v60 }
 0x161   : > { %v617_v51 = vpop.eup %616 }
 0x162   : > { %v414_v56 = vmul.f32 0.6931472, %v617_v51  ;;  %v619_v18 = vpop.eup %618 }
 0x163   : > { %v467_v19 = vmul.f32 4.0, %v619_v18  ;;  %vm471_vm2 = vweird.f32 %v619_v18 }
 0x164   : > { %v422_v57 = vmul.f32 0.43429446, %v414_v56 }
 0x165   : > { %v468_v20 = vsub.f32 1.0, %v467_v19 }
 0x166   : > { %v434_v62 = vsel %vm423_vm1, %v422_v57, -inf }
 0x167   : > { %v435_v4 = vmax.f32 %v427_v1, %v434_v62  ;;  %v469_v21 = vmul.f32 %v619_v18, %v468_v20 }
 0x169   : > { %v437_v6 = vmax.f32 %v433_v3, %v435_v4  ;;  %v470_v22 = vadd.f32 %v619_v18, %v469_v21 }
 0x16b   : > { %v438_v7 = vmax.f32 %v436_v5, %v437_v6  ;;  %v472_v25 = vsel %vm471_vm2, %v619_v18, %v470_v22 }
 0x16d   : > { %439 = vmax.xlane.f32.xlu0 %v438_v7 }
 0x1e0   : > { %v440_v10 = vpop.xlane.xlu0 %439 }
 0x1e1   : > { %v441_v11 = vrot.slane %v440_v10, 4 }
 0x1e3   : > { %v442_v12 = vmax.f32 %v440_v10, %v441_v11 }
 0x1e5   : > { %v443_v13 = vrot.slane %v442_v12, 2 }
 0x1e7   : > { %v444_v14 = vmax.f32 %v442_v12, %v443_v13 }
 0x1e9   : > { %v445_v15 = vrot.slane %v444_v14, 1 }
 0x1eb   : > { %v446_v16 = vmax.f32 %v444_v14, %v445_v15 }
 0x1ed   : > { %591 = vpush %v446_v16 }
 0x21e   : > { %s592_s20 = spop %591 }
 0x21f   : > { %v448_v23 = vstv %s592_s20 }
 0x220   : > { %v570_v24 = vadd.f32 -8.0, %v448_v23 }
 0x222   : > { %v450_v26 = vmax.f32 %v415_v52, %v570_v24  ;;  %v451_v27 = vmax.f32 %v416_v48, %v570_v24  ;;  %v452_v28 = vmax.f32 %v417_v53, %v570_v24  ;;  %v453_v29 = vmax.f32 %v418_v54, %v570_v24 }
 0x223   : > { %v454_v30 = vmax.f32 %v419_v49, %v570_v24  ;;  %v455_v31 = vmax.f32 %v788_v47, %v570_v24  ;;  %v456_v32 = vmax.f32 %v421_v50, %v570_v24  ;;  %v457_v33 = vmax.f32 %v422_v57, %v570_v24 }
 0x224   : > { %v458_v34 = vadd.f32 4.0, %v450_v26  ;;  %v459_v35 = vadd.f32 4.0, %v451_v27  ;;  %v460_v36 = vadd.f32 4.0, %v452_v28  ;;  %v461_v37 = vadd.f32 4.0, %v453_v29 }
 0x225   : > { %v462_v38 = vadd.f32 4.0, %v454_v30  ;;  %v463_v39 = vadd.f32 4.0, %v455_v31  ;;  %v464_v40 = vadd.f32 4.0, %v456_v32  ;;  %v465_v44 = vadd.f32 4.0, %v457_v33 }
 0x226   : > { %v473_v41 = vmul.f32 %v472_v25, %v458_v34  ;;  %v474_v42 = vmul.f32 %v472_v25, %v459_v35  ;;  %v475_v43 = vmul.f32 %v472_v25, %v460_v36  ;;  %v476_v45 = vmul.f32 %v472_v25, %v461_v37 }
 0x227   : > { %v477_v46 = vmul.f32 %v472_v25, %v462_v38  ;;  %v478_v47 = vmul.f32 %v472_v25, %v463_v39  ;;  %v479_v48 = vmul.f32 %v472_v25, %v464_v40  ;;  %v480_v49 = vmul.f32 %v472_v25, %v465_v44 }
 0x228   : > { %481 = vst.msk [vmem:[%s170_s9] sm:$0xff] %vm423_vm1, %v473_v41 }
 0x229   : > { %482 = vst.msk [vmem:[%s170_s9 + $0x8] sm:$0xff] %vm423_vm1, %v474_v42 }
 0x22a   : > { %483 = vst.msk [vmem:[%s170_s9 + $0x10] sm:$0xff] %vm423_vm1, %v475_v43 }
 0x22b   : > { %484 = vst.msk [vmem:[%s170_s9 + $0x18] sm:$0xff] %vm423_vm1, %v476_v45 }
 0x22c   : > { %485 = vst.msk [vmem:[%s170_s9 + $0x20] sm:$0xff] %vm423_vm1, %v477_v46 }
 0x22d   : > { %486 = vst.msk [vmem:[%s170_s9 + $0x28] sm:$0xff] %vm423_vm1, %v478_v47 }
 0x22e   : > { %487 = vst.msk [vmem:[%s170_s9 + $0x30] sm:$0xff] %vm423_vm1, %v479_v48 }
 0x22f   : > { %488 = vst.msk [vmem:[%s170_s9 + $0x38] sm:$0xff] %vm423_vm1, %v480_v49 }
 0x230 PF: > { %s13_s12 = sadd.s32 1, %s626_s12  }
 0x231   : > { %p10_p4 = scmp.ge.s32.totalorder %s13_s12, 4  }
 0x233   :  { %12 = sbr.rel (!%p10_p4) target bundleno = 1 (0x1), region = 62 }

// kernel: whisper_ppg_forward.11
= control target key start
LH: loop header
LB: loop body
LE: loop exit
PB: predicated region body
PF: predicated region fallthrough
CT: control target
= control target key end

     0   :  { %vm52_vm0 = vcmask 392192   ;;  %s587_s1 = inlined_call_operand.vmem [shape: f32[48,128], index: 1, kind: input, shape index: {}]   ;;  %s588_s0 = inlined_call_operand.vmem [shape: f32[128,48], index: 0, kind: input, shape index: {}]   ;;  %s589_s2 = inlined_call_operand.vmem [shape: f32[1,128], index: 2, kind: input, shape index: {}]   ;;  %s590_s3 = inlined_call_operand.vmem [shape: f32[128,128], index: 3, kind: output, shape index: {}]  }
   0x1   :  { %v35_v0 = vld [vmem:[%s587_s1 + $0x20] sm:$0xff]  ;;  %v36_v1 = vld [vmem:[%s587_s1 + $0x28] sm:$0xff]  ;;  %v33_v2 = vld [vmem:[%s587_s1 + $0x10] sm:$0xff] }
   0x2   :  { %v47_v3 = vpack.c.bf16 %v36_v1, %v35_v0  ;;  %v34_v4 = vld [vmem:[%s587_s1 + $0x18] sm:$0xff]  ;;  %v31_v6 = vld [vmem:[%s587_s1] sm:$0xff]  ;;  %v32_v7 = vld [vmem:[%s587_s1 + $0x8] sm:$0xff] }
   0x3   :  { %v46_v5 = vpack.c.bf16 %v34_v4, %v33_v2  ;;  %v15_v8 = vld [vmem:[%s588_s0] sm:$0xff]  ;;  %v16_v9 = vld [vmem:[%s588_s0 + $0x8] sm:$0xff]  ;;  %v45_v11 = vpack.c.bf16 %v32_v7, %v31_v6  ;;  %v17_v21 = vld [vmem:[%s588_s0 + $0x10] sm:$0xff] }
   0x4   :  { %82 = vmatpush.bf16.msra.mxu0 %v47_v3  ;;  %298 = vmatpush.bf16.msra.mxu1 %v47_v3  ;;  %v19_v10 = vld [vmem:[%s588_s0 + $0x20] sm:$0xff]  ;;  %v20_v12 = vld [vmem:[%s588_s0 + $0x28] sm:$0xff]  ;;  %v37_v17 = vpack.c.bf16 %v16_v9, %v15_v8  ;;  %v18_v22 = vld [vmem:[%s588_s0 + $0x18] sm:$0xff] }
   0x5   :  { %299 = vmatpush.bf16.msra.mxu2 %v47_v3  ;;  %300 = vmatpush.bf16.msra.mxu3 %v47_v3  ;;  %v23_v13 = vld [vmem:[%s588_s0 + $0x40] sm:$0xff]  ;;  %v24_v14 = vld [vmem:[%s588_s0 + $0x48] sm:$0xff]  ;;  %v39_v18 = vpack.c.bf16 %v20_v12, %v19_v10  ;;  %v21_v23 = vld [vmem:[%s588_s0 + $0x30] sm:$0xff]  ;;  %v38_v29 = vpack.c.bf16 %v18_v22, %v17_v21 }
   0x6   :  { %v27_v15 = vld [vmem:[%s588_s0 + $0x60] sm:$0xff]  ;;  %v28_v16 = vld [vmem:[%s588_s0 + $0x68] sm:$0xff]  ;;  %v41_v19 = vpack.c.bf16 %v24_v14, %v23_v13  ;;  %v22_v24 = vld [vmem:[%s588_s0 + $0x38] sm:$0xff] }
   0x7   :  { %v43_v20 = vpack.c.bf16 %v28_v16, %v27_v15  ;;  %v25_v25 = vld [vmem:[%s588_s0 + $0x50] sm:$0xff]  ;;  %v26_v26 = vld [vmem:[%s588_s0 + $0x58] sm:$0xff]  ;;  %v40_v30 = vpack.c.bf16 %v22_v24, %v21_v23  ;;  %v437_v33 = vld [vmem:[%s589_s2] ss:$0 sm:$0xff] }
   0x8   :  { %83 = vmatpush.bf16.msra.mxu0 %v46_v5  ;;  %301 = vmatpush.bf16.msra.mxu1 %v46_v5  ;;  %v29_v27 = vld [vmem:[%s588_s0 + $0x70] sm:$0xff]  ;;  %v30_v28 = vld [vmem:[%s588_s0 + $0x78] sm:$0xff]  ;;  %v42_v31 = vpack.c.bf16 %v26_v26, %v25_v25 }
   0x9   :  { %302 = vmatpush.bf16.msra.mxu2 %v46_v5  ;;  %303 = vmatpush.bf16.msra.mxu3 %v46_v5  ;;  %v44_v32 = vpack.c.bf16 %v30_v28, %v29_v27 }
   0xc   :  { %84 = vmatpush.bf16.msra.mxu0 %v45_v11  ;;  %304 = vmatpush.bf16.msra.mxu1 %v45_v11 }
   0xd   :  { %305 = vmatpush.bf16.msra.mxu2 %v45_v11  ;;  %306 = vmatpush.bf16.msra.mxu3 %v45_v11 }
   0xf   :  { %290 = vmatmul.msk.bf16.vlgmr.msra.gmra.mxu0 %vm52_vm0, %v37_v17  ;;  %292 = vmatmul.msk.bf16.vlgmr.msra.gmra.mxu1 %vm52_vm0, %v39_v18 }
  0x10   :  { %294 = vmatmul.msk.bf16.vlgmr.msra.gmra.mxu2 %vm52_vm0, %v41_v19  ;;  %296 = vmatmul.msk.bf16.vlgmr.msra.gmra.mxu3 %vm52_vm0, %v43_v20 }
  0x1f   :  { %291 = vmatmul.msk.bf16.gmra.mxu0 %vm52_vm0, %v38_v29  ;;  %293 = vmatmul.msk.bf16.gmra.mxu1 %vm52_vm0, %v40_v30 }
  0x20   :  { %295 = vmatmul.msk.bf16.gmra.mxu2 %vm52_vm0, %v42_v31  ;;  %297 = vmatmul.msk.bf16.gmra.mxu3 %vm52_vm0, %v44_v32 }
  0x8c   :  { %v86_v34 = vpop.f32.mrf.mxu0  ;;  %v96_v35 = vpop.f32.mrf.mxu1 }
  0x8d   :  { %v87_v36 = vadd.f32 %v437_v33, %v86_v34  ;;  %v97_v37 = vadd.f32 %v437_v33, %v96_v35 }
  0x8f   :  { %v142_v38 = vmul.f32 0.044715, %v87_v36  ;;  %v146_v39 = vmul.f32 0.044715, %v97_v37  ;;  %v126_v10 = vmul.f32 0.5, %v87_v36  ;;  %v130_v11 = vmul.f32 0.5, %v97_v37 }
  0x91   :  { %v158_v40 = vmul.f32 %v142_v38, %v87_v36  ;;  %v162_v41 = vmul.f32 %v146_v39, %v97_v37 }
  0x93   :  { %v174_v42 = vmul.f32 %v158_v40, %v87_v36  ;;  %v178_v43 = vmul.f32 %v162_v41, %v97_v37  ;;  %v106_v44 = vpop.f32.mrf.mxu2  ;;  %v116_v45 = vpop.f32.mrf.mxu3 }
  0x94   :  { %v107_v46 = vadd.f32 %v437_v33, %v106_v44  ;;  %v117_v47 = vadd.f32 %v437_v33, %v116_v45  ;;  %v88_v48 = vpop.f32.mrf.mxu0  ;;  %v98_v49 = vpop.f32.mrf.mxu1 }
  0x95   :  { %v190_v50 = vadd.f32 %v174_v42, %v87_v36  ;;  %v194_v51 = vadd.f32 %v178_v43, %v97_v37  ;;  %v444_v52 = vadd.f32 %v437_v33, %v88_v48  ;;  %v447_v53 = vadd.f32 %v437_v33, %v98_v49 }
  0x96   :  { %v150_v54 = vmul.f32 0.044715, %v107_v46  ;;  %v154_v55 = vmul.f32 0.044715, %v117_v47  ;;  %v134_v19 = vmul.f32 0.5, %v107_v46  ;;  %v138_v35 = vmul.f32 0.5, %v117_v47 }
  0x97   :  { %v206_v56 = vmul.f32 0.7978846, %v190_v50  ;;  %v210_v57 = vmul.f32 0.7978846, %v194_v51  ;;  %v143_v60 = vmul.f32 0.044715, %v444_v52 }
  0x98   :  { %v166_v58 = vmul.f32 %v150_v54, %v107_v46  ;;  %v170_v59 = vmul.f32 %v154_v55, %v117_v47  ;;  %v147_v61 = vmul.f32 0.044715, %v447_v53  ;;  %v127_v45 = vmul.f32 0.5, %v444_v52 }
  0x99   :  { %308 = vtanh.f32 %v206_v56  ;;  %v159_v0 = vmul.f32 %v143_v60, %v444_v52 }
  0x9a   :  { %310 = vtanh.f32 %v210_v57  ;;  %v182_v62 = vmul.f32 %v166_v58, %v107_v46  ;;  %v186_v63 = vmul.f32 %v170_v59, %v117_v47  ;;  %v163_v1 = vmul.f32 %v147_v61, %v447_v53 }
  0x9b   :  { %v108_v2 = vpop.f32.mrf.mxu2  ;;  %v118_v3 = vpop.f32.mrf.mxu3  ;;  %v175_v6 = vmul.f32 %v159_v0, %v444_v52 }
  0x9c   :  { %v198_v4 = vadd.f32 %v182_v62, %v107_v46  ;;  %v202_v5 = vadd.f32 %v186_v63, %v117_v47  ;;  %v455_v7 = vadd.f32 %v437_v33, %v108_v2  ;;  %v91_v8 = vpop.f32.mrf.mxu0  ;;  %v101_v9 = vpop.f32.mrf.mxu1  ;;  %v179_v12 = vmul.f32 %v163_v1, %v447_v53 }
  0x9d   :  { %v459_v13 = vadd.f32 %v437_v33, %v118_v3  ;;  %v191_v16 = vadd.f32 %v175_v6, %v444_v52  ;;  %v463_v17 = vadd.f32 %v437_v33, %v91_v8  ;;  %v469_v26 = vadd.f32 %v437_v33, %v101_v9 }
  0x9e   :  { %v214_v14 = vmul.f32 0.7978846, %v198_v4  ;;  %v218_v15 = vmul.f32 0.7978846, %v202_v5  ;;  %v195_v20 = vadd.f32 %v179_v12, %v447_v53  ;;  %v151_v21 = vmul.f32 0.044715, %v455_v7 }
  0x9f   :  { %v309_v18 = vpop.eup %308  ;;  %v155_v22 = vmul.f32 0.044715, %v459_v13  ;;  %v207_v25 = vmul.f32 0.7978846, %v191_v16  ;;  %v144_v32 = vmul.f32 0.044715, %v463_v17 }
  0xa0   :  { %v311_v23 = vpop.eup %310  ;;  %v238_v24 = vadd.f32 1.0, %v309_v18  ;;  %312 = vtanh.f32 %v214_v14  ;;  %v211_v28 = vmul.f32 0.7978846, %v195_v20  ;;  %v167_v29 = vmul.f32 %v151_v21, %v455_v7 }
  0xa1   :  { %v242_v27 = vadd.f32 1.0, %v311_v23  ;;  %314 = vtanh.f32 %v218_v15  ;;  %v171_v31 = vmul.f32 %v155_v22, %v459_v13  ;;  %v160_v40 = vmul.f32 %v144_v32, %v463_v17 }
  0xa2   :  { %v254_v30 = vmul.f32 %v238_v24, %v126_v10  ;;  %316 = vtanh.f32 %v207_v25  ;;  %v183_v36 = vmul.f32 %v167_v29, %v455_v7  ;;  %v148_v41 = vmul.f32 0.044715, %v469_v26 }
  0xa3   :  { %v258_v34 = vmul.f32 %v242_v27, %v130_v11  ;;  %318 = vtanh.f32 %v211_v28  ;;  %v111_v37 = vpop.f32.mrf.mxu2  ;;  %v121_v38 = vpop.f32.mrf.mxu3  ;;  %v187_v39 = vmul.f32 %v171_v31, %v459_v13  ;;  %v131_v46 = vmul.f32 0.5, %v447_v53 }
  0xa4   :  { %270 = vst [vmem:[%s590_s3] sm:$0xff] %v254_v30  ;;  %v482_v42 = vadd.f32 %v437_v33, %v111_v37  ;;  %v93_v43 = vpop.f32.mrf.mxu0  ;;  %v103_v44 = vpop.f32.mrf.mxu1  ;;  %v199_v47 = vadd.f32 %v183_v36, %v455_v7  ;;  %v491_v48 = vadd.f32 %v437_v33, %v121_v38  ;;  %v176_v51 = vmul.f32 %v160_v40, %v463_v17 }
  0xa5   :  { %274 = vst [vmem:[%s590_s3 + $0x20] sm:$0xff] %v258_v34  ;;  %v203_v50 = vadd.f32 %v187_v39, %v459_v13  ;;  %v164_v54 = vmul.f32 %v148_v41, %v469_v26  ;;  %v497_v55 = vadd.f32 %v437_v33, %v93_v43  ;;  %v501_v58 = vadd.f32 %v437_v33, %v103_v44 }
  0xa6   :  { %v313_v49 = vpop.eup %312  ;;  %v215_v52 = vmul.f32 0.7978846, %v199_v47  ;;  %v152_v53 = vmul.f32 0.044715, %v482_v42  ;;  %v192_v62 = vadd.f32 %v176_v51, %v463_v17  ;;  %v156_v11 = vmul.f32 0.044715, %v491_v48 }
  0xa7   :  { %v315_v56 = vpop.eup %314  ;;  %v246_v57 = vadd.f32 1.0, %v313_v49  ;;  %v219_v61 = vmul.f32 0.7978846, %v203_v50  ;;  %v180_v63 = vmul.f32 %v164_v54, %v469_v26  ;;  %v145_v15 = vmul.f32 0.044715, %v497_v55 }
  0xa8   :  { %v317_v59 = vpop.eup %316  ;;  %v250_v60 = vadd.f32 1.0, %v315_v56  ;;  %320 = vtanh.f32 %v215_v52  ;;  %v168_v3 = vmul.f32 %v152_v53, %v482_v42  ;;  %v208_v6 = vmul.f32 0.7978846, %v192_v62 }
  0xa9   :  { %v319_v0 = vpop.eup %318  ;;  %v262_v1 = vmul.f32 %v246_v57, %v134_v19  ;;  %v239_v2 = vadd.f32 1.0, %v317_v59  ;;  %322 = vtanh.f32 %v219_v61  ;;  %v196_v9 = vadd.f32 %v180_v63, %v469_v26 }
  0xaa   :  { %v266_v4 = vmul.f32 %v250_v60, %v138_v35  ;;  %v243_v5 = vadd.f32 1.0, %v319_v0  ;;  %v184_v10 = vmul.f32 %v168_v3, %v482_v42  ;;  %324 = vtanh.f32 %v208_v6 }
  0xab   :  { %278 = vst [vmem:[%s590_s3 + $0x40] sm:$0xff] %v262_v1  ;;  %v255_v8 = vmul.f32 %v239_v2, %v127_v45  ;;  %v113_v12 = vpop.f32.mrf.mxu2  ;;  %v212_v16 = vmul.f32 0.7978846, %v196_v9  ;;  %v172_v19 = vmul.f32 %v156_v11, %v491_v48  ;;  %v123_v20 = vpop.f32.mrf.mxu3  ;;  %v135_v21 = vmul.f32 0.5, %v455_v7 }
  0xac   :  { %282 = vst [vmem:[%s590_s3 + $0x60] sm:$0xff] %v266_v4  ;;  %v259_v14 = vmul.f32 %v243_v5, %v131_v46  ;;  %v200_v18 = vadd.f32 %v184_v10, %v482_v42  ;;  %v161_v22 = vmul.f32 %v145_v15, %v497_v55  ;;  %v149_v23 = vmul.f32 0.044715, %v501_v58 }
  0xad   :  { %271 = vst [vmem:[%s590_s3 + $0x8] sm:$0xff] %v255_v8  ;;  %v528_v24 = vadd.f32 %v437_v33, %v113_v12  ;;  %v139_v27 = vmul.f32 0.5, %v459_v13  ;;  %326 = vtanh.f32 %v212_v16  ;;  %v188_v29 = vmul.f32 %v172_v19, %v491_v48 }
  0xae   :  { %275 = vst [vmem:[%s590_s3 + $0x28] sm:$0xff] %v259_v14  ;;  %v321_v25 = vpop.eup %320  ;;  %v216_v28 = vmul.f32 0.7978846, %v200_v18  ;;  %v177_v32 = vmul.f32 %v161_v22, %v497_v55  ;;  %v165_v7 = vmul.f32 %v149_v23, %v501_v58  ;;  %v535_v34 = vadd.f32 %v437_v33, %v123_v20 }
  0xaf   :  { %v323_v30 = vpop.eup %322  ;;  %v247_v31 = vadd.f32 1.0, %v321_v25  ;;  %v204_v36 = vadd.f32 %v188_v29, %v491_v48  ;;  %v153_v37 = vmul.f32 0.044715, %v528_v24  ;;  %v128_v39 = vmul.f32 0.5, %v463_v17 }
  0xb0   :  { %v251_v35 = vadd.f32 1.0, %v323_v30  ;;  %328 = vtanh.f32 %v216_v28  ;;  %v325_v13 = vpop.eup %324  ;;  %v193_v40 = vadd.f32 %v177_v32, %v497_v55  ;;  %v181_v41 = vmul.f32 %v165_v7, %v501_v58 }
  0xb1   :  { %v263_v38 = vmul.f32 %v247_v31, %v135_v21  ;;  %v240_v44 = vadd.f32 1.0, %v325_v13  ;;  %v220_v45 = vmul.f32 0.7978846, %v204_v36  ;;  %v169_v33 = vmul.f32 %v153_v37, %v528_v24 }
  0xb2   :  { %v267_v43 = vmul.f32 %v251_v35, %v139_v27  ;;  %v209_v46 = vmul.f32 0.7978846, %v193_v40  ;;  %v197_v47 = vadd.f32 %v181_v41, %v501_v58  ;;  %v157_v49 = vmul.f32 0.044715, %v535_v34 }
  0xb3   :  { %279 = vst [vmem:[%s590_s3 + $0x48] sm:$0xff] %v263_v38  ;;  %v327_v50 = vpop.eup %326  ;;  %v256_v17 = vmul.f32 %v240_v44, %v128_v39  ;;  %v132_v51 = vmul.f32 0.5, %v469_v26  ;;  %330 = vtanh.f32 %v220_v45  ;;  %v185_v54 = vmul.f32 %v169_v33, %v528_v24 }
  0xb4   :  { %283 = vst [vmem:[%s590_s3 + $0x68] sm:$0xff] %v267_v43  ;;  %v244_v56 = vadd.f32 1.0, %v327_v50  ;;  %332 = vtanh.f32 %v209_v46  ;;  %v213_v57 = vmul.f32 0.7978846, %v197_v47  ;;  %v173_v52 = vmul.f32 %v157_v49, %v535_v34 }
  0xb5   :  { %272 = vst [vmem:[%s590_s3 + $0x10] sm:$0xff] %v256_v17  ;;  %v136_v59 = vmul.f32 0.5, %v482_v42  ;;  %v201_v60 = vadd.f32 %v185_v54, %v528_v24  ;;  %v140_v42 = vmul.f32 0.5, %v491_v48  ;;  %v129_v6 = vmul.f32 0.5, %v497_v55 }
  0xb6   :  { %v329_v53 = vpop.eup %328  ;;  %v260_v61 = vmul.f32 %v244_v56, %v132_v51  ;;  %334 = vtanh.f32 %v213_v57  ;;  %v189_v26 = vmul.f32 %v173_v52, %v535_v34  ;;  %v133_v12 = vmul.f32 0.5, %v501_v58 }
  0xb7   :  { %v248_v62 = vadd.f32 1.0, %v329_v53  ;;  %v217_v63 = vmul.f32 0.7978846, %v201_v60  ;;  %v137_v55 = vmul.f32 0.5, %v528_v24  ;;  %v141_v19 = vmul.f32 0.5, %v535_v34 }
  0xb8   :  { %276 = vst [vmem:[%s590_s3 + $0x30] sm:$0xff] %v260_v61  ;;  %v205_v1 = vadd.f32 %v189_v26, %v535_v34 }
  0xb9   :  { %v264_v0 = vmul.f32 %v248_v62, %v136_v59  ;;  %v331_v2 = vpop.eup %330  ;;  %336 = vtanh.f32 %v217_v63 }
  0xba   :  { %v333_v3 = vpop.eup %332  ;;  %v252_v4 = vadd.f32 1.0, %v331_v2  ;;  %v221_v5 = vmul.f32 0.7978846, %v205_v1 }
  0xbb   :  { %280 = vst [vmem:[%s590_s3 + $0x50] sm:$0xff] %v264_v0  ;;  %v241_v8 = vadd.f32 1.0, %v333_v3 }
  0xbc   :  { %v335_v9 = vpop.eup %334  ;;  %v268_v10 = vmul.f32 %v252_v4, %v140_v42  ;;  %338 = vtanh.f32 %v221_v5 }
  0xbd   :  { %v257_v11 = vmul.f32 %v241_v8, %v129_v6  ;;  %v245_v14 = vadd.f32 1.0, %v335_v9 }
  0xbe   :  { %284 = vst [vmem:[%s590_s3 + $0x70] sm:$0xff] %v268_v10 }
  0xbf   :  { %v337_v15 = vpop.eup %336  ;;  %273 = vst [vmem:[%s590_s3 + $0x18] sm:$0xff] %v257_v11  ;;  %v261_v48 = vmul.f32 %v245_v14, %v133_v12 }
  0xc0   :  { %v249_v16 = vadd.f32 1.0, %v337_v15 }
  0xc1   :  { %277 = vst [vmem:[%s590_s3 + $0x38] sm:$0xff] %v261_v48 }
  0xc2   :  { %v339_v18 = vpop.eup %338  ;;  %v265_v58 = vmul.f32 %v249_v16, %v137_v55 }
  0xc3   :  { %v253_v20 = vadd.f32 1.0, %v339_v18 }
  0xc4   :  { %281 = vst [vmem:[%s590_s3 + $0x58] sm:$0xff] %v265_v58 }
  0xc5   :  { %v269_v21 = vmul.f32 %v253_v20, %v141_v19 }
  0xc7   :  { %285 = vst [vmem:[%s590_s3 + $0x78] sm:$0xff] %v269_v21 }

// kernel: whisper_ppg_forward.12
= control target key start
LH: loop header
LB: loop body
LE: loop exit
PB: predicated region body
PF: predicated region fallthrough
CT: control target
= control target key end

     0   :  { %s522_s15 = smov 0   ;;  %s732_s0 = inlined_call_operand.vmem [shape: f32[2,32,384], index: 0, kind: input, shape index: {}]   ;;  %s733_s1 = inlined_call_operand.vmem [shape: f32[384,128], index: 1, kind: input, shape index: {}]   ;;  %s734_s2 = inlined_call_operand.vmem [shape: f32[1,128], index: 2, kind: input, shape index: {}]   ;;  %s735_s3 = inlined_call_operand.vmem [shape: f32[32,128], index: 3, kind: input, shape index: {}]   ;;  %s736_s4 = inlined_call_operand.vmem [shape: f32[2,32,128], index: 4, kind: output, shape index: {}]  }
   0x1 LB: > { %s452_s16 = sadd.s32 4294967295, %s495_s15   ;;  %p456_p0 = scmp.ge.s32.totalorder %s495_s15, 1  ;;  %s495_s15 = sphi %s522_s15, %s14_s15  }
   0x2   : > { %p162_p1 = scmp.lt.s32.totalorder %s495_s15, 3 }
   0x4   : > { %p163_p2 = pnand %p456_p0, %p162_p1 }
   0x5   : > { %p604_p3 = scmp.lt.s32.totalorder (!%p163_p2), %s452_s16, 1 }
   0x6   : > { %166 = sbr.rel (%p163_p2) target bundleno = 229 (0xe5), region = 36 }
   0xb   : > { %v224_v0 = vld [vmem:[%s733_s1 + $0x70] sm:$0xff]  ;;  %v225_v1 = vld [vmem:[%s733_s1 + $0x78] sm:$0xff]  ;;  %v222_v9 = vld [vmem:[%s733_s1 + $0x60] sm:$0xff]  ;;  %s739_s16 = smov (!%p604_p3, %s452_s16), 1 }
   0xc   : > { %v240_v2 = vld [vmem:[%s733_s1 + $0xf0] sm:$0xff]  ;;  %v271_v3 = vpack.c.bf16 %v225_v1, %v224_v0  ;;  %v241_v4 = vld [vmem:[%s733_s1 + $0xf8] sm:$0xff]  ;;  %v223_v10 = vld [vmem:[%s733_s1 + $0x68] sm:$0xff]  ;;  %s471_s20 = smul.u32 96, %s739_s16  ;;  %s462_s24 = sshll.u32 %s739_s16, 5 }
   0xd   : > { %v256_v5 = vld [vmem:[%s733_s1 + $0x170] sm:$0xff]  ;;  %v257_v6 = vld [vmem:[%s733_s1 + $0x178] sm:$0xff]  ;;  %v279_v7 = vpack.c.bf16 %v241_v4, %v240_v2  ;;  %v238_v11 = vld [vmem:[%s733_s1 + $0xe0] sm:$0xff]  ;;  %v270_v12 = vpack.c.bf16 %v223_v10, %v222_v9  ;;  %s714_s29 = scalar_lea.vmem %s736_s4, %s462_s24 }
   0xe   : > { %v287_v8 = vpack.c.bf16 %v257_v6, %v256_v5  ;;  %292 = vmatpush.bf16.msra.mxu0 %v271_v3  ;;  %463 = vmatpush.bf16.msra.mxu3 %v271_v3  ;;  %v239_v13 = vld [vmem:[%s733_s1 + $0xe8] sm:$0xff]  ;;  %v254_v14 = vld [vmem:[%s733_s1 + $0x160] sm:$0xff]  ;;  %v220_v18 = vld [vmem:[%s733_s1 + $0x50] sm:$0xff]  ;;  %s672_s7 = scalar_lea.vmem %s732_s0, %s471_s20 }
   0xf   : > { %v255_v15 = vld [vmem:[%s733_s1 + $0x168] sm:$0xff]  ;;  %311 = vmatpush.bf16.msra.mxu1 %v279_v7  ;;  %v278_v16 = vpack.c.bf16 %v239_v13, %v238_v11  ;;  %v221_v19 = vld [vmem:[%s733_s1 + $0x58] sm:$0xff]  ;;  %v236_v20 = vld [vmem:[%s733_s1 + $0xd0] sm:$0xff] }
  0x10   : > { %330 = vmatpush.bf16.msra.mxu2 %v287_v8  ;;  %v286_v17 = vpack.c.bf16 %v255_v15, %v254_v14  ;;  %v237_v21 = vld [vmem:[%s733_s1 + $0xd8] sm:$0xff]  ;;  %v252_v22 = vld [vmem:[%s733_s1 + $0x150] sm:$0xff]  ;;  %v269_v24 = vpack.c.bf16 %v221_v19, %v220_v18  ;;  %v218_v27 = vld [vmem:[%s733_s1 + $0x40] sm:$0xff] }
  0x11   : > { %v253_v23 = vld [vmem:[%s733_s1 + $0x158] sm:$0xff]  ;;  %v277_v25 = vpack.c.bf16 %v237_v21, %v236_v20  ;;  %v219_v28 = vld [vmem:[%s733_s1 + $0x48] sm:$0xff]  ;;  %v234_v29 = vld [vmem:[%s733_s1 + $0xc0] sm:$0xff] }
  0x12   : > { %293 = vmatpush.bf16.msra.mxu0 %v270_v12  ;;  %464 = vmatpush.bf16.msra.mxu3 %v270_v12  ;;  %v285_v26 = vpack.c.bf16 %v253_v23, %v252_v22  ;;  %v235_v30 = vld [vmem:[%s733_s1 + $0xc8] sm:$0xff]  ;;  %v250_v31 = vld [vmem:[%s733_s1 + $0x140] sm:$0xff]  ;;  %v268_v33 = vpack.c.bf16 %v219_v28, %v218_v27  ;;  %v216_v36 = vld [vmem:[%s733_s1 + $0x30] sm:$0xff] }
  0x13   : > { %312 = vmatpush.bf16.msra.mxu1 %v278_v16  ;;  %v251_v32 = vld [vmem:[%s733_s1 + $0x148] sm:$0xff]  ;;  %v276_v34 = vpack.c.bf16 %v235_v30, %v234_v29  ;;  %v217_v37 = vld [vmem:[%s733_s1 + $0x38] sm:$0xff]  ;;  %v232_v38 = vld [vmem:[%s733_s1 + $0xb0] sm:$0xff] }
  0x14   : > { %331 = vmatpush.bf16.msra.mxu2 %v286_v17  ;;  %v284_v35 = vpack.c.bf16 %v251_v32, %v250_v31  ;;  %v233_v39 = vld [vmem:[%s733_s1 + $0xb8] sm:$0xff]  ;;  %v248_v40 = vld [vmem:[%s733_s1 + $0x130] sm:$0xff]  ;;  %v267_v42 = vpack.c.bf16 %v217_v37, %v216_v36  ;;  %v214_v45 = vld [vmem:[%s733_s1 + $0x20] sm:$0xff] }
  0x15   : > { %v249_v41 = vld [vmem:[%s733_s1 + $0x138] sm:$0xff]  ;;  %v275_v43 = vpack.c.bf16 %v233_v39, %v232_v38  ;;  %v215_v46 = vld [vmem:[%s733_s1 + $0x28] sm:$0xff]  ;;  %v230_v47 = vld [vmem:[%s733_s1 + $0xa0] sm:$0xff] }
  0x16   : > { %294 = vmatpush.bf16.msra.mxu0 %v269_v24  ;;  %465 = vmatpush.bf16.msra.mxu3 %v269_v24  ;;  %v283_v44 = vpack.c.bf16 %v249_v41, %v248_v40  ;;  %v231_v48 = vld [vmem:[%s733_s1 + $0xa8] sm:$0xff]  ;;  %v246_v49 = vld [vmem:[%s733_s1 + $0x120] sm:$0xff]  ;;  %v266_v51 = vpack.c.bf16 %v215_v46, %v214_v45  ;;  %v212_v52 = vld [vmem:[%s733_s1 + $0x10] sm:$0xff] }
  0x17   : > { %313 = vmatpush.bf16.msra.mxu1 %v277_v25  ;;  %v247_v50 = vld [vmem:[%s733_s1 + $0x128] sm:$0xff]  ;;  %v274_v53 = vpack.c.bf16 %v231_v48, %v230_v47  ;;  %v213_v55 = vld [vmem:[%s733_s1 + $0x18] sm:$0xff]  ;;  %v228_v56 = vld [vmem:[%s733_s1 + $0x90] sm:$0xff] }
  0x18   : > { %332 = vmatpush.bf16.msra.mxu2 %v285_v26  ;;  %v282_v54 = vpack.c.bf16 %v247_v50, %v246_v49  ;;  %v229_v57 = vld [vmem:[%s733_s1 + $0x98] sm:$0xff]  ;;  %v244_v58 = vld [vmem:[%s733_s1 + $0x110] sm:$0xff]  ;;  %v265_v60 = vpack.c.bf16 %v213_v55, %v212_v52  ;;  %v210_v63 = vld [vmem:[%s733_s1] sm:$0xff] }
  0x19   : > { %v245_v59 = vld [vmem:[%s733_s1 + $0x118] sm:$0xff]  ;;  %v273_v61 = vpack.c.bf16 %v229_v57, %v228_v56  ;;  %v211_v0 = vld [vmem:[%s733_s1 + $0x8] sm:$0xff]  ;;  %v226_v1 = vld [vmem:[%s733_s1 + $0x80] sm:$0xff] }
  0x1a   : > { %295 = vmatpush.bf16.msra.mxu0 %v268_v33  ;;  %466 = vmatpush.bf16.msra.mxu3 %v268_v33  ;;  %v281_v62 = vpack.c.bf16 %v245_v59, %v244_v58  ;;  %v227_v2 = vld [vmem:[%s733_s1 + $0x88] sm:$0xff]  ;;  %v242_v3 = vld [vmem:[%s733_s1 + $0x100] sm:$0xff]  ;;  %v201_v6 = vld [vmem:[%s672_s7 + $0x18] sm:$0xff]  ;;  %v264_v7 = vpack.c.bf16 %v211_v0, %v210_v63 }
  0x1b   : > { %314 = vmatpush.bf16.msra.mxu1 %v276_v34  ;;  %v243_v4 = vld [vmem:[%s733_s1 + $0x108] sm:$0xff]  ;;  %v198_v5 = vld [vmem:[%s672_s7] sm:$0xff]  ;;  %v204_v9 = vld [vmem:[%s672_s7 + $0x30] sm:$0xff]  ;;  %v272_v11 = vpack.c.bf16 %v227_v2, %v226_v1 }
  0x1c   : > { %333 = vmatpush.bf16.msra.mxu2 %v284_v35  ;;  %v199_v8 = vld [vmem:[%s672_s7 + $0x8] sm:$0xff]  ;;  %v280_v12 = vpack.c.bf16 %v243_v4, %v242_v3  ;;  %v202_v13 = vld [vmem:[%s672_s7 + $0x20] sm:$0xff]  ;;  %v200_v14 = vld [vmem:[%s672_s7 + $0x10] sm:$0xff]  ;;  %v258_v16 = vpack.c.bf16 %v201_v6, %v198_v5 }
  0x1d   : > { %v207_v10 = vld [vmem:[%s672_s7 + $0x48] sm:$0xff]  ;;  %v259_v18 = vpack.c.bf16 %v202_v13, %v199_v8  ;;  %v205_v20 = vld [vmem:[%s672_s7 + $0x38] sm:$0xff]  ;;  %v208_v21 = vld [vmem:[%s672_s7 + $0x50] sm:$0xff] }
  0x1e   : > { %296 = vmatpush.bf16.msra.mxu0 %v267_v42  ;;  %467 = vmatpush.bf16.msra.mxu3 %v267_v42  ;;  %v203_v15 = vld [vmem:[%s672_s7 + $0x28] sm:$0xff]  ;;  %v261_v17 = vpack.c.bf16 %v207_v10, %v204_v9  ;;  %v206_v22 = vld [vmem:[%s672_s7 + $0x40] sm:$0xff]  ;;  %v209_v23 = vld [vmem:[%s672_s7 + $0x58] sm:$0xff]  ;;  %v262_v24 = vpack.c.bf16 %v208_v21, %v205_v20 }
  0x1f   : > { %315 = vmatpush.bf16.msra.mxu1 %v275_v43  ;;  %v260_v19 = vpack.c.bf16 %v203_v15, %v200_v14  ;;  %v263_v25 = vpack.c.bf16 %v209_v23, %v206_v22  ;;  %v480_v26 = vld [vmem:[%s734_s2] ss:$0 sm:$0xff]  ;;  %v387_v22 = vld [vmem:[%s735_s3 + $0x10] sm:$0xff] }
  0x20   : > { %334 = vmatpush.bf16.msra.mxu2 %v283_v44 }
  0x22   : > { %297 = vmatpush.bf16.msra.mxu0 %v266_v51  ;;  %468 = vmatpush.bf16.msra.mxu3 %v266_v51 }
  0x23   : > { %316 = vmatpush.bf16.msra.mxu1 %v274_v53 }
  0x24   : > { %335 = vmatpush.bf16.msra.mxu2 %v282_v54 }
  0x26   : > { %298 = vmatpush.bf16.msra.mxu0 %v265_v60  ;;  %469 = vmatpush.bf16.msra.mxu3 %v265_v60 }
  0x27   : > { %317 = vmatpush.bf16.msra.mxu1 %v273_v61  ;;  %v385_v61 = vld [vmem:[%s735_s3] sm:$0xff] }
  0x28   : > { %336 = vmatpush.bf16.msra.mxu2 %v281_v62 }
  0x2a   : > { %299 = vmatpush.bf16.msra.mxu0 %v264_v7  ;;  %470 = vmatpush.bf16.msra.mxu3 %v264_v7 }
  0x2b   : > { %318 = vmatpush.bf16.msra.mxu1 %v272_v11 }
  0x2c   : > { %337 = vmatpush.bf16.msra.mxu2 %v280_v12  ;;  %v386_v12 = vld [vmem:[%s735_s3 + $0x8] sm:$0xff] }
  0x2d   : > { %300 = vmatmul.bf16.vlgmr.msra.gmra.mxu0 %v258_v16  ;;  %305 = vmatmul.bf16.vlgmr.msra.gmra.mxu3 %v261_v17 }
  0x2e   : > { %319 = vmatmul.bf16.vlgmr.msra.gmra.mxu1 %v259_v18 }
  0x2f   : > { %338 = vmatmul.bf16.vlgmr.msra.gmra.mxu2 %v260_v19 }
  0x3e   : > { %324 = vmatmul.bf16.gmra.mxu1 %v262_v24 }
  0x3f   : > { %343 = vmatmul.bf16.gmra.mxu2 %v263_v25 }
  0xaa   : > { %v301_v27 = vpop.f32.mrf.mxu0 }
  0xab   : > { %v302_v28 = vadd.f32 %v480_v26, %v301_v27  ;;  %v320_v29 = vpop.f32.mrf.mxu1 }
  0xad   : > { %v321_v30 = vadd.f32 %v320_v29, %v302_v28  ;;  %v388_v28 = vld [vmem:[%s735_s3 + $0x18] sm:$0xff] }
  0xb0   : > { %v306_v40 = vpop.f32.mrf.mxu3 }
  0xb1   : > { %v307_v43 = vadd.f32 %v480_v26, %v306_v40 }
  0xb2   : > { %v339_v31 = vpop.f32.mrf.mxu2  ;;  %v303_v33 = vpop.f32.mrf.mxu0 }
  0xb3   : > { %v340_v32 = vadd.f32 %v339_v31, %v321_v30  ;;  %v322_v34 = vpop.f32.mrf.mxu1  ;;  %v304_v36 = vadd.f32 %v480_v26, %v303_v33 }
  0xb5   : > { %v353_v35 = vmul.f32 0.044715, %v340_v32  ;;  %v323_v39 = vadd.f32 %v322_v34, %v304_v36  ;;  %v349_v58 = vmul.f32 0.5, %v340_v32 }
  0xb7   : > { %v357_v37 = vmul.f32 %v353_v35, %v340_v32 }
  0xb8   : > { %v308_v54 = vpop.f32.mrf.mxu3 }
  0xb9   : > { %v361_v38 = vmul.f32 %v357_v37, %v340_v32  ;;  %v309_v62 = vadd.f32 %v480_v26, %v308_v54 }
  0xba   : > { %v341_v41 = vpop.f32.mrf.mxu2 }
  0xbb   : > { %v365_v42 = vadd.f32 %v361_v38, %v340_v32  ;;  %v342_v44 = vadd.f32 %v341_v41, %v323_v39  ;;  %v325_v45 = vpop.f32.mrf.mxu1 }
  0xbc   : > { %v326_v49 = vadd.f32 %v325_v45, %v307_v43 }
  0xbd   : > { %v369_v46 = vmul.f32 0.7978846, %v365_v42  ;;  %v354_v47 = vmul.f32 0.044715, %v342_v44  ;;  %v350_v10 = vmul.f32 0.5, %v342_v44 }
  0xbf   : > { %481 = vtanh.f32 %v369_v46  ;;  %v358_v48 = vmul.f32 %v354_v47, %v342_v44 }
  0xc1   : > { %v362_v50 = vmul.f32 %v358_v48, %v342_v44 }
  0xc2   : > { %v344_v51 = vpop.f32.mrf.mxu2 }
  0xc3   : > { %v366_v52 = vadd.f32 %v362_v50, %v342_v44  ;;  %v345_v53 = vadd.f32 %v344_v51, %v326_v49  ;;  %v327_v60 = vpop.f32.mrf.mxu1 }
  0xc4   : > { %v328_v2 = vadd.f32 %v327_v60, %v309_v62 }
  0xc5   : > { %v482_v55 = vpop.eup %481  ;;  %v370_v56 = vmul.f32 0.7978846, %v366_v52  ;;  %v355_v57 = vmul.f32 0.044715, %v345_v53  ;;  %v351_v20 = vmul.f32 0.5, %v345_v53 }
  0xc6   : > { %v377_v59 = vadd.f32 1.0, %v482_v55 }
  0xc7   : > { %483 = vtanh.f32 %v370_v56  ;;  %v359_v63 = vmul.f32 %v355_v57, %v345_v53 }
  0xc8   : > { %v381_v0 = vmul.f32 %v377_v59, %v349_v58 }
  0xc9   : > { %v363_v1 = vmul.f32 %v359_v63, %v345_v53 }
  0xca   : > { %v389_v3 = vadd.f32 %v385_v61, %v381_v0  ;;  %v346_v4 = vpop.f32.mrf.mxu2 }
  0xcb   : > { %v367_v5 = vadd.f32 %v363_v1, %v345_v53  ;;  %v347_v6 = vadd.f32 %v346_v4, %v328_v2 }
  0xcc   : > { %393 = vst [vmem:[%s714_s29] sm:$0xff] %v389_v3 }
  0xcd   : > { %v484_v7 = vpop.eup %483  ;;  %v371_v8 = vmul.f32 0.7978846, %v367_v5  ;;  %v356_v9 = vmul.f32 0.044715, %v347_v6  ;;  %v352_v26 = vmul.f32 0.5, %v347_v6 }
  0xce   : > { %v378_v11 = vadd.f32 1.0, %v484_v7 }
  0xcf   : > { %485 = vtanh.f32 %v371_v8  ;;  %v360_v13 = vmul.f32 %v356_v9, %v347_v6 }
  0xd0   : > { %v382_v14 = vmul.f32 %v378_v11, %v350_v10 }
  0xd1   : > { %v364_v15 = vmul.f32 %v360_v13, %v347_v6 }
  0xd2   : > { %v390_v16 = vadd.f32 %v386_v12, %v382_v14 }
  0xd3   : > { %v368_v17 = vadd.f32 %v364_v15, %v347_v6 }
  0xd4   : > { %394 = vst [vmem:[%s714_s29 + $0x8] sm:$0xff] %v390_v16 }
  0xd5   : > { %v486_v18 = vpop.eup %485  ;;  %v372_v19 = vmul.f32 0.7978846, %v368_v17 }
  0xd6   : > { %v379_v21 = vadd.f32 1.0, %v486_v18 }
  0xd7   : > { %487 = vtanh.f32 %v372_v19 }
  0xd8   : > { %v383_v23 = vmul.f32 %v379_v21, %v351_v20 }
  0xda   : > { %v391_v24 = vadd.f32 %v387_v22, %v383_v23 }
  0xdc   : > { %395 = vst [vmem:[%s714_s29 + $0x10] sm:$0xff] %v391_v24 }
  0xdd   : > { %v488_v25 = vpop.eup %487 }
  0xde   : > { %v380_v27 = vadd.f32 1.0, %v488_v25 }
  0xe0   : > { %v384_v29 = vmul.f32 %v380_v27, %v352_v26 }
  0xe2   : > { %v392_v30 = vadd.f32 %v388_v28, %v384_v29 }
  0xe4   : > { %396 = vst [vmem:[%s714_s29 + $0x18] sm:$0xff] %v392_v30 }
  0xe5 PF: > { %s14_s15 = sadd.s32 1, %s495_s15  }
  0xe6   : > { %p11_p4 = scmp.ge.s32.totalorder %s14_s15, 4  }
  0xe8   :  { %13 = sbr.rel (!%p11_p4) target bundleno = 1 (0x1), region = 66 }

// kernel: whisper_ppg_forward.13
= control target key start
LH: loop header
LB: loop body
LE: loop exit
PB: predicated region body
PF: predicated region fallthrough
CT: control target
= control target key end

     0   :  { %v447_v7 = vmov 128.0   ;;  %s844_s0 = inlined_call_operand.vmem [shape: f32[64,128], index: 0, kind: input, shape index: {}]   ;;  %s845_s1 = inlined_call_operand.vmem [shape: f32[1,128], index: 1, kind: input, shape index: {}]   ;;  %s846_s2 = inlined_call_operand.vmem [shape: f32[1,128], index: 2, kind: input, shape index: {}]   ;;  %s847_s3 = inlined_call_operand.vmem [shape: f32[128,384], index: 3, kind: input, shape index: {}]   ;;  %s848_s4 = inlined_call_operand.vmem [shape: f32[1,384], index: 4, kind: input, shape index: {}]   ;;  %s849_s5 = inlined_call_operand.vmem [shape: f32[64,384], index: 5, kind: output, shape index: {}]  }
   0x1   :  { %v24_v0 = vld [vmem:[%s844_s0 + $0x20] sm:$0xff]  ;;  %v22_v1 = vld [vmem:[%s844_s0 + $0x10] sm:$0xff]  ;;  %v25_v3 = vld [vmem:[%s844_s0 + $0x28] sm:$0xff]  ;;  %429 = vrcp.f32 %v447_v7 }
   0x2   :  { %v20_v2 = vld [vmem:[%s844_s0] sm:$0xff]  ;;  %38 = vadd.xlane.f32.xlu2 %v24_v0  ;;  %34 = vadd.xlane.f32.xlu1 %v22_v1  ;;  %v23_v4 = vld [vmem:[%s844_s0 + $0x18] sm:$0xff]  ;;  %v21_v5 = vld [vmem:[%s844_s0 + $0x8] sm:$0xff] }
   0x3   :  { %30 = vadd.xlane.f32.xlu0 %v20_v2  ;;  %v26_v6 = vld [vmem:[%s844_s0 + $0x30] sm:$0xff]  ;;  %v519_v30 = vld [vmem:[%s844_s0 + $0x38] sm:$0xff]  ;;  %v264_v44 = vld [vmem:[%s847_s3 + $0x168] sm:$0xff] }
   0x4   :  { %v261_v43 = vld [vmem:[%s847_s3 + $0x150] sm:$0xff]  ;;  %v262_v45 = vld [vmem:[%s847_s3 + $0x158] sm:$0xff]  ;;  %v263_v48 = vld [vmem:[%s847_s3 + $0x160] sm:$0xff] }
   0x5   :  { %v292_v46 = vpack.c.bf16 %v264_v44, %v261_v43  ;;  %v265_v47 = vld [vmem:[%s847_s3 + $0x170] sm:$0xff]  ;;  %v266_v49 = vld [vmem:[%s847_s3 + $0x178] sm:$0xff]  ;;  %v255_v52 = vld [vmem:[%s847_s3 + $0x120] sm:$0xff] }
   0x6   :  { %v293_v50 = vpack.c.bf16 %v265_v47, %v262_v45  ;;  %v294_v51 = vpack.c.bf16 %v266_v49, %v263_v48  ;;  %v258_v53 = vld [vmem:[%s847_s3 + $0x138] sm:$0xff]  ;;  %v256_v54 = vld [vmem:[%s847_s3 + $0x128] sm:$0xff]  ;;  %v259_v56 = vld [vmem:[%s847_s3 + $0x140] sm:$0xff] }
   0x7   :  { %v430_v8 = vpop.eup %429  ;;  %303 = vmatpush.bf16.msra.mxu0 %v292_v46  ;;  %418 = vmatpush.bf16.msra.mxu3 %v292_v46  ;;  %v289_v55 = vpack.c.bf16 %v258_v53, %v255_v52  ;;  %v257_v57 = vld [vmem:[%s847_s3 + $0x130] sm:$0xff]  ;;  %v260_v58 = vld [vmem:[%s847_s3 + $0x148] sm:$0xff]  ;;  %v290_v59 = vpack.c.bf16 %v259_v56, %v256_v54  ;;  %v250_v63 = vld [vmem:[%s847_s3 + $0xf8] sm:$0xff] }
   0x8   :  { %v47_v9 = vmul.f32 128.0, %v430_v8  ;;  %vm51_vm0 = vweird.f32 %v430_v8  ;;  %332 = vmatpush.bf16.msra.mxu1 %v293_v50  ;;  %361 = vmatpush.bf16.msra.mxu2 %v294_v51  ;;  %v291_v60 = vpack.c.bf16 %v260_v58, %v257_v57  ;;  %v249_v61 = vld [vmem:[%s847_s3 + $0xf0] sm:$0xff]  ;;  %v252_v62 = vld [vmem:[%s847_s3 + $0x108] sm:$0xff]  ;;  %v246_v7 = vld [vmem:[%s847_s3 + $0xd8] sm:$0xff] }
   0x9   :  { %v228_v43 = vld [vmem:[%s847_s3 + $0x48] sm:$0xff]  ;;  %v226_v44 = vld [vmem:[%s847_s3 + $0x38] sm:$0xff]  ;;  %v229_v46 = vld [vmem:[%s847_s3 + $0x50] sm:$0xff] }
   0xa   :  { %40 = vadd.xlane.f32.xlu2 %v25_v3  ;;  %36 = vadd.xlane.f32.xlu1 %v23_v4  ;;  %v48_v10 = vsub.f32 1.0, %v47_v9  ;;  %v227_v47 = vld [vmem:[%s847_s3 + $0x40] sm:$0xff]  ;;  %v230_v48 = vld [vmem:[%s847_s3 + $0x58] sm:$0xff]  ;;  %v275_v50 = vpack.c.bf16 %v229_v46, %v226_v44 }
   0xb   :  { %32 = vadd.xlane.f32.xlu0 %v21_v5  ;;  %304 = vmatpush.bf16.msra.mxu0 %v289_v55  ;;  %v276_v51 = vpack.c.bf16 %v230_v48, %v227_v47  ;;  %v219_v53 = vld [vmem:[%s847_s3] sm:$0xff]  ;;  %v222_v54 = vld [vmem:[%s847_s3 + $0x18] sm:$0xff] }
   0xc   :  { %v49_v11 = vmul.f32 %v430_v8, %v48_v10  ;;  %419 = vmatpush.bf16.msra.mxu3 %v289_v55  ;;  %333 = vmatpush.bf16.msra.mxu1 %v290_v59  ;;  %v247_v10 = vld [vmem:[%s847_s3 + $0xe0] sm:$0xff]  ;;  %v220_v55 = vld [vmem:[%s847_s3 + $0x8] sm:$0xff]  ;;  %v271_v57 = vpack.c.bf16 %v222_v54, %v219_v53  ;;  %v221_v59 = vld [vmem:[%s847_s3 + $0x10] sm:$0xff] }
   0xd   :  { %362 = vmatpush.bf16.msra.mxu2 %v291_v60  ;;  %v223_v58 = vld [vmem:[%s847_s3 + $0x20] sm:$0xff]  ;;  %v224_v60 = vld [vmem:[%s847_s3 + $0x28] sm:$0xff] }
   0xe   :  { %v50_v12 = vadd.f32 %v430_v8, %v49_v11  ;;  %v245_v11 = vld [vmem:[%s847_s3 + $0xd0] sm:$0xff] }
  0x10   :  { %v499_v13 = vsel %vm51_vm0, %v430_v8, %v50_v12  ;;  %v244_v8 = vld [vmem:[%s847_s3 + $0xc8] sm:$0xff] }
  0x11   :  { %v248_v12 = vld [vmem:[%s847_s3 + $0xe8] sm:$0xff] }
  0x12   :  { %42 = vadd.xlane.f32.xlu2 %v26_v6 }
  0x75   :  { %v39_v14 = vpop.xlane.xlu2 %38  ;;  %v35_v15 = vpop.xlane.xlu1 %34 }
  0x76   :  { %v31_v16 = vpop.xlane.xlu0 %30  ;;  %v57_v26 = vmul.f32 %v499_v13, %v39_v14  ;;  %v55_v27 = vmul.f32 %v499_v13, %v35_v15  ;;  %v284_v14 = vpack.c.bf16 %v247_v10, %v244_v8  ;;  %v285_v15 = vpack.c.bf16 %v248_v12, %v245_v11 }
  0x77   :  { %v53_v17 = vmul.f32 %v499_v13, %v31_v16  ;;  %v237_v16 = vld [vmem:[%s847_s3 + $0x90] sm:$0xff] }
  0x78   :  { %v523_v32 = vsub.f32 %v24_v0, %v57_v26  ;;  %v525_v33 = vsub.f32 %v22_v1, %v55_v27  ;;  %v286_v0 = vpack.c.bf16 %v252_v62, %v249_v61  ;;  %v253_v1 = vld [vmem:[%s847_s3 + $0x110] sm:$0xff]  ;;  %v231_v27 = vld [vmem:[%s847_s3 + $0x60] sm:$0xff]  ;;  %v272_v61 = vpack.c.bf16 %v223_v58, %v220_v55 }
  0x79   :  { %v502_v18 = vsub.f32 %v20_v2, %v53_v17  ;;  %v251_v2 = vld [vmem:[%s847_s3 + $0x100] sm:$0xff]  ;;  %v240_v17 = vld [vmem:[%s847_s3 + $0xa8] sm:$0xff]  ;;  %v273_v62 = vpack.c.bf16 %v224_v60, %v221_v59 }
  0x7a   :  { %v73_v38 = vmul.f32 %v523_v32, %v523_v32  ;;  %v71_v39 = vmul.f32 %v525_v33, %v525_v33  ;;  %305 = vmatpush.bf16.msra.mxu0 %v286_v0  ;;  %420 = vmatpush.bf16.msra.mxu3 %v286_v0 }
  0x7b   :  { %v69_v19 = vmul.f32 %v502_v18, %v502_v18 }
  0x7d   :  { %77 = vadd.xlane.f32.xlu0 %v69_v19  ;;  %v41_v20 = vpop.xlane.xlu2 %40  ;;  %v37_v21 = vpop.xlane.xlu1 %36  ;;  %v238_v19 = vld [vmem:[%s847_s3 + $0x98] sm:$0xff] }
  0x7e   :  { %v56_v22 = vmul.f32 %v499_v13, %v37_v21  ;;  %v33_v23 = vpop.xlane.xlu0 %32  ;;  %v58_v37 = vmul.f32 %v499_v13, %v41_v20  ;;  %v280_v20 = vpack.c.bf16 %v240_v17, %v237_v16  ;;  %v241_v21 = vld [vmem:[%s847_s3 + $0xb0] sm:$0xff] }
  0x7f   :  { %v54_v24 = vmul.f32 %v499_v13, %v33_v23  ;;  %v242_v23 = vld [vmem:[%s847_s3 + $0xb8] sm:$0xff] }
  0x80   :  { %v508_v25 = vsub.f32 %v23_v4, %v56_v22  ;;  %v538_v41 = vsub.f32 %v25_v3, %v58_v37  ;;  %v254_v3 = vld [vmem:[%s847_s3 + $0x118] sm:$0xff]  ;;  %v287_v4 = vpack.c.bf16 %v253_v1, %v250_v63  ;;  %v239_v22 = vld [vmem:[%s847_s3 + $0xa0] sm:$0xff]  ;;  %v233_v37 = vld [vmem:[%s847_s3 + $0x70] sm:$0xff] }
  0x81   :  { %v512_v28 = vsub.f32 %v21_v5, %v54_v24  ;;  %v288_v5 = vpack.c.bf16 %v254_v3, %v251_v2  ;;  %v281_v24 = vpack.c.bf16 %v241_v21, %v238_v19  ;;  %v282_v26 = vpack.c.bf16 %v242_v23, %v239_v22 }
  0x82   :  { %v72_v29 = vmul.f32 %v508_v25, %v508_v25  ;;  %v74_v42 = vmul.f32 %v538_v41, %v538_v41  ;;  %334 = vmatpush.bf16.msra.mxu1 %v287_v4 }
  0x83   :  { %v70_v31 = vmul.f32 %v512_v28, %v512_v28  ;;  %363 = vmatpush.bf16.msra.mxu2 %v288_v5 }
  0x84   :  { %83 = vadd.xlane.f32.xlu2 %v72_v29  ;;  %v234_v29 = vld [vmem:[%s847_s3 + $0x78] sm:$0xff] }
  0x85   :  { %44 = vadd.xlane.f32.xlu0 %v519_v30  ;;  %79 = vadd.xlane.f32.xlu1 %v70_v31  ;;  %v43_v34 = vpop.xlane.xlu2 %42  ;;  %v232_v31 = vld [vmem:[%s847_s3 + $0x68] sm:$0xff] }
  0x86   :  { %v59_v35 = vmul.f32 %v499_v13, %v43_v34  ;;  %335 = vmatpush.bf16.msra.mxu1 %v284_v14  ;;  %v277_v34 = vpack.c.bf16 %v234_v29, %v231_v27 }
  0x87   :  { %364 = vmatpush.bf16.msra.mxu2 %v285_v15 }
  0x88   :  { %v529_v36 = vsub.f32 %v26_v6, %v59_v35  ;;  %v243_v6 = vld [vmem:[%s847_s3 + $0xc0] sm:$0xff] }
  0x89   :  { %v283_v9 = vpack.c.bf16 %v246_v7, %v243_v6  ;;  %v235_v35 = vld [vmem:[%s847_s3 + $0x80] sm:$0xff] }
  0x8a   :  { %v75_v40 = vmul.f32 %v529_v36, %v529_v36  ;;  %336 = vmatpush.bf16.msra.mxu1 %v281_v24 }
  0x8b   :  { %306 = vmatpush.bf16.msra.mxu0 %v283_v9  ;;  %421 = vmatpush.bf16.msra.mxu3 %v283_v9 }
  0x8c   :  { %89 = vadd.xlane.f32.xlu2 %v75_v40  ;;  %365 = vmatpush.bf16.msra.mxu2 %v282_v26 }
  0x8d   :  { %85 = vadd.xlane.f32.xlu0 %v73_v38  ;;  %81 = vadd.xlane.f32.xlu1 %v71_v39  ;;  %v236_v38 = vld [vmem:[%s847_s3 + $0x88] sm:$0xff]  ;;  %v278_v39 = vpack.c.bf16 %v235_v35, %v232_v31 }
  0x8e   :  { %v279_v40 = vpack.c.bf16 %v236_v38, %v233_v37 }
  0x8f   :  { %307 = vmatpush.bf16.msra.mxu0 %v280_v20  ;;  %422 = vmatpush.bf16.msra.mxu3 %v280_v20 }
  0x90   :  { %337 = vmatpush.bf16.msra.mxu1 %v278_v39  ;;  %366 = vmatpush.bf16.msra.mxu2 %v279_v40 }
  0x93   :  { %308 = vmatpush.bf16.msra.mxu0 %v277_v34  ;;  %423 = vmatpush.bf16.msra.mxu3 %v277_v34 }
  0x94   :  { %338 = vmatpush.bf16.msra.mxu1 %v275_v50  ;;  %367 = vmatpush.bf16.msra.mxu2 %v276_v51 }
  0x95   :  { %87 = vadd.xlane.f32.xlu1 %v74_v42  ;;  %v225_v42 = vld [vmem:[%s847_s3 + $0x30] sm:$0xff] }
  0x96   :  { %v274_v45 = vpack.c.bf16 %v228_v43, %v225_v42 }
  0x98   :  { %309 = vmatpush.bf16.msra.mxu0 %v274_v45  ;;  %424 = vmatpush.bf16.msra.mxu3 %v274_v45  ;;  %v705_v45 = vld [vmem:[%s845_s1] ss:$0 sm:$0xff] }
  0x99   :  { %339 = vmatpush.bf16.msra.mxu1 %v272_v61  ;;  %368 = vmatpush.bf16.msra.mxu2 %v273_v62 }
  0x9c   :  { %310 = vmatpush.bf16.msra.mxu0 %v271_v57  ;;  %425 = vmatpush.bf16.msra.mxu3 %v271_v57  ;;  %v713_v57 = vld [vmem:[%s846_s2] ss:$0 sm:$0xff] }
  0xf0   :  { %v78_v49 = vpop.xlane.xlu0 %77 }
  0xf1   :  { %v93_v52 = vmul.f32 %v78_v49, %v499_v13 }
  0xf3   :  { %v101_v56 = vadd.f32 1e-05, %v93_v52 }
  0xf5   :  { %431 = vrsqrt.f32 %v101_v56  ;;  %vm115_vm2 = vweird.f32 %v101_v56 }
  0xf7   :  { %v84_v63 = vpop.xlane.xlu2 %83 }
  0xf8   :  { %v96_v0 = vmul.f32 %v84_v63, %v499_v13  ;;  %v80_v1 = vpop.xlane.xlu1 %79  ;;  %v45_v2 = vpop.xlane.xlu0 %44 }
  0xf9   :  { %v94_v3 = vmul.f32 %v80_v1, %v499_v13  ;;  %v60_v4 = vmul.f32 %v499_v13, %v45_v2 }
  0xfa   :  { %v104_v5 = vadd.f32 1e-05, %v96_v0 }
  0xfb   :  { %v432_v6 = vpop.eup %431  ;;  %v102_v7 = vadd.f32 1e-05, %v94_v3  ;;  %v691_v8 = vsub.f32 %v519_v30, %v60_v4 }
  0xfc   :  { %v110_v9 = vmul.f32 %v432_v6, %v101_v56  ;;  %433 = vrsqrt.f32 %v104_v5  ;;  %vm116_vm1 = vweird.f32 %v432_v6  ;;  %vm145_vm6 = vweird.f32 %v104_v5 }
  0xfd   :  { %435 = vrsqrt.f32 %v102_v7  ;;  %v76_v10 = vmul.f32 %v691_v8, %v691_v8  ;;  %vm117_vm3 = vmor %vm115_vm2, %vm116_vm1  ;;  %vm125_vm4 = vweird.f32 %v102_v7 }
  0xfe   :  { %v111_v11 = vmul.f32 %v432_v6, %v110_v9 }
  0xff   :  { %91 = vadd.xlane.f32.xlu0 %v76_v10 }
 0x100   :  { %v112_v12 = vmul.f32 0.5, %v111_v11  ;;  %v82_v14 = vpop.xlane.xlu1 %81  ;;  %v86_v15 = vpop.xlane.xlu0 %85 }
 0x101   :  { %v95_v16 = vmul.f32 %v82_v14, %v499_v13  ;;  %v97_v17 = vmul.f32 %v86_v15, %v499_v13 }
 0x102   :  { %v434_v19 = vpop.eup %433  ;;  %v113_v20 = vsub.f32 1.5, %v112_v12 }
 0x103   :  { %v436_v21 = vpop.eup %435  ;;  %v140_v30 = vmul.f32 %v434_v19, %v104_v5  ;;  %v103_v22 = vadd.f32 1e-05, %v95_v16  ;;  %v697_v23 = vadd.f32 1e-05, %v97_v17  ;;  %vm146_vm7 = vweird.f32 %v434_v19 }
 0x104   :  { %v114_v24 = vmul.f32 %v432_v6, %v113_v20  ;;  %v120_v26 = vmul.f32 %v436_v21, %v102_v7  ;;  %vm126_vm5 = vweird.f32 %v436_v21  ;;  %vm147_vm9 = vmor %vm145_vm6, %vm146_vm7 }
 0x105   :  { %v141_v27 = vmul.f32 %v434_v19, %v140_v30  ;;  %437 = vrsqrt.f32 %v103_v22  ;;  %vm127_vm8 = vmor %vm125_vm4, %vm126_vm5  ;;  %vm135_vm10 = vweird.f32 %v103_v22  ;;  %vm155_vm15 = vweird.f32 %v697_v23 }
 0x106   :  { %v121_v29 = vmul.f32 %v436_v21, %v120_v26  ;;  %439 = vrsqrt.f32 %v697_v23  ;;  %v118_v34 = vsel %vm117_vm3, %v432_v6, %v114_v24  ;;  %v90_v26 = vpop.xlane.xlu2 %89 }
 0x107   :  { %v142_v31 = vmul.f32 0.5, %v141_v27  ;;  %v189_v43 = vmul.f32 %v118_v34, %v502_v18  ;;  %v99_v27 = vmul.f32 %v90_v26, %v499_v13 }
 0x108   :  { %v122_v35 = vmul.f32 0.5, %v121_v29  ;;  %v88_v37 = vpop.xlane.xlu1 %87 }
 0x109   :  { %v143_v38 = vsub.f32 1.5, %v142_v31  ;;  %v98_v39 = vmul.f32 %v88_v37, %v499_v13  ;;  %v200_v18 = vmul.f32 %v705_v45, %v189_v43 }
 0x10a   :  { %v123_v40 = vsub.f32 1.5, %v122_v35 }
 0x10b   :  { %v438_v42 = vpop.eup %437  ;;  %v106_v44 = vadd.f32 1e-05, %v98_v39  ;;  %v144_v47 = vmul.f32 %v434_v19, %v143_v38  ;;  %v211_v0 = vadd.f32 %v713_v57, %v200_v18 }
 0x10c   :  { %v440_v46 = vpop.eup %439  ;;  %v124_v48 = vmul.f32 %v436_v21, %v123_v40  ;;  %v130_v49 = vmul.f32 %v438_v42, %v103_v22  ;;  %vm136_vm11 = vweird.f32 %v438_v42 }
 0x10d   :  { %v150_v50 = vmul.f32 %v440_v46, %v697_v23  ;;  %441 = vrsqrt.f32 %v106_v44  ;;  %v148_v54 = vsel %vm147_vm9, %v434_v19, %v144_v47  ;;  %vm137_vm12 = vmor %vm135_vm10, %vm136_vm11  ;;  %vm165_vm13 = vweird.f32 %v106_v44 }
 0x10e   :  { %v128_v51 = vsel %vm127_vm8, %v436_v21, %v124_v48  ;;  %v131_v52 = vmul.f32 %v438_v42, %v130_v49  ;;  %v192_v60 = vmul.f32 %v148_v54, %v508_v25  ;;  %vm156_vm0 = vweird.f32 %v440_v46 }
 0x10f   :  { %v190_v53 = vmul.f32 %v128_v51, %v512_v28  ;;  %v151_v56 = vmul.f32 %v440_v46, %v150_v50  ;;  %vm157_vm2 = vmor %vm155_vm15, %vm156_vm0 }
 0x110   :  { %v132_v55 = vmul.f32 0.5, %v131_v52  ;;  %v203_v6 = vmul.f32 %v705_v45, %v192_v60 }
 0x111   :  { %v201_v58 = vmul.f32 %v705_v45, %v190_v53  ;;  %v152_v63 = vmul.f32 0.5, %v151_v56  ;;  %v295_v56 = vld [vmem:[%s848_s4] sm:$0x7] }
 0x112   :  { %v133_v59 = vsub.f32 1.5, %v132_v55 }
 0x113   :  { %v212_v28 = vadd.f32 %v713_v57, %v201_v58  ;;  %v442_v61 = vpop.eup %441  ;;  %v153_v7 = vsub.f32 1.5, %v152_v63  ;;  %v744_v58 = vperm.slane %v295_v56, 1 }
 0x114   :  { %v134_v62 = vmul.f32 %v438_v42, %v133_v59  ;;  %v160_v1 = vmul.f32 %v442_v61, %v106_v44  ;;  %vm166_vm14 = vweird.f32 %v442_v61 }
 0x115   :  { %v267_v3 = vpack.c.bf16 %v212_v28, %v211_v0  ;;  %v154_v12 = vmul.f32 %v440_v46, %v153_v7  ;;  %vm167_vm1 = vmor %vm165_vm13, %vm166_vm14 }
 0x116   :  { %v138_v2 = vsel %vm137_vm12, %v438_v42, %v134_v62  ;;  %v161_v5 = vmul.f32 %v442_v61, %v160_v1 }
 0x117   :  { %v191_v4 = vmul.f32 %v138_v2, %v525_v33  ;;  %311 = vmatmul.bf16.vlgmr.msra.gmra.mxu0 %v267_v3  ;;  %340 = vmatmul.bf16.vlgmr.msra.gmra.mxu1 %v267_v3  ;;  %v214_v33 = vadd.f32 %v713_v57, %v203_v6  ;;  %v158_v17 = vsel %vm157_vm2, %v440_v46, %v154_v12 }
 0x118   :  { %v162_v25 = vmul.f32 0.5, %v161_v5  ;;  %369 = vmatmul.bf16.vlgmr.msra.gmra.mxu2 %v267_v3  ;;  %v193_v20 = vmul.f32 %v158_v17, %v523_v32 }
 0x119   :  { %v202_v9 = vmul.f32 %v705_v45, %v191_v4 }
 0x11a   :  { %v163_v10 = vsub.f32 1.5, %v162_v25  ;;  %v204_v30 = vmul.f32 %v705_v45, %v193_v20 }
 0x11b   :  { %v213_v11 = vadd.f32 %v713_v57, %v202_v9 }
 0x11c   :  { %v164_v14 = vmul.f32 %v442_v61, %v163_v10  ;;  %v215_v23 = vadd.f32 %v713_v57, %v204_v30 }
 0x11d   :  { %v268_v15 = vpack.c.bf16 %v214_v33, %v213_v11 }
 0x11e   :  { %v168_v16 = vsel %vm167_vm1, %v442_v61, %v164_v14 }
 0x11f   :  { %316 = vmatmul.bf16.vlgmr.msra.gmra.mxu3 %v268_v15  ;;  %v194_v19 = vmul.f32 %v168_v16, %v538_v41  ;;  %v107_v41 = vadd.f32 1e-05, %v99_v27 }
 0x121   :  { %v205_v21 = vmul.f32 %v705_v45, %v194_v19  ;;  %443 = vrsqrt.f32 %v107_v41  ;;  %vm175_vm3 = vweird.f32 %v107_v41 }
 0x123   :  { %v216_v22 = vadd.f32 %v713_v57, %v205_v21 }
 0x125   :  { %v269_v24 = vpack.c.bf16 %v216_v22, %v215_v23 }
 0x127   :  { %345 = vmatmul.bf16.gmra.mxu1 %v268_v15  ;;  %v444_v32 = vpop.eup %443 }
 0x128   :  { %374 = vmatmul.bf16.gmra.mxu2 %v268_v15  ;;  %v170_v29 = vmul.f32 %v444_v32, %v107_v41  ;;  %vm176_vm4 = vweird.f32 %v444_v32 }
 0x129   :  { %vm177_vm5 = vmor %vm175_vm3, %vm176_vm4 }
 0x12a   :  { %v171_v31 = vmul.f32 %v444_v32, %v170_v29 }
 0x12c   :  { %v172_v38 = vmul.f32 0.5, %v171_v31 }
 0x12e   :  { %v173_v39 = vsub.f32 1.5, %v172_v38 }
 0x12f   :  { %321 = vmatmul.bf16.gmra.mxu3 %v269_v24 }
 0x130   :  { %v174_v42 = vmul.f32 %v444_v32, %v173_v39 }
 0x132   :  { %v178_v46 = vsel %vm177_vm5, %v444_v32, %v174_v42 }
 0x133   :  { %v195_v49 = vmul.f32 %v178_v46, %v529_v36  ;;  %v742_v36 = vperm.slane %v295_v56, 0 }
 0x135   :  { %v206_v52 = vmul.f32 %v705_v45, %v195_v49 }
 0x137   :  { %350 = vmatmul.bf16.gmra.mxu1 %v269_v24  ;;  %v217_v18 = vadd.f32 %v713_v57, %v206_v52 }
 0x138   :  { %379 = vmatmul.bf16.gmra.mxu2 %v269_v24 }
 0x172   :  { %v92_v34 = vpop.xlane.xlu0 %91 }
 0x173   :  { %v100_v35 = vmul.f32 %v92_v34, %v499_v13 }
 0x175   :  { %v108_v37 = vadd.f32 1e-05, %v100_v35 }
 0x177   :  { %445 = vrsqrt.f32 %v108_v37  ;;  %vm185_vm7 = vweird.f32 %v108_v37 }
 0x17d   :  { %v446_v40 = vpop.eup %445 }
 0x17e   :  { %v180_v43 = vmul.f32 %v446_v40, %v108_v37  ;;  %vm186_vm6 = vweird.f32 %v446_v40 }
 0x17f   :  { %vm187_vm8 = vmor %vm185_vm7, %vm186_vm6 }
 0x180   :  { %v181_v44 = vmul.f32 %v446_v40, %v180_v43 }
 0x182   :  { %v182_v47 = vmul.f32 0.5, %v181_v44 }
 0x184   :  { %v183_v48 = vsub.f32 1.5, %v182_v47 }
 0x186   :  { %v184_v50 = vmul.f32 %v446_v40, %v183_v48 }
 0x188   :  { %v188_v13 = vsel %vm187_vm8, %v446_v40, %v184_v50 }
 0x189   :  { %v196_v51 = vmul.f32 %v188_v13, %v691_v8 }
 0x18b   :  { %v207_v53 = vmul.f32 %v705_v45, %v196_v51 }
 0x18d   :  { %v218_v54 = vadd.f32 %v713_v57, %v207_v53  ;;  %v754_v57 = vperm.slane %v295_v56, 2 }
 0x18f   :  { %v270_v55 = vpack.c.bf16 %v218_v54, %v217_v18 }
 0x191   :  { %326 = vmatmul.bf16.gmra.mxu3 %v270_v55  ;;  %355 = vmatmul.bf16.gmra.mxu1 %v270_v55 }
 0x192   :  { %384 = vmatmul.bf16.gmra.mxu2 %v270_v55 }
 0x194   :  { %v312_v8 = vpop.f32.mrf.mxu0  ;;  %v341_v59 = vpop.f32.mrf.mxu1 }
 0x195   :  { %v313_v45 = vadd.f32 %v312_v8, %v742_v36  ;;  %v342_v60 = vadd.f32 %v341_v59, %v744_v58 }
 0x197   :  { %390 = vst [vmem:[%s849_s5] sm:$0xff] %v313_v45 }
 0x198   :  { %391 = vst [vmem:[%s849_s5 + $0x8] sm:$0xff] %v342_v60 }
 0x19b   :  { %v370_v28 = vpop.f32.mrf.mxu2 }
 0x19c   :  { %v371_v61 = vadd.f32 %v370_v28, %v754_v57  ;;  %v314_v62 = vpop.f32.mrf.mxu0  ;;  %v343_v63 = vpop.f32.mrf.mxu1 }
 0x19d   :  { %v315_v0 = vadd.f32 %v314_v62, %v742_v36  ;;  %v344_v1 = vadd.f32 %v343_v63, %v744_v58 }
 0x19e   :  { %392 = vst [vmem:[%s849_s5 + $0x10] sm:$0xff] %v371_v61 }
 0x19f   :  { %393 = vst [vmem:[%s849_s5 + $0x18] sm:$0xff] %v315_v0 }
 0x1a0   :  { %394 = vst [vmem:[%s849_s5 + $0x20] sm:$0xff] %v344_v1 }
 0x1a2   :  { %v317_v2 = vpop.f32.mrf.mxu3 }
 0x1a3   :  { %v318_v3 = vadd.f32 %v317_v2, %v742_v36  ;;  %v372_v4 = vpop.f32.mrf.mxu2 }
 0x1a4   :  { %v373_v5 = vadd.f32 %v372_v4, %v754_v57  ;;  %v346_v6 = vpop.f32.mrf.mxu1 }
 0x1a5   :  { %396 = vst [vmem:[%s849_s5 + $0x30] sm:$0xff] %v318_v3  ;;  %v347_v7 = vadd.f32 %v346_v6, %v744_v58 }
 0x1a6   :  { %395 = vst [vmem:[%s849_s5 + $0x28] sm:$0xff] %v373_v5 }
 0x1a7   :  { %397 = vst [vmem:[%s849_s5 + $0x38] sm:$0xff] %v347_v7 }
 0x1aa   :  { %v319_v25 = vpop.f32.mrf.mxu3 }
 0x1ab   :  { %v320_v9 = vadd.f32 %v319_v25, %v742_v36  ;;  %v375_v10 = vpop.f32.mrf.mxu2 }
 0x1ac   :  { %v376_v11 = vadd.f32 %v375_v10, %v754_v57  ;;  %v348_v33 = vpop.f32.mrf.mxu1 }
 0x1ad   :  { %399 = vst [vmem:[%s849_s5 + $0x48] sm:$0xff] %v320_v9  ;;  %v349_v12 = vadd.f32 %v348_v33, %v744_v58 }
 0x1ae   :  { %398 = vst [vmem:[%s849_s5 + $0x40] sm:$0xff] %v376_v11 }
 0x1af   :  { %400 = vst [vmem:[%s849_s5 + $0x50] sm:$0xff] %v349_v12 }
 0x1b2   :  { %v322_v14 = vpop.f32.mrf.mxu3 }
 0x1b3   :  { %v323_v15 = vadd.f32 %v322_v14, %v742_v36  ;;  %v377_v16 = vpop.f32.mrf.mxu2 }
 0x1b4   :  { %v378_v17 = vadd.f32 %v377_v16, %v754_v57  ;;  %v351_v19 = vpop.f32.mrf.mxu1 }
 0x1b5   :  { %402 = vst [vmem:[%s849_s5 + $0x60] sm:$0xff] %v323_v15  ;;  %v352_v20 = vadd.f32 %v351_v19, %v744_v58 }
 0x1b6   :  { %401 = vst [vmem:[%s849_s5 + $0x58] sm:$0xff] %v378_v17 }
 0x1b7   :  { %403 = vst [vmem:[%s849_s5 + $0x68] sm:$0xff] %v352_v20 }
 0x1ba   :  { %v324_v21 = vpop.f32.mrf.mxu3 }
 0x1bb   :  { %v325_v30 = vadd.f32 %v324_v21, %v742_v36  ;;  %v380_v22 = vpop.f32.mrf.mxu2 }
 0x1bc   :  { %v381_v23 = vadd.f32 %v380_v22, %v754_v57  ;;  %v353_v24 = vpop.f32.mrf.mxu1 }
 0x1bd   :  { %405 = vst [vmem:[%s849_s5 + $0x78] sm:$0xff] %v325_v30  ;;  %v354_v26 = vadd.f32 %v353_v24, %v744_v58 }
 0x1be   :  { %404 = vst [vmem:[%s849_s5 + $0x70] sm:$0xff] %v381_v23 }
 0x1bf   :  { %406 = vst [vmem:[%s849_s5 + $0x80] sm:$0xff] %v354_v26 }
 0x1c3   :  { %v382_v27 = vpop.f32.mrf.mxu2 }
 0x1c4   :  { %v383_v41 = vadd.f32 %v382_v27, %v754_v57 }
 0x1c6   :  { %407 = vst [vmem:[%s849_s5 + $0x88] sm:$0xff] %v383_v41 }
 0x20e   :  { %v356_v32 = vpop.f32.mrf.mxu1 }
 0x20f   :  { %v357_v29 = vadd.f32 %v356_v32, %v744_v58 }
 0x211   :  { %409 = vst [vmem:[%s849_s5 + $0x98] sm:$0xff] %v357_v29 }
 0x214   :  { %v327_v31 = vpop.f32.mrf.mxu3 }
 0x215   :  { %v328_v34 = vadd.f32 %v327_v31, %v742_v36  ;;  %v385_v35 = vpop.f32.mrf.mxu2 }
 0x216   :  { %v386_v37 = vadd.f32 %v385_v35, %v754_v57  ;;  %v358_v38 = vpop.f32.mrf.mxu1 }
 0x217   :  { %408 = vst [vmem:[%s849_s5 + $0x90] sm:$0xff] %v328_v34  ;;  %v359_v39 = vadd.f32 %v358_v38, %v744_v58 }
 0x218   :  { %410 = vst [vmem:[%s849_s5 + $0xa0] sm:$0xff] %v386_v37 }
 0x219   :  { %412 = vst [vmem:[%s849_s5 + $0xb0] sm:$0xff] %v359_v39 }
 0x21c   :  { %v329_v40 = vpop.f32.mrf.mxu3 }
 0x21d   :  { %v330_v42 = vadd.f32 %v329_v40, %v742_v36  ;;  %v387_v43 = vpop.f32.mrf.mxu2 }
 0x21e   :  { %v388_v44 = vadd.f32 %v387_v43, %v754_v57 }
 0x21f   :  { %411 = vst [vmem:[%s849_s5 + $0xa8] sm:$0xff] %v330_v42 }
 0x220   :  { %413 = vst [vmem:[%s849_s5 + $0xb8] sm:$0xff] %v388_v44 }

// kernel: whisper_ppg_forward.14
= control target key start
LH: loop header
LB: loop body
LE: loop exit
PB: predicated region body
PF: predicated region fallthrough
CT: control target
= control target key end

     0   :  { %s691_s15 = smov 0   ;;  %s852_s0 = inlined_call_operand.vmem [shape: f32[2,32,384], index: 0, kind: input, shape index: {}]   ;;  %s853_s1 = inlined_call_operand.vmem [shape: f32[2,32,128], index: 1, kind: input, shape index: {}]   ;;  %s854_s2 = inlined_call_operand.vmem [shape: f32[128,128], index: 2, kind: input, shape index: {}]   ;;  %s855_s3 = inlined_call_operand.vmem [shape: f32[1,128], index: 3, kind: input, shape index: {}]   ;;  %s856_s4 = inlined_call_operand.vmem [shape: f32[2,32,128], index: 4, kind: output, shape index: {}]  }
   0x1 LB: > { %s586_s16 = sadd.s32 4294967295, %s663_s15   ;;  %p590_p0 = scmp.ge.s32.totalorder %s663_s15, 1  ;;  %s663_s15 = sphi %s691_s15, %s14_s15  }
   0x2   : > { %p172_p1 = scmp.lt.s32.totalorder %s663_s15, 3 }
   0x4   : > { %p173_p2 = pnand %p590_p0, %p172_p1 }
   0x5   : > { %p203_p3 = scmp.lt.s32.totalorder (!%p173_p2), %s586_s16, 1 }
   0x6   : > { %176 = sbr.rel (%p173_p2) target bundleno = 732 (0x2dc), region = 36 }
   0xb   : > { %s858_s16 = smov (!%p203_p3, %s586_s16), 1  ;;  %v239_v0 = vlaneseq  ;;  %v665_v16 = vmov 0.0   ;;  %vm273_vm2 = vcmask 261120  }
   0xc   : > { %s614_s17 = smul.u32 96, %s858_s16  ;;  %s604_s29 = sshll.u32 %s858_s16, 5 }
   0xd   : > { %v240_v7 = vand.u32 127, %v239_v0  ;;  %s212_s6 = scalar_lea.vmem %s853_s1, %s604_s29  ;;  %s217_s11 = scalar_lea.vmem %s856_s4, %s604_s29 }
   0xe   : > { %s705_s20 = scalar_lea.vmem %s852_s0, %s614_s17 }
   0xf   : > { %v226_v1 = vld [vmem:[%s705_s20 + $0x38] sm:$0xff]  ;;  %v229_v2 = vld [vmem:[%s705_s20 + $0x50] sm:$0xff]  ;;  %v220_v5 = vld [vmem:[%s705_s20 + $0x8] sm:$0xff]  ;;  %vm242_vm0 = vcmp.lt.s32.totalorder %v240_v7, 64  ;;  %vm326_vm1 = vcmp.ge.s32.totalorder %v240_v7, 64 }
  0x10   : > { %v237_v3 = vmul.f32 0.35355338, %v226_v1  ;;  %v238_v4 = vmul.f32 0.35355338, %v229_v2  ;;  %v223_v6 = vld [vmem:[%s705_s20 + $0x20] sm:$0xff]  ;;  %v222_v12 = vld [vmem:[%s705_s20 + $0x18] sm:$0xff] }
  0x11   : > { %v235_v9 = vmul.f32 0.35355338, %v220_v5  ;;  %v236_v10 = vmul.f32 0.35355338, %v223_v6  ;;  %v219_v11 = vld [vmem:[%s705_s20] sm:$0xff]  ;;  %v713_v17 = vsel %vm242_vm0, 1.0, %v665_v16 }
  0x12   : > { %v253_v8 = vpack.c.bf16 %v238_v4, %v237_v3  ;;  %v231_v13 = vmul.f32 0.35355338, %v219_v11  ;;  %v232_v14 = vmul.f32 0.35355338, %v222_v12  ;;  %v715_v18 = vsel %vm326_vm1, 1.0, %v665_v16  ;;  %v225_v25 = vld [vmem:[%s705_s20 + $0x30] sm:$0xff] }
  0x13   : > { %v252_v15 = vpack.c.bf16 %v236_v10, %v235_v9  ;;  %v228_v26 = vld [vmem:[%s705_s20 + $0x48] sm:$0xff]  ;;  %v233_v27 = vmul.f32 0.35355338, %v225_v25 }
  0x14   : > { %260 = vmatpush.bf16.xpose.msra.mxu0 %v253_v8  ;;  %343 = vmatpush.bf16.xpose.msra.mxu1 %v253_v8  ;;  %v246_v19 = vmul.f32 %v713_v17, %v231_v13  ;;  %v247_v20 = vmul.f32 %v713_v17, %v232_v14  ;;  %v331_v21 = vmul.f32 %v715_v18, %v231_v13  ;;  %v234_v28 = vmul.f32 0.35355338, %v228_v26 }
  0x15   : > { %v332_v22 = vmul.f32 %v715_v18, %v232_v14  ;;  %v248_v29 = vmul.f32 %v713_v17, %v233_v27  ;;  %v333_v31 = vmul.f32 %v715_v18, %v233_v27 }
  0x16   : > { %v250_v23 = vpack.c.bf16 %v247_v20, %v246_v19  ;;  %v249_v30 = vmul.f32 %v713_v17, %v234_v28  ;;  %v334_v32 = vmul.f32 %v715_v18, %v234_v28 }
  0x17   : > { %v335_v24 = vpack.c.bf16 %v332_v22, %v331_v21 }
  0x18   : > { %v251_v33 = vpack.c.bf16 %v249_v30, %v248_v29  ;;  %v336_v34 = vpack.c.bf16 %v334_v32, %v333_v31  ;;  %v227_v29 = vld [vmem:[%s705_s20 + $0x40] sm:$0xff]  ;;  %v230_v30 = vld [vmem:[%s705_s20 + $0x58] sm:$0xff] }
  0x19   : > { %v404_v31 = vmul.f32 %v715_v18, %v227_v29  ;;  %v405_v32 = vmul.f32 %v715_v18, %v230_v30 }
  0x1c   : > { %261 = vmatpush.bf16.xpose.msra.mxu0 %v252_v15  ;;  %344 = vmatpush.bf16.xpose.msra.mxu1 %v252_v15 }
  0x23   : > { %262 = vmatmul.bf16.vlgmr.msra.gmra.mxu0 %v250_v23  ;;  %345 = vmatmul.bf16.vlgmr.msra.gmra.mxu1 %v335_v24 }
  0x33   : > { %267 = vmatmul.bf16.gmra.mxu0 %v251_v33  ;;  %350 = vmatmul.bf16.gmra.mxu1 %v336_v34  ;;  %v322_v33 = vmul.f32 %v713_v17, %v227_v29  ;;  %v323_v34 = vmul.f32 %v713_v17, %v230_v30  ;;  %v458_v30 = vld [vmem:[%s854_s2] sm:$0xff] }
  0xa0   : > { %v263_v35 = vpop.f32.mrf.mxu0  ;;  %v346_v36 = vpop.f32.mrf.mxu1 }
  0xa1   : > { %v356_v37 = vsel %vm273_vm2, %v346_v36, -inf  ;;  %v274_v38 = vsel %vm273_vm2, %v263_v35, -inf }
  0xa2   : > { %357 = vmax.xlane.f32.xlu1 %v356_v37  ;;  %275 = vmax.xlane.f32.xlu0 %v274_v38  ;;  %v221_v37 = vld [vmem:[%s705_s20 + $0x10] sm:$0xff]  ;;  %v224_v38 = vld [vmem:[%s705_s20 + $0x28] sm:$0xff] }
  0xa8   : > { %v265_v39 = vpop.f32.mrf.mxu0  ;;  %v348_v40 = vpop.f32.mrf.mxu1 }
  0xa9   : > { %v359_v41 = vsel %vm273_vm2, %v348_v40, -inf  ;;  %v277_v42 = vsel %vm273_vm2, %v265_v39, -inf }
  0xaa   : > { %360 = vmax.xlane.f32.xlu1 %v359_v41  ;;  %278 = vmax.xlane.f32.xlu0 %v277_v42  ;;  %v320_v41 = vmul.f32 %v713_v17, %v221_v37  ;;  %v321_v42 = vmul.f32 %v713_v17, %v224_v38  ;;  %v471_v17 = vld [vmem:[%s854_s2 + $0x68] sm:$0xff] }
  0xb0   : > { %v268_v43 = vpop.f32.mrf.mxu0  ;;  %v351_v44 = vpop.f32.mrf.mxu1 }
  0xb1   : > { %v362_v45 = vsel %vm273_vm2, %v351_v44, -inf  ;;  %v280_v46 = vsel %vm273_vm2, %v268_v43, -inf }
  0xb2   : > { %363 = vmax.xlane.f32.xlu0 %v362_v45  ;;  %281 = vmax.xlane.f32.xlu2 %v280_v46 }
  0xb8   : > { %v270_v47 = vpop.f32.mrf.mxu0  ;;  %v353_v48 = vpop.f32.mrf.mxu1 }
  0xb9   : > { %v365_v49 = vsel %vm273_vm2, %v353_v48, -inf  ;;  %v283_v50 = vsel %vm273_vm2, %v270_v47, -inf }
  0xba   : > { %366 = vmax.xlane.f32.xlu1 %v365_v49  ;;  %284 = vmax.xlane.f32.xlu2 %v283_v50 }
 0x115   : > { %v358_v51 = vpop.xlane.xlu1 %357  ;;  %v276_v52 = vpop.xlane.xlu0 %275 }
 0x116   : > { %v368_v53 = vsub.f32 %v346_v36, %v358_v51  ;;  %v286_v54 = vsub.f32 %v263_v35, %v276_v52  ;;  %v407_v35 = vpack.c.bf16 %v405_v32, %v404_v31  ;;  %v325_v36 = vpack.c.bf16 %v323_v34, %v322_v33  ;;  %v459_v31 = vld [vmem:[%s854_s2 + $0x8] sm:$0xff] }
 0x117   : > { %v476_v32 = vpack.c.bf16 %v459_v31, %v458_v30 }
 0x118   : > { %v372_v55 = vmul.f32 1.442695, %v368_v53  ;;  %v290_v56 = vmul.f32 1.442695, %v286_v54  ;;  %420 = vmatpush.bf16.msra.mxu2 %v407_v35  ;;  %445 = vmatpush.bf16.msra.mxu3 %v325_v36  ;;  %v468_v53 = vld [vmem:[%s854_s2 + $0x50] sm:$0xff]  ;;  %v469_v54 = vld [vmem:[%s854_s2 + $0x58] sm:$0xff] }
 0x11a   : > { %625 = vpow2.f32 %v372_v55  ;;  %v481_v55 = vpack.c.bf16 %v469_v54, %v468_v53 }
 0x11b   : > { %627 = vpow2.f32 %v290_v56 }
 0x11d   : > { %v361_v57 = vpop.xlane.xlu1 %360  ;;  %v279_v58 = vpop.xlane.xlu0 %278 }
 0x11e   : > { %v369_v59 = vsub.f32 %v348_v40, %v361_v57  ;;  %v287_v60 = vsub.f32 %v265_v39, %v279_v58  ;;  %v402_v39 = vmul.f32 %v715_v18, %v221_v37  ;;  %v403_v40 = vmul.f32 %v715_v18, %v224_v38  ;;  %v470_v18 = vld [vmem:[%s854_s2 + $0x60] sm:$0xff]  ;;  %v467_v58 = vld [vmem:[%s854_s2 + $0x48] sm:$0xff] }
 0x11f   : > { %v482_v52 = vpack.c.bf16 %v471_v17, %v470_v18  ;;  %v466_v57 = vld [vmem:[%s854_s2 + $0x40] sm:$0xff] }
 0x120   : > { %v735_v61 = vpop.eup %625  ;;  %v374_v62 = vmul.f32 1.442695, %v369_v59  ;;  %v292_v63 = vmul.f32 1.442695, %v287_v60  ;;  %v507_v18 = vld [vmem:[%s212_s6] sm:$0xff] }
 0x121   : > { %v737_v0 = vpop.eup %627  ;;  %v380_v1 = vsel %vm273_vm2, %v735_v61, 0.0 }
 0x122   : > { %629 = vpow2.f32 %v374_v62  ;;  %381 = vadd.xlane.f32.xlu1 %v380_v1  ;;  %v298_v2 = vsel %vm273_vm2, %v737_v0, 0.0 }
 0x123   : > { %631 = vpow2.f32 %v292_v63  ;;  %299 = vadd.xlane.f32.xlu2 %v298_v2 }
 0x125   : > { %v364_v3 = vpop.xlane.xlu0 %363  ;;  %v282_v4 = vpop.xlane.xlu2 %281 }
 0x126   : > { %v370_v5 = vsub.f32 %v351_v44, %v364_v3  ;;  %v288_v6 = vsub.f32 %v268_v43, %v282_v4  ;;  %v406_v43 = vpack.c.bf16 %v403_v40, %v402_v39  ;;  %v324_v44 = vpack.c.bf16 %v321_v42, %v320_v41 }
 0x127   : > { %v480_v3 = vpack.c.bf16 %v467_v58, %v466_v57 }
 0x128   : > { %v743_v7 = vpop.eup %629  ;;  %v376_v8 = vmul.f32 1.442695, %v370_v5  ;;  %v294_v9 = vmul.f32 1.442695, %v288_v6  ;;  %421 = vmatpush.bf16.msra.mxu2 %v406_v43  ;;  %446 = vmatpush.bf16.msra.mxu3 %v324_v44  ;;  %v464_v6 = vld [vmem:[%s854_s2 + $0x30] sm:$0xff] }
 0x129   : > { %v745_v10 = vpop.eup %631  ;;  %v383_v11 = vsel %vm273_vm2, %v743_v7, 0.0 }
 0x12a   : > { %633 = vpow2.f32 %v376_v8  ;;  %v301_v12 = vsel %vm273_vm2, %v745_v10, 0.0  ;;  %v465_v8 = vld [vmem:[%s854_s2 + $0x38] sm:$0xff] }
 0x12b   : > { %635 = vpow2.f32 %v294_v9  ;;  %302 = vadd.xlane.f32.xlu0 %v301_v12  ;;  %384 = vadd.xlane.f32.xlu2 %v383_v11 }
 0x12d   : > { %v367_v13 = vpop.xlane.xlu1 %366  ;;  %v285_v14 = vpop.xlane.xlu2 %284 }
 0x12e   : > { %v371_v15 = vsub.f32 %v353_v48, %v367_v13  ;;  %v289_v16 = vsub.f32 %v270_v47, %v285_v14  ;;  %v472_v47 = vld [vmem:[%s854_s2 + $0x70] sm:$0xff]  ;;  %v473_v48 = vld [vmem:[%s854_s2 + $0x78] sm:$0xff] }
 0x12f   : > { %v483_v49 = vpack.c.bf16 %v473_v48, %v472_v47  ;;  %v624_v47 = vld [vmem:[%s855_s3] ss:$0 sm:$0xff] }
 0x130   : > { %v751_v19 = vpop.eup %633  ;;  %v378_v20 = vmul.f32 1.442695, %v371_v15  ;;  %v296_v21 = vmul.f32 1.442695, %v289_v16 }
 0x131   : > { %v753_v22 = vpop.eup %635  ;;  %v386_v23 = vsel %vm273_vm2, %v751_v19, 0.0  ;;  %488 = vmatpush.bf16.msrb.mxu2 %v483_v49  ;;  %606 = vmatpush.bf16.msrb.mxu3 %v483_v49 }
 0x132   : > { %637 = vpow2.f32 %v378_v20  ;;  %v304_v24 = vsel %vm273_vm2, %v753_v22, 0.0 }
 0x133   : > { %639 = vpow2.f32 %v296_v21  ;;  %305 = vadd.xlane.f32.xlu0 %v304_v24  ;;  %387 = vadd.xlane.f32.xlu2 %v386_v23 }
 0x135   : > { %489 = vmatpush.bf16.msrb.mxu2 %v482_v52  ;;  %607 = vmatpush.bf16.msrb.mxu3 %v482_v52 }
 0x138   : > { %v759_v25 = vpop.eup %637 }
 0x139   : > { %v761_v26 = vpop.eup %639  ;;  %v389_v27 = vsel %vm273_vm2, %v759_v25, 0.0  ;;  %490 = vmatpush.bf16.msrb.mxu2 %v481_v55  ;;  %608 = vmatpush.bf16.msrb.mxu3 %v481_v55  ;;  %v509_v55 = vld [vmem:[%s212_s6 + $0x10] sm:$0xff] }
 0x13a   : > { %v307_v28 = vsel %vm273_vm2, %v761_v26, 0.0 }
 0x13b   : > { %390 = vadd.xlane.f32.xlu0 %v389_v27  ;;  %308 = vadd.xlane.f32.xlu1 %v307_v28  ;;  %v462_v28 = vld [vmem:[%s854_s2 + $0x20] sm:$0xff] }
 0x13d   : > { %491 = vmatpush.bf16.msrb.mxu2 %v480_v3  ;;  %609 = vmatpush.bf16.msrb.mxu3 %v480_v3 }
 0x195   : > { %v382_v46 = vpop.xlane.xlu1 %381 }
 0x196   : > { %v300_v45 = vpop.xlane.xlu2 %299 }
 0x197   : > { %641 = vrcp.f32 %v300_v45 }
 0x198   : > { %643 = vrcp.f32 %v382_v46 }
 0x19d   : > { %v642_v56 = vpop.eup %641 }
 0x19e   : > { %v303_v50 = vpop.xlane.xlu0 %302  ;;  %v385_v51 = vpop.xlane.xlu2 %384  ;;  %v314_v1 = vmul.f32 %v642_v56, %v737_v0 }
 0x19f   : > { %645 = vrcp.f32 %v303_v50  ;;  %v644_v59 = vpop.eup %643 }
 0x1a0   : > { %647 = vrcp.f32 %v385_v51  ;;  %v396_v4 = vmul.f32 %v644_v59, %v735_v61  ;;  %v508_v51 = vld [vmem:[%s212_s6 + $0x8] sm:$0xff]  ;;  %v510_v59 = vld [vmem:[%s212_s6 + $0x18] sm:$0xff] }
 0x1a5   : > { %v646_v60 = vpop.eup %645 }
 0x1a6   : > { %v648_v62 = vpop.eup %647  ;;  %v306_v63 = vpop.xlane.xlu0 %305  ;;  %v315_v2 = vmul.f32 %v646_v60, %v745_v10  ;;  %v479_v10 = vpack.c.bf16 %v465_v8, %v464_v6 }
 0x1a7   : > { %v397_v5 = vmul.f32 %v648_v62, %v743_v7  ;;  %v388_v0 = vpop.xlane.xlu2 %387 }
 0x1a8   : > { %v318_v9 = vpack.c.bf16 %v315_v2, %v314_v1  ;;  %649 = vrcp.f32 %v388_v0  ;;  %492 = vmatpush.bf16.msrb.mxu2 %v479_v10  ;;  %610 = vmatpush.bf16.msrb.mxu3 %v479_v10 }
 0x1a9   : > { %v400_v11 = vpack.c.bf16 %v397_v5, %v396_v4  ;;  %651 = vrcp.f32 %v306_v63 }
 0x1aa   : > { %600 = vmatmul.msk.bf16.vlgmr.msra.gmra.mxu3 %vm273_vm2, %v318_v9 }
 0x1ab   : > { %598 = vmatmul.msk.bf16.vlgmr.msra.gmra.mxu2 %vm273_vm2, %v400_v11 }
 0x1ae   : > { %v391_v61 = vpop.xlane.xlu0 %390  ;;  %v309_v7 = vpop.xlane.xlu1 %308 }
 0x1af   : > { %653 = vrcp.f32 %v391_v61  ;;  %v650_v12 = vpop.eup %649 }
 0x1b0   : > { %655 = vrcp.f32 %v309_v7  ;;  %v652_v13 = vpop.eup %651  ;;  %v398_v16 = vmul.f32 %v650_v12, %v751_v19  ;;  %v463_v19 = vld [vmem:[%s854_s2 + $0x28] sm:$0xff] }
 0x1b1   : > { %v316_v21 = vmul.f32 %v652_v13, %v753_v22  ;;  %v478_v29 = vpack.c.bf16 %v463_v19, %v462_v28  ;;  %v460_v22 = vld [vmem:[%s854_s2 + $0x10] sm:$0xff] }
 0x1b3   : > { %493 = vmatpush.bf16.msrb.mxu2 %v478_v29  ;;  %611 = vmatpush.bf16.msrb.mxu3 %v478_v29 }
 0x1b5   : > { %v654_v14 = vpop.eup %653 }
 0x1b6   : > { %v656_v15 = vpop.eup %655  ;;  %v399_v20 = vmul.f32 %v654_v14, %v759_v25  ;;  %v461_v25 = vld [vmem:[%s854_s2 + $0x18] sm:$0xff] }
 0x1b7   : > { %v317_v23 = vmul.f32 %v656_v15, %v761_v26  ;;  %v477_v26 = vpack.c.bf16 %v461_v25, %v460_v22 }
 0x1b8   : > { %v401_v24 = vpack.c.bf16 %v399_v20, %v398_v16 }
 0x1b9   : > { %v319_v27 = vpack.c.bf16 %v317_v23, %v316_v21  ;;  %494 = vmatpush.bf16.msrb.mxu2 %v477_v26  ;;  %612 = vmatpush.bf16.msrb.mxu3 %v477_v26 }
 0x1bb   : > { %599 = vmatmul.msk.bf16.gmra.mxu2 %vm273_vm2, %v401_v24  ;;  %601 = vmatmul.msk.bf16.gmra.mxu3 %vm273_vm2, %v319_v27 }
 0x1bd   : > { %495 = vmatpush.bf16.msrb.mxu2 %v476_v32  ;;  %613 = vmatpush.bf16.msrb.mxu3 %v476_v32 }
 0x22d   : > { %v448_v33 = vpop.f32.mrf.mxu3 }
 0x22e   : > { %v423_v34 = vpop.f32.mrf.mxu2 }
 0x22f   : > { %v449_v37 = vadd.f32 %v448_v33, %v423_v34 }
 0x235   : > { %v450_v35 = vpop.f32.mrf.mxu3 }
 0x236   : > { %v425_v36 = vpop.f32.mrf.mxu2 }
 0x237   : > { %v451_v38 = vadd.f32 %v450_v35, %v425_v36 }
 0x239   : > { %v474_v39 = vpack.c.bf16 %v451_v38, %v449_v37 }
 0x23b   : > { %496 = vmatmul.bf16.vlgmr.msrb.gmra.mxu2 %v474_v39 }
 0x23e   : > { %v428_v40 = vpop.f32.mrf.mxu2  ;;  %v453_v41 = vpop.f32.mrf.mxu3 }
 0x23f   : > { %v454_v44 = vadd.f32 %v453_v41, %v428_v40 }
 0x246   : > { %v430_v42 = vpop.f32.mrf.mxu2  ;;  %v455_v43 = vpop.f32.mrf.mxu3 }
 0x247   : > { %v456_v45 = vadd.f32 %v455_v43, %v430_v42 }
 0x249   : > { %v475_v46 = vpack.c.bf16 %v456_v45, %v454_v44 }
 0x24b   : > { %501 = vmatmul.bf16.vlgmr.msrb.gmra.mxu3 %v475_v46 }
 0x2be   : > { %v497_v48 = vpop.f32.mrf.mxu2 }
 0x2bf   : > { %v498_v49 = vadd.f32 %v624_v47, %v497_v48 }
 0x2c1   : > { %v511_v17 = vadd.f32 %v507_v18, %v498_v49 }
 0x2c3   : > { %515 = vst [vmem:[%s217_s11] sm:$0xff] %v511_v17 }
 0x2c6   : > { %v499_v50 = vpop.f32.mrf.mxu2 }
 0x2c7   : > { %v500_v52 = vadd.f32 %v624_v47, %v499_v50 }
 0x2c9   : > { %v512_v53 = vadd.f32 %v508_v51, %v500_v52 }
 0x2cb   : > { %516 = vst [vmem:[%s217_s11 + $0x8] sm:$0xff] %v512_v53 }
 0x2ce   : > { %v502_v54 = vpop.f32.mrf.mxu3 }
 0x2cf   : > { %v503_v56 = vadd.f32 %v624_v47, %v502_v54 }
 0x2d1   : > { %v513_v57 = vadd.f32 %v509_v55, %v503_v56 }
 0x2d3   : > { %517 = vst [vmem:[%s217_s11 + $0x10] sm:$0xff] %v513_v57 }
 0x2d6   : > { %v504_v58 = vpop.f32.mrf.mxu3 }
 0x2d7   : > { %v505_v60 = vadd.f32 %v624_v47, %v504_v58 }
 0x2d9   : > { %v514_v62 = vadd.f32 %v510_v59, %v505_v60 }
 0x2db   : > { %518 = vst [vmem:[%s217_s11 + $0x18] sm:$0xff] %v514_v62 }
 0x2dc PF: > { %s14_s15 = sadd.s32 1, %s663_s15  }
 0x2dd   : > { %p11_p4 = scmp.ge.s32.totalorder %s14_s15, 4  }
 0x2df   :  { %13 = sbr.rel (!%p11_p4) target bundleno = 1 (0x1), region = 69 }

// kernel: whisper_ppg_forward.19
= control target key start
LH: loop header
LB: loop body
LE: loop exit
PB: predicated region body
PF: predicated region fallthrough
CT: control target
= control target key end

     0   :  { %v246_v8 = vmov 128.0   ;;  %s430_s0 = inlined_call_operand.vmem [shape: f32[64,128], index: 0, kind: input, shape index: {}]   ;;  %s431_s1 = inlined_call_operand.vmem [shape: f32[1,128], index: 1, kind: input, shape index: {}]   ;;  %s432_s2 = inlined_call_operand.vmem [shape: f32[1,128], index: 2, kind: input, shape index: {}]   ;;  %s433_s3 = inlined_call_operand.vmem [shape: f32[64,128], index: 3, kind: output, shape index: {}]  }
   0x1   :  { %v18_v0 = vld [vmem:[%s430_s0 + $0x20] sm:$0xff]  ;;  %v16_v1 = vld [vmem:[%s430_s0 + $0x10] sm:$0xff]  ;;  %v19_v3 = vld [vmem:[%s430_s0 + $0x28] sm:$0xff]  ;;  %228 = vrcp.f32 %v246_v8 }
   0x2   :  { %v14_v2 = vld [vmem:[%s430_s0] sm:$0xff]  ;;  %32 = vadd.xlane.f32.xlu2 %v18_v0  ;;  %28 = vadd.xlane.f32.xlu1 %v16_v1  ;;  %v17_v4 = vld [vmem:[%s430_s0 + $0x18] sm:$0xff]  ;;  %v15_v5 = vld [vmem:[%s430_s0 + $0x8] sm:$0xff] }
   0x3   :  { %24 = vadd.xlane.f32.xlu0 %v14_v2  ;;  %v21_v6 = vld [vmem:[%s430_s0 + $0x38] sm:$0xff]  ;;  %v20_v7 = vld [vmem:[%s430_s0 + $0x30] sm:$0xff] }
   0x7   :  { %v229_v9 = vpop.eup %228 }
   0x8   :  { %v41_v10 = vmul.f32 128.0, %v229_v9  ;;  %vm45_vm0 = vweird.f32 %v229_v9 }
   0xa   :  { %34 = vadd.xlane.f32.xlu2 %v19_v3  ;;  %30 = vadd.xlane.f32.xlu1 %v17_v4  ;;  %v42_v11 = vsub.f32 1.0, %v41_v10 }
   0xb   :  { %26 = vadd.xlane.f32.xlu0 %v15_v5 }
   0xc   :  { %v43_v12 = vmul.f32 %v229_v9, %v42_v11 }
   0xe   :  { %v44_v13 = vadd.f32 %v229_v9, %v43_v12 }
  0x10   :  { %v291_v14 = vsel %vm45_vm0, %v229_v9, %v44_v13 }
  0x12   :  { %38 = vadd.xlane.f32.xlu1 %v21_v6 }
  0x13   :  { %36 = vadd.xlane.f32.xlu0 %v20_v7 }
  0x75   :  { %v33_v15 = vpop.xlane.xlu2 %32  ;;  %v29_v16 = vpop.xlane.xlu1 %28 }
  0x76   :  { %v49_v17 = vmul.f32 %v291_v14, %v29_v16  ;;  %v25_v18 = vpop.xlane.xlu0 %24  ;;  %v51_v32 = vmul.f32 %v291_v14, %v33_v15 }
  0x77   :  { %v47_v19 = vmul.f32 %v291_v14, %v25_v18 }
  0x78   :  { %v295_v20 = vsub.f32 %v16_v1, %v49_v17  ;;  %v319_v37 = vsub.f32 %v18_v0, %v51_v32 }
  0x79   :  { %v297_v21 = vsub.f32 %v14_v2, %v47_v19  ;;  %v351_v19 = vld [vmem:[%s431_s1] ss:$0 sm:$0xff] }
  0x7a   :  { %v65_v22 = vmul.f32 %v295_v20, %v295_v20  ;;  %v67_v42 = vmul.f32 %v319_v37, %v319_v37 }
  0x7b   :  { %v63_v23 = vmul.f32 %v297_v21, %v297_v21 }
  0x7c   :  { %75 = vadd.xlane.f32.xlu1 %v65_v22 }
  0x7d   :  { %71 = vadd.xlane.f32.xlu2 %v63_v23  ;;  %v35_v24 = vpop.xlane.xlu2 %34  ;;  %v31_v25 = vpop.xlane.xlu1 %30 }
  0x7e   :  { %v52_v26 = vmul.f32 %v291_v14, %v35_v24  ;;  %v50_v27 = vmul.f32 %v291_v14, %v31_v25  ;;  %v27_v28 = vpop.xlane.xlu0 %26 }
  0x7f   :  { %v48_v29 = vmul.f32 %v291_v14, %v27_v28  ;;  %v361_v28 = vld [vmem:[%s432_s2] ss:$0 sm:$0xff] }
  0x80   :  { %v306_v30 = vsub.f32 %v19_v3, %v52_v26  ;;  %v308_v31 = vsub.f32 %v17_v4, %v50_v27 }
  0x81   :  { %v311_v33 = vsub.f32 %v15_v5, %v48_v29 }
  0x82   :  { %v68_v34 = vmul.f32 %v306_v30, %v306_v30  ;;  %v66_v35 = vmul.f32 %v308_v31, %v308_v31 }
  0x83   :  { %v64_v36 = vmul.f32 %v311_v33, %v311_v33 }
  0x84   :  { %81 = vadd.xlane.f32.xlu1 %v68_v34 }
  0x85   :  { %77 = vadd.xlane.f32.xlu2 %v66_v35  ;;  %73 = vadd.xlane.f32.xlu0 %v64_v36  ;;  %v39_v39 = vpop.xlane.xlu1 %38 }
  0x86   :  { %v37_v38 = vpop.xlane.xlu0 %36  ;;  %v54_v43 = vmul.f32 %v291_v14, %v39_v39 }
  0x87   :  { %v53_v40 = vmul.f32 %v291_v14, %v37_v38 }
  0x88   :  { %v329_v45 = vsub.f32 %v21_v6, %v54_v43 }
  0x89   :  { %v322_v41 = vsub.f32 %v20_v7, %v53_v40 }
  0x8a   :  { %v70_v46 = vmul.f32 %v329_v45, %v329_v45 }
  0x8b   :  { %v69_v44 = vmul.f32 %v322_v41, %v322_v41 }
  0x8d   :  { %79 = vadd.xlane.f32.xlu0 %v67_v42  ;;  %83 = vadd.xlane.f32.xlu2 %v69_v44 }
  0x95   :  { %85 = vadd.xlane.f32.xlu0 %v70_v46 }
  0xef   :  { %v76_v47 = vpop.xlane.xlu1 %75 }
  0xf0   :  { %v89_v48 = vmul.f32 %v76_v47, %v291_v14  ;;  %v72_v49 = vpop.xlane.xlu2 %71 }
  0xf1   :  { %v87_v50 = vmul.f32 %v72_v49, %v291_v14 }
  0xf2   :  { %v97_v51 = vadd.f32 1e-05, %v89_v48 }
  0xf3   :  { %v95_v52 = vadd.f32 1e-05, %v87_v50 }
  0xf4   :  { %230 = vrsqrt.f32 %v97_v51  ;;  %vm129_vm1 = vweird.f32 %v97_v51 }
  0xf5   :  { %232 = vrsqrt.f32 %v95_v52  ;;  %vm109_vm5 = vweird.f32 %v95_v52 }
  0xf7   :  { %v82_v53 = vpop.xlane.xlu1 %81 }
  0xf8   :  { %v92_v54 = vmul.f32 %v82_v53, %v291_v14  ;;  %v78_v55 = vpop.xlane.xlu2 %77  ;;  %v74_v56 = vpop.xlane.xlu0 %73 }
  0xf9   :  { %v90_v57 = vmul.f32 %v78_v55, %v291_v14  ;;  %v88_v58 = vmul.f32 %v74_v56, %v291_v14 }
  0xfa   :  { %v231_v59 = vpop.eup %230  ;;  %v100_v60 = vadd.f32 1e-05, %v92_v54 }
  0xfb   :  { %v233_v61 = vpop.eup %232  ;;  %v124_v62 = vmul.f32 %v231_v59, %v97_v51  ;;  %v338_v63 = vadd.f32 1e-05, %v90_v57  ;;  %v340_v0 = vadd.f32 1e-05, %v88_v58  ;;  %vm130_vm2 = vweird.f32 %v231_v59 }
  0xfc   :  { %v104_v1 = vmul.f32 %v233_v61, %v95_v52  ;;  %234 = vrsqrt.f32 %v100_v60  ;;  %vm110_vm3 = vweird.f32 %v233_v61  ;;  %vm131_vm4 = vmor %vm129_vm1, %vm130_vm2  ;;  %vm159_vm7 = vweird.f32 %v100_v60 }
  0xfd   :  { %v125_v2 = vmul.f32 %v231_v59, %v124_v62  ;;  %236 = vrsqrt.f32 %v338_v63  ;;  %vm111_vm6 = vmor %vm109_vm5, %vm110_vm3  ;;  %vm139_vm9 = vweird.f32 %v338_v63  ;;  %vm119_vm14 = vweird.f32 %v340_v0 }
  0xfe   :  { %v105_v3 = vmul.f32 %v233_v61, %v104_v1  ;;  %238 = vrsqrt.f32 %v340_v0 }
  0xff   :  { %v126_v4 = vmul.f32 0.5, %v125_v2 }
 0x100   :  { %v106_v5 = vmul.f32 0.5, %v105_v3  ;;  %v84_v6 = vpop.xlane.xlu2 %83  ;;  %v80_v7 = vpop.xlane.xlu0 %79 }
 0x101   :  { %v127_v8 = vsub.f32 1.5, %v126_v4  ;;  %v93_v9 = vmul.f32 %v84_v6, %v291_v14  ;;  %v91_v10 = vmul.f32 %v80_v7, %v291_v14 }
 0x102   :  { %v235_v11 = vpop.eup %234  ;;  %v107_v12 = vsub.f32 1.5, %v106_v5 }
 0x103   :  { %v237_v13 = vpop.eup %236  ;;  %v128_v15 = vmul.f32 %v231_v59, %v127_v8  ;;  %v154_v16 = vmul.f32 %v235_v11, %v100_v60  ;;  %v346_v17 = vadd.f32 1e-05, %v93_v9  ;;  %v355_v24 = vadd.f32 1e-05, %v91_v10 }
 0x104   :  { %v239_v18 = vpop.eup %238  ;;  %v108_v22 = vmul.f32 %v233_v61, %v107_v12  ;;  %v134_v23 = vmul.f32 %v237_v13, %v338_v63  ;;  %vm160_vm8 = vweird.f32 %v235_v11  ;;  %vm140_vm11 = vweird.f32 %v237_v13 }
 0x105   :  { %v132_v25 = vsel %vm131_vm4, %v231_v59, %v128_v15  ;;  %v155_v26 = vmul.f32 %v235_v11, %v154_v16  ;;  %v114_v27 = vmul.f32 %v239_v18, %v340_v0  ;;  %240 = vrsqrt.f32 %v346_v17  ;;  %vm373_vm10 = vmor %vm159_vm7, %vm160_vm8 }
 0x106   :  { %v185_v29 = vmul.f32 %v132_v25, %v295_v20  ;;  %v112_v32 = vsel %vm111_vm6, %v233_v61, %v108_v22  ;;  %v135_v34 = vmul.f32 %v237_v13, %v134_v23  ;;  %242 = vrsqrt.f32 %v355_v24  ;;  %vm141_vm13 = vmor %vm139_vm9, %vm140_vm11 }
 0x107   :  { %v183_v35 = vmul.f32 %v112_v32, %v297_v21  ;;  %v156_v36 = vmul.f32 0.5, %v155_v26  ;;  %v115_v38 = vmul.f32 %v239_v18, %v114_v27  ;;  %vm120_vm12 = vweird.f32 %v239_v18 }
 0x108   :  { %v196_v39 = vmul.f32 %v351_v19, %v185_v29  ;;  %v136_v40 = vmul.f32 0.5, %v135_v34  ;;  %v86_v42 = vpop.xlane.xlu0 %85  ;;  %vm121_vm15 = vmor %vm119_vm14, %vm120_vm12  ;;  %vm169_vm0 = vweird.f32 %v346_v17  ;;  %vm149_vm4 = vweird.f32 %v355_v24 }
 0x109   :  { %v194_v43 = vmul.f32 %v351_v19, %v183_v35  ;;  %v157_v20 = vsub.f32 1.5, %v156_v36  ;;  %v116_v44 = vmul.f32 0.5, %v115_v38  ;;  %v94_v46 = vmul.f32 %v86_v42, %v291_v14 }
 0x10a   :  { %v207_v47 = vadd.f32 %v361_v28, %v196_v39  ;;  %v137_v48 = vsub.f32 1.5, %v136_v40 }
 0x10b   :  { %v205_v49 = vadd.f32 %v361_v28, %v194_v43  ;;  %v158_v50 = vmul.f32 %v235_v11, %v157_v20  ;;  %v117_v51 = vsub.f32 1.5, %v116_v44  ;;  %v102_v52 = vadd.f32 1e-05, %v94_v46  ;;  %v241_v53 = vpop.eup %240 }
 0x10c   :  { %215 = vst [vmem:[%s433_s3 + $0x10] sm:$0xff] %v207_v47  ;;  %v138_v14 = vmul.f32 %v237_v13, %v137_v48  ;;  %v164_v56 = vmul.f32 %v241_v53, %v346_v17  ;;  %v243_v57 = vpop.eup %242  ;;  %vm170_vm1 = vweird.f32 %v241_v53 }
 0x10d   :  { %213 = vst [vmem:[%s433_s3] sm:$0xff] %v205_v49  ;;  %v162_v54 = vsel %vm373_vm10, %v235_v11, %v158_v50  ;;  %v118_v55 = vmul.f32 %v239_v18, %v117_v51  ;;  %244 = vrsqrt.f32 %v102_v52  ;;  %v144_v1 = vmul.f32 %v243_v57, %v355_v24  ;;  %vm171_vm3 = vmor %vm169_vm0, %vm170_vm1 }
 0x10e   :  { %v188_v58 = vmul.f32 %v162_v54, %v306_v30  ;;  %v142_v59 = vsel %vm141_vm13, %v237_v13, %v138_v14  ;;  %v165_v62 = vmul.f32 %v241_v53, %v164_v56  ;;  %vm150_vm2 = vweird.f32 %v243_v57 }
 0x10f   :  { %v186_v60 = vmul.f32 %v142_v59, %v308_v31  ;;  %v122_v61 = vsel %vm121_vm15, %v239_v18, %v118_v55  ;;  %v145_v4 = vmul.f32 %v243_v57, %v144_v1  ;;  %vm151_vm5 = vmor %vm149_vm4, %vm150_vm2  ;;  %vm179_vm7 = vweird.f32 %v102_v52 }
 0x110   :  { %v199_v63 = vmul.f32 %v351_v19, %v188_v58  ;;  %v184_v2 = vmul.f32 %v122_v61, %v311_v33  ;;  %v166_v3 = vmul.f32 0.5, %v165_v62 }
 0x111   :  { %v197_v0 = vmul.f32 %v351_v19, %v186_v60  ;;  %v146_v7 = vmul.f32 0.5, %v145_v4 }
 0x112   :  { %v210_v30 = vadd.f32 %v361_v28, %v199_v63  ;;  %v195_v5 = vmul.f32 %v351_v19, %v184_v2  ;;  %v167_v6 = vsub.f32 1.5, %v166_v3 }
 0x113   :  { %v208_v31 = vadd.f32 %v361_v28, %v197_v0  ;;  %v245_v8 = vpop.eup %244  ;;  %v147_v10 = vsub.f32 1.5, %v146_v7 }
 0x114   :  { %218 = vst [vmem:[%s433_s3 + $0x28] sm:$0xff] %v210_v30  ;;  %v206_v33 = vadd.f32 %v361_v28, %v195_v5  ;;  %v168_v9 = vmul.f32 %v241_v53, %v167_v6  ;;  %v174_v11 = vmul.f32 %v245_v8, %v102_v52  ;;  %vm180_vm6 = vweird.f32 %v245_v8 }
 0x115   :  { %216 = vst [vmem:[%s433_s3 + $0x18] sm:$0xff] %v208_v31  ;;  %v148_v13 = vmul.f32 %v243_v57, %v147_v10  ;;  %vm181_vm8 = vmor %vm179_vm7, %vm180_vm6 }
 0x116   :  { %214 = vst [vmem:[%s433_s3 + $0x8] sm:$0xff] %v206_v33  ;;  %v172_v12 = vsel %vm171_vm3, %v241_v53, %v168_v9  ;;  %v175_v15 = vmul.f32 %v245_v8, %v174_v11 }
 0x117   :  { %v189_v16 = vmul.f32 %v172_v12, %v322_v41  ;;  %v152_v17 = vsel %vm151_vm5, %v243_v57, %v148_v13 }
 0x118   :  { %v176_v18 = vmul.f32 0.5, %v175_v15  ;;  %v187_v23 = vmul.f32 %v152_v17, %v319_v37 }
 0x119   :  { %v200_v22 = vmul.f32 %v351_v19, %v189_v16 }
 0x11a   :  { %v177_v25 = vsub.f32 1.5, %v176_v18  ;;  %v198_v27 = vmul.f32 %v351_v19, %v187_v23 }
 0x11b   :  { %v211_v26 = vadd.f32 %v361_v28, %v200_v22 }
 0x11c   :  { %v178_v29 = vmul.f32 %v245_v8, %v177_v25  ;;  %v209_v41 = vadd.f32 %v361_v28, %v198_v27 }
 0x11d   :  { %219 = vst [vmem:[%s433_s3 + $0x30] sm:$0xff] %v211_v26 }
 0x11e   :  { %v182_v24 = vsel %vm181_vm8, %v245_v8, %v178_v29  ;;  %217 = vst [vmem:[%s433_s3 + $0x20] sm:$0xff] %v209_v41 }
 0x11f   :  { %v190_v37 = vmul.f32 %v182_v24, %v329_v45 }
 0x121   :  { %v201_v32 = vmul.f32 %v351_v19, %v190_v37 }
 0x123   :  { %v212_v34 = vadd.f32 %v361_v28, %v201_v32 }
 0x125   :  { %220 = vst [vmem:[%s433_s3 + $0x38] sm:$0xff] %v212_v34 }

// kernel: whisper_ppg_forward.15
= control target key start
LH: loop header
LB: loop body
LE: loop exit
PB: predicated region body
PF: predicated region fallthrough
CT: control target
= control target key end

     0   :  { %v1093_v7 = vmov 128.0   ;;  %s1935_s0 = inlined_call_operand.vmem [shape: f32[64,128], index: 0, kind: input, shape index: {}]   ;;  %s1936_s1 = inlined_call_operand.vmem [shape: f32[1,128], index: 1, kind: input, shape index: {}]   ;;  %s1937_s2 = inlined_call_operand.vmem [shape: f32[1,128], index: 2, kind: input, shape index: {}]   ;;  %s1938_s3 = inlined_call_operand.vmem [shape: f32[128,512], index: 3, kind: input, shape index: {}]   ;;  %s1939_s5 = inlined_call_operand.vmem [shape: f32[512,128], index: 5, kind: input, shape index: {}]   ;;  %s1940_s4 = inlined_call_operand.vmem [shape: f32[1,512], index: 4, kind: input, shape index: {}]   ;;  %s1941_s6 = inlined_call_operand.vmem [shape: f32[1,128], index: 6, kind: input, shape index: {}]   ;;  %s1942_s7 = inlined_call_operand.vmem [shape: f32[64,128], index: 7, kind: output, shape index: {}]  }
   0x1   :  { %v30_v0 = vld [vmem:[%s1935_s0 + $0x20] sm:$0xff]  ;;  %v28_v1 = vld [vmem:[%s1935_s0 + $0x10] sm:$0xff]  ;;  %v31_v3 = vld [vmem:[%s1935_s0 + $0x28] sm:$0xff]  ;;  %1003 = vrcp.f32 %v1093_v7 }
   0x2   :  { %v26_v2 = vld [vmem:[%s1935_s0] sm:$0xff]  ;;  %44 = vadd.xlane.f32.xlu2 %v30_v0  ;;  %40 = vadd.xlane.f32.xlu1 %v28_v1  ;;  %v29_v4 = vld [vmem:[%s1935_s0 + $0x18] sm:$0xff]  ;;  %v27_v5 = vld [vmem:[%s1935_s0 + $0x8] sm:$0xff] }
   0x3   :  { %36 = vadd.xlane.f32.xlu0 %v26_v2  ;;  %v32_v6 = vld [vmem:[%s1935_s0 + $0x30] sm:$0xff]  ;;  %v1175_v30 = vld [vmem:[%s1935_s0 + $0x38] sm:$0xff]  ;;  %v281_v43 = vld [vmem:[%s1938_s3 + $0x1c0] sm:$0xff] }
   0x4   :  { %v285_v44 = vld [vmem:[%s1938_s3 + $0x1e0] sm:$0xff]  ;;  %v282_v45 = vld [vmem:[%s1938_s3 + $0x1c8] sm:$0xff]  ;;  %v283_v48 = vld [vmem:[%s1938_s3 + $0x1d0] sm:$0xff] }
   0x5   :  { %v321_v46 = vpack.c.bf16 %v285_v44, %v281_v43  ;;  %v286_v47 = vld [vmem:[%s1938_s3 + $0x1e8] sm:$0xff]  ;;  %v287_v49 = vld [vmem:[%s1938_s3 + $0x1f0] sm:$0xff]  ;;  %v284_v52 = vld [vmem:[%s1938_s3 + $0x1d8] sm:$0xff] }
   0x6   :  { %v322_v50 = vpack.c.bf16 %v286_v47, %v282_v45  ;;  %v323_v51 = vpack.c.bf16 %v287_v49, %v283_v48  ;;  %v288_v53 = vld [vmem:[%s1938_s3 + $0x1f8] sm:$0xff]  ;;  %v273_v55 = vld [vmem:[%s1938_s3 + $0x180] sm:$0xff]  ;;  %v274_v57 = vld [vmem:[%s1938_s3 + $0x188] sm:$0xff] }
   0x7   :  { %v1004_v8 = vpop.eup %1003  ;;  %335 = vmatpush.bf16.msra.mxu0 %v321_v46  ;;  %v324_v54 = vpack.c.bf16 %v288_v53, %v284_v52  ;;  %v277_v56 = vld [vmem:[%s1938_s3 + $0x1a0] sm:$0xff]  ;;  %v278_v59 = vld [vmem:[%s1938_s3 + $0x1a8] sm:$0xff]  ;;  %v275_v60 = vld [vmem:[%s1938_s3 + $0x190] sm:$0xff] }
   0x8   :  { %v53_v9 = vmul.f32 128.0, %v1004_v8  ;;  %vm57_vm0 = vweird.f32 %v1004_v8  ;;  %364 = vmatpush.bf16.msra.mxu1 %v322_v50  ;;  %393 = vmatpush.bf16.msra.mxu2 %v323_v51  ;;  %v317_v58 = vpack.c.bf16 %v277_v56, %v273_v55  ;;  %v279_v61 = vld [vmem:[%s1938_s3 + $0x1b0] sm:$0xff]  ;;  %v318_v62 = vpack.c.bf16 %v278_v59, %v274_v57  ;;  %v270_v7 = vld [vmem:[%s1938_s3 + $0x168] sm:$0xff]  ;;  %v252_v45 = vld [vmem:[%s1938_s3 + $0xd8] sm:$0xff] }
   0x9   :  { %422 = vmatpush.bf16.msra.mxu3 %v324_v54  ;;  %v319_v63 = vpack.c.bf16 %v279_v61, %v275_v60  ;;  %v256_v46 = vld [vmem:[%s1938_s3 + $0xf8] sm:$0xff]  ;;  %v241_v48 = vld [vmem:[%s1938_s3 + $0x80] sm:$0xff]  ;;  %v242_v50 = vld [vmem:[%s1938_s3 + $0x88] sm:$0xff] }
   0xa   :  { %46 = vadd.xlane.f32.xlu2 %v31_v3  ;;  %42 = vadd.xlane.f32.xlu1 %v29_v4  ;;  %v54_v10 = vsub.f32 1.0, %v53_v9  ;;  %v271_v9 = vld [vmem:[%s1938_s3 + $0x170] sm:$0xff]  ;;  %v308_v47 = vpack.c.bf16 %v256_v46, %v252_v45  ;;  %v245_v49 = vld [vmem:[%s1938_s3 + $0xa0] sm:$0xff]  ;;  %v246_v52 = vld [vmem:[%s1938_s3 + $0xa8] sm:$0xff] }
   0xb   :  { %38 = vadd.xlane.f32.xlu0 %v27_v5  ;;  %336 = vmatpush.bf16.msra.mxu0 %v317_v58  ;;  %v301_v51 = vpack.c.bf16 %v245_v49, %v241_v48  ;;  %v243_v53 = vld [vmem:[%s1938_s3 + $0x90] sm:$0xff]  ;;  %v302_v55 = vpack.c.bf16 %v246_v52, %v242_v50  ;;  %v244_v57 = vld [vmem:[%s1938_s3 + $0x98] sm:$0xff]  ;;  %v233_v60 = vld [vmem:[%s1938_s3 + $0x40] sm:$0xff] }
   0xc   :  { %v55_v11 = vmul.f32 %v1004_v8, %v54_v10  ;;  %365 = vmatpush.bf16.msra.mxu1 %v318_v62  ;;  %394 = vmatpush.bf16.msra.mxu2 %v319_v63  ;;  %v247_v54 = vld [vmem:[%s1938_s3 + $0xb0] sm:$0xff]  ;;  %v248_v58 = vld [vmem:[%s1938_s3 + $0xb8] sm:$0xff]  ;;  %v237_v61 = vld [vmem:[%s1938_s3 + $0x60] sm:$0xff] }
   0xd   :  { %v303_v56 = vpack.c.bf16 %v247_v54, %v243_v53  ;;  %v304_v59 = vpack.c.bf16 %v248_v58, %v244_v57  ;;  %v234_v62 = vld [vmem:[%s1938_s3 + $0x48] sm:$0xff]  ;;  %v297_v63 = vpack.c.bf16 %v237_v61, %v233_v60 }
   0xe   :  { %v56_v12 = vadd.f32 %v1004_v8, %v55_v11 }
  0x10   :  { %v1155_v13 = vsel %vm57_vm0, %v1004_v8, %v56_v12  ;;  %v267_v8 = vld [vmem:[%s1938_s3 + $0x150] sm:$0xff]  ;;  %v268_v12 = vld [vmem:[%s1938_s3 + $0x158] sm:$0xff] }
  0x11   :  { %v315_v11 = vpack.c.bf16 %v271_v9, %v267_v8 }
  0x12   :  { %48 = vadd.xlane.f32.xlu2 %v32_v6 }
  0x13   :  { %395 = vmatpush.bf16.msra.mxu2 %v315_v11  ;;  %v229_v11 = vld [vmem:[%s1938_s3 + $0x20] sm:$0xff] }
  0x75   :  { %v45_v14 = vpop.xlane.xlu2 %44  ;;  %v41_v15 = vpop.xlane.xlu1 %40 }
  0x76   :  { %v37_v16 = vpop.xlane.xlu0 %36  ;;  %v63_v26 = vmul.f32 %v1155_v13, %v45_v14  ;;  %v61_v27 = vmul.f32 %v1155_v13, %v41_v15  ;;  %v272_v14 = vld [vmem:[%s1938_s3 + $0x178] sm:$0xff] }
  0x77   :  { %v59_v17 = vmul.f32 %v1155_v13, %v37_v16  ;;  %v316_v15 = vpack.c.bf16 %v272_v14, %v268_v12  ;;  %v257_v16 = vld [vmem:[%s1938_s3 + $0x100] sm:$0xff]  ;;  %v226_v12 = vld [vmem:[%s1938_s3 + $0x8] sm:$0xff] }
  0x78   :  { %v1179_v32 = vsub.f32 %v30_v0, %v63_v26  ;;  %v1181_v33 = vsub.f32 %v28_v1, %v61_v27  ;;  %v276_v0 = vld [vmem:[%s1938_s3 + $0x198] sm:$0xff] }
  0x79   :  { %v1158_v18 = vsub.f32 %v26_v2, %v59_v17  ;;  %v280_v1 = vld [vmem:[%s1938_s3 + $0x1b8] sm:$0xff]  ;;  %v261_v17 = vld [vmem:[%s1938_s3 + $0x120] sm:$0xff] }
  0x7a   :  { %v79_v38 = vmul.f32 %v1179_v32, %v1179_v32  ;;  %v77_v39 = vmul.f32 %v1181_v33, %v1181_v33  ;;  %v320_v2 = vpack.c.bf16 %v280_v1, %v276_v0  ;;  %v260_v27 = vld [vmem:[%s1938_s3 + $0x118] sm:$0xff]  ;;  %v238_v0 = vld [vmem:[%s1938_s3 + $0x68] sm:$0xff]  ;;  %v235_v1 = vld [vmem:[%s1938_s3 + $0x50] sm:$0xff] }
  0x7b   :  { %v75_v19 = vmul.f32 %v1158_v18, %v1158_v18 }
  0x7c   :  { %423 = vmatpush.bf16.msra.mxu3 %v320_v2  ;;  %v239_v2 = vld [vmem:[%s1938_s3 + $0x70] sm:$0xff] }
  0x7d   :  { %83 = vadd.xlane.f32.xlu0 %v75_v19  ;;  %v47_v20 = vpop.xlane.xlu2 %46  ;;  %v43_v21 = vpop.xlane.xlu1 %42  ;;  %v258_v19 = vld [vmem:[%s1938_s3 + $0x108] sm:$0xff] }
  0x7e   :  { %v62_v22 = vmul.f32 %v1155_v13, %v43_v21  ;;  %v39_v23 = vpop.xlane.xlu0 %38  ;;  %v64_v37 = vmul.f32 %v1155_v13, %v47_v20  ;;  %v309_v20 = vpack.c.bf16 %v261_v17, %v257_v16  ;;  %v262_v21 = vld [vmem:[%s1938_s3 + $0x128] sm:$0xff]  ;;  %v227_v17 = vld [vmem:[%s1938_s3 + $0x10] sm:$0xff] }
  0x7f   :  { %v60_v24 = vmul.f32 %v1155_v13, %v39_v23  ;;  %v263_v23 = vld [vmem:[%s1938_s3 + $0x130] sm:$0xff]  ;;  %v230_v16 = vld [vmem:[%s1938_s3 + $0x28] sm:$0xff] }
  0x80   :  { %v1164_v25 = vsub.f32 %v29_v4, %v62_v22  ;;  %v1194_v41 = vsub.f32 %v31_v3, %v64_v37  ;;  %v265_v3 = vld [vmem:[%s1938_s3 + $0x140] sm:$0xff]  ;;  %424 = vmatpush.bf16.msra.mxu3 %v316_v15  ;;  %v259_v22 = vld [vmem:[%s1938_s3 + $0x110] sm:$0xff]  ;;  %v250_v37 = vld [vmem:[%s1938_s3 + $0xc8] sm:$0xff] }
  0x81   :  { %v1168_v28 = vsub.f32 %v27_v5, %v60_v24  ;;  %v269_v4 = vld [vmem:[%s1938_s3 + $0x160] sm:$0xff]  ;;  %v266_v5 = vld [vmem:[%s1938_s3 + $0x148] sm:$0xff]  ;;  %v310_v24 = vpack.c.bf16 %v262_v21, %v258_v19  ;;  %v311_v26 = vpack.c.bf16 %v263_v23, %v259_v22  ;;  %v231_v19 = vld [vmem:[%s1938_s3 + $0x30] sm:$0xff] }
  0x82   :  { %v78_v29 = vmul.f32 %v1164_v25, %v1164_v25  ;;  %v80_v42 = vmul.f32 %v1194_v41, %v1194_v41  ;;  %v314_v10 = vpack.c.bf16 %v270_v7, %v266_v5  ;;  %v299_v5 = vpack.c.bf16 %v239_v2, %v235_v1  ;;  %v240_v7 = vld [vmem:[%s1938_s3 + $0x78] sm:$0xff] }
  0x83   :  { %v76_v31 = vmul.f32 %v1168_v28, %v1168_v28  ;;  %396 = vmatpush.bf16.msra.mxu2 %v311_v26  ;;  %v295_v21 = vpack.c.bf16 %v231_v19, %v227_v17  ;;  %v228_v22 = vld [vmem:[%s1938_s3 + $0x18] sm:$0xff] }
  0x84   :  { %89 = vadd.xlane.f32.xlu2 %v78_v29  ;;  %366 = vmatpush.bf16.msra.mxu1 %v314_v10  ;;  %v264_v29 = vld [vmem:[%s1938_s3 + $0x138] sm:$0xff]  ;;  %v225_v10 = vld [vmem:[%s1938_s3] sm:$0xff] }
  0x85   :  { %50 = vadd.xlane.f32.xlu0 %v1175_v30  ;;  %85 = vadd.xlane.f32.xlu1 %v76_v31  ;;  %v49_v34 = vpop.xlane.xlu2 %48  ;;  %v312_v31 = vpack.c.bf16 %v264_v29, %v260_v27  ;;  %v293_v15 = vpack.c.bf16 %v229_v11, %v225_v10  ;;  %v232_v23 = vld [vmem:[%s1938_s3 + $0x38] sm:$0xff] }
  0x86   :  { %v65_v35 = vmul.f32 %v1155_v13, %v49_v34  ;;  %v249_v34 = vld [vmem:[%s1938_s3 + $0xc0] sm:$0xff] }
  0x87   :  { %425 = vmatpush.bf16.msra.mxu3 %v312_v31 }
  0x88   :  { %v1185_v36 = vsub.f32 %v32_v6, %v65_v35  ;;  %v313_v6 = vpack.c.bf16 %v269_v4, %v265_v3  ;;  %367 = vmatpush.bf16.msra.mxu1 %v310_v24  ;;  %v253_v35 = vld [vmem:[%s1938_s3 + $0xe0] sm:$0xff]  ;;  %v298_v4 = vpack.c.bf16 %v238_v0, %v234_v62  ;;  %v296_v24 = vpack.c.bf16 %v232_v23, %v228_v22 }
  0x8a   :  { %v81_v40 = vmul.f32 %v1185_v36, %v1185_v36  ;;  %337 = vmatpush.bf16.msra.mxu0 %v313_v6  ;;  %v236_v6 = vld [vmem:[%s1938_s3 + $0x58] sm:$0xff] }
  0x8b   :  { %426 = vmatpush.bf16.msra.mxu3 %v308_v47  ;;  %v300_v9 = vpack.c.bf16 %v240_v7, %v236_v6 }
  0x8c   :  { %95 = vadd.xlane.f32.xlu2 %v81_v40  ;;  %v251_v40 = vld [vmem:[%s1938_s3 + $0xd0] sm:$0xff] }
  0x8d   :  { %91 = vadd.xlane.f32.xlu0 %v79_v38  ;;  %87 = vadd.xlane.f32.xlu1 %v77_v39  ;;  %v305_v38 = vpack.c.bf16 %v253_v35, %v249_v34  ;;  %v254_v39 = vld [vmem:[%s1938_s3 + $0xe8] sm:$0xff] }
  0x8e   :  { %338 = vmatpush.bf16.msra.mxu0 %v309_v20  ;;  %v306_v43 = vpack.c.bf16 %v254_v39, %v250_v37  ;;  %v294_v20 = vpack.c.bf16 %v230_v16, %v226_v12 }
  0x8f   :  { %427 = vmatpush.bf16.msra.mxu3 %v304_v59 }
  0x90   :  { %368 = vmatpush.bf16.msra.mxu1 %v306_v43 }
  0x92   :  { %339 = vmatpush.bf16.msra.mxu0 %v305_v38 }
  0x93   :  { %428 = vmatpush.bf16.msra.mxu3 %v300_v9 }
  0x94   :  { %369 = vmatpush.bf16.msra.mxu1 %v302_v55 }
  0x95   :  { %93 = vadd.xlane.f32.xlu1 %v80_v42  ;;  %v255_v42 = vld [vmem:[%s1938_s3 + $0xf0] sm:$0xff] }
  0x96   :  { %v307_v44 = vpack.c.bf16 %v255_v42, %v251_v40  ;;  %340 = vmatpush.bf16.msra.mxu0 %v301_v51 }
  0x97   :  { %429 = vmatpush.bf16.msra.mxu3 %v296_v24 }
  0x98   :  { %397 = vmatpush.bf16.msra.mxu2 %v307_v44  ;;  %370 = vmatpush.bf16.msra.mxu1 %v298_v4 }
  0x9a   :  { %341 = vmatpush.bf16.msra.mxu0 %v297_v63 }
  0x9c   :  { %398 = vmatpush.bf16.msra.mxu2 %v303_v56  ;;  %371 = vmatpush.bf16.msra.mxu1 %v294_v20 }
  0x9e   :  { %342 = vmatpush.bf16.msra.mxu0 %v293_v15 }
  0xa0   :  { %399 = vmatpush.bf16.msra.mxu2 %v299_v5  ;;  %v1417_v5 = vld [vmem:[%s1936_s1] ss:$0 sm:$0xff] }
  0xa4   :  { %400 = vmatpush.bf16.msra.mxu2 %v295_v21 }
  0xf0   :  { %v84_v3 = vpop.xlane.xlu0 %83 }
  0xf1   :  { %v99_v8 = vmul.f32 %v84_v3, %v1155_v13 }
  0xf3   :  { %v107_v14 = vadd.f32 1e-05, %v99_v8 }
  0xf5   :  { %1005 = vrsqrt.f32 %v107_v14  ;;  %vm121_vm2 = vweird.f32 %v107_v14 }
  0xf7   :  { %v90_v26 = vpop.xlane.xlu2 %89 }
  0xf8   :  { %v102_v27 = vmul.f32 %v90_v26, %v1155_v13  ;;  %v86_v29 = vpop.xlane.xlu1 %85  ;;  %v51_v31 = vpop.xlane.xlu0 %50 }
  0xf9   :  { %v100_v34 = vmul.f32 %v86_v29, %v1155_v13  ;;  %v66_v35 = vmul.f32 %v1155_v13, %v51_v31 }
  0xfa   :  { %v1394_v37 = vadd.f32 1e-05, %v102_v27 }
  0xfb   :  { %v1006_v38 = vpop.eup %1005  ;;  %v108_v39 = vadd.f32 1e-05, %v100_v34  ;;  %v1397_v40 = vsub.f32 %v1175_v30, %v66_v35 }
  0xfc   :  { %v116_v42 = vmul.f32 %v1006_v38, %v107_v14  ;;  %1007 = vrsqrt.f32 %v1394_v37  ;;  %vm122_vm1 = vweird.f32 %v1006_v38  ;;  %vm151_vm9 = vweird.f32 %v1394_v37 }
  0xfd   :  { %1009 = vrsqrt.f32 %v108_v39  ;;  %v82_v43 = vmul.f32 %v1397_v40, %v1397_v40  ;;  %vm123_vm3 = vmor %vm121_vm2, %vm122_vm1  ;;  %vm131_vm4 = vweird.f32 %v108_v39 }
  0xfe   :  { %v117_v44 = vmul.f32 %v1006_v38, %v116_v42 }
  0xff   :  { %97 = vadd.xlane.f32.xlu0 %v82_v43 }
 0x100   :  { %v118_v45 = vmul.f32 0.5, %v117_v44  ;;  %v88_v46 = vpop.xlane.xlu1 %87  ;;  %v92_v48 = vpop.xlane.xlu0 %91 }
 0x101   :  { %v101_v47 = vmul.f32 %v88_v46, %v1155_v13  ;;  %v103_v53 = vmul.f32 %v92_v48, %v1155_v13 }
 0x102   :  { %v1403_v49 = vpop.eup %1007  ;;  %v119_v50 = vsub.f32 1.5, %v118_v45 }
 0x103   :  { %v1010_v51 = vpop.eup %1009  ;;  %v109_v30 = vadd.f32 1e-05, %v101_v47  ;;  %v146_v55 = vmul.f32 %v1403_v49, %v1394_v37  ;;  %v1408_v58 = vadd.f32 1e-05, %v103_v53  ;;  %vm152_vm10 = vweird.f32 %v1403_v49 }
 0x104   :  { %v126_v52 = vmul.f32 %v1010_v51, %v108_v39  ;;  %v120_v54 = vmul.f32 %v1006_v38, %v119_v50  ;;  %vm132_vm5 = vweird.f32 %v1010_v51  ;;  %vm153_vm12 = vmor %vm151_vm9, %vm152_vm10 }
 0x105   :  { %1011 = vrsqrt.f32 %v109_v30  ;;  %v147_v61 = vmul.f32 %v1403_v49, %v146_v55  ;;  %vm133_vm6 = vmor %vm131_vm4, %vm132_vm5  ;;  %vm141_vm7 = vweird.f32 %v109_v30  ;;  %vm161_vm15 = vweird.f32 %v1408_v58 }
 0x106   :  { %v127_v56 = vmul.f32 %v1010_v51, %v126_v52  ;;  %v124_v60 = vsel %vm123_vm3, %v1006_v38, %v120_v54  ;;  %1013 = vrsqrt.f32 %v1408_v58 }
 0x107   :  { %v195_v2 = vmul.f32 %v124_v60, %v1158_v18  ;;  %v148_v6 = vmul.f32 0.5, %v147_v61  ;;  %v1424_v18 = vld [vmem:[%s1937_s2] ss:$0 sm:$0xff] }
 0x108   :  { %v128_v57 = vmul.f32 0.5, %v127_v56  ;;  %v94_v59 = vpop.xlane.xlu1 %93  ;;  %v96_v56 = vpop.xlane.xlu2 %95 }
 0x109   :  { %v104_v62 = vmul.f32 %v94_v59, %v1155_v13  ;;  %v206_v11 = vmul.f32 %v1417_v5, %v195_v2  ;;  %v149_v12 = vsub.f32 1.5, %v148_v6  ;;  %v769_v2 = vld [vmem:[%s1939_s5 + $0xf0] sm:$0xff] }
 0x10a   :  { %v129_v63 = vsub.f32 1.5, %v128_v57  ;;  %v105_v57 = vmul.f32 %v96_v56, %v1155_v13  ;;  %v798_v56 = vld [vmem:[%s1939_s5 + $0x1d8] sm:$0xff] }
 0x10b   :  { %v1012_v0 = vpop.eup %1011  ;;  %v112_v1 = vadd.f32 1e-05, %v104_v62  ;;  %v217_v20 = vadd.f32 %v1424_v18, %v206_v11  ;;  %v150_v21 = vmul.f32 %v1403_v49, %v149_v12  ;;  %v768_v11 = vld [vmem:[%s1939_s5 + $0xe8] sm:$0xff] }
 0x10c   :  { %v130_v3 = vmul.f32 %v1010_v51, %v129_v63  ;;  %v136_v4 = vmul.f32 %v1012_v0, %v109_v30  ;;  %vm142_vm8 = vweird.f32 %v1012_v0  ;;  %v1014_v15 = vpop.eup %1013 }
 0x10d   :  { %1015 = vrsqrt.f32 %v112_v1  ;;  %vm143_vm11 = vmor %vm141_vm7, %vm142_vm8  ;;  %v156_v22 = vmul.f32 %v1014_v15, %v1408_v58  ;;  %v154_v29 = vsel %vm153_vm12, %v1403_v49, %v150_v21  ;;  %vm171_vm13 = vweird.f32 %v112_v1 }
 0x10e   :  { %v134_v7 = vsel %vm133_vm6, %v1010_v51, %v130_v3  ;;  %v137_v8 = vmul.f32 %v1012_v0, %v136_v4  ;;  %v198_v37 = vmul.f32 %v154_v29, %v1164_v25  ;;  %vm162_vm0 = vweird.f32 %v1014_v15 }
 0x10f   :  { %v196_v9 = vmul.f32 %v134_v7, %v1168_v28  ;;  %v157_v31 = vmul.f32 %v1014_v15, %v156_v22  ;;  %vm163_vm2 = vmor %vm161_vm15, %vm162_vm0  ;;  %v113_v58 = vadd.f32 1e-05, %v105_v57  ;;  %v751_v7 = vld [vmem:[%s1939_s5 + $0x60] sm:$0xff] }
 0x110   :  { %v138_v10 = vmul.f32 0.5, %v137_v8  ;;  %v209_v43 = vmul.f32 %v1417_v5, %v198_v37  ;;  %v752_v8 = vld [vmem:[%s1939_s5 + $0x68] sm:$0xff]  ;;  %v783_v37 = vld [vmem:[%s1939_s5 + $0x160] sm:$0xff] }
 0x111   :  { %v207_v14 = vmul.f32 %v1417_v5, %v196_v9  ;;  %v158_v38 = vmul.f32 0.5, %v157_v31  ;;  %1017 = vrsqrt.f32 %v113_v58  ;;  %v767_v9 = vld [vmem:[%s1939_s5 + $0xe0] sm:$0xff]  ;;  %vm181_vm3 = vweird.f32 %v113_v58  ;;  %v766_v31 = vld [vmem:[%s1939_s5 + $0xd8] sm:$0xff] }
 0x112   :  { %v139_v16 = vsub.f32 1.5, %v138_v10  ;;  %v825_v10 = vpack.c.bf16 %v752_v8, %v751_v7  ;;  %v833_v12 = vpack.c.bf16 %v768_v11, %v767_v9  ;;  %v743_v7 = vld [vmem:[%s1939_s5 + $0x20] sm:$0xff]  ;;  %v744_v8 = vld [vmem:[%s1939_s5 + $0x28] sm:$0xff] }
 0x113   :  { %v218_v28 = vadd.f32 %v1424_v18, %v207_v14  ;;  %v1016_v17 = vpop.eup %1015  ;;  %v159_v44 = vsub.f32 1.5, %v158_v38  ;;  %v785_v14 = vld [vmem:[%s1939_s5 + $0x170] sm:$0xff]  ;;  %v784_v38 = vld [vmem:[%s1939_s5 + $0x168] sm:$0xff] }
 0x114   :  { %v140_v19 = vmul.f32 %v1012_v0, %v139_v16  ;;  %v166_v23 = vmul.f32 %v1016_v17, %v112_v1  ;;  %vm172_vm14 = vweird.f32 %v1016_v17  ;;  %v754_v1 = vld [vmem:[%s1939_s5 + $0x78] sm:$0xff]  ;;  %v801_v16 = vld [vmem:[%s1939_s5 + $0x1f0] sm:$0xff]  ;;  %v760_v11 = vld [vmem:[%s1939_s5 + $0xa8] sm:$0xff] }
 0x115   :  { %v289_v24 = vpack.c.bf16 %v218_v28, %v217_v20  ;;  %vm173_vm1 = vmor %vm171_vm13, %vm172_vm14  ;;  %v160_v47 = vmul.f32 %v1014_v15, %v159_v44 }
 0x116   :  { %v144_v26 = vsel %vm143_vm11, %v1012_v0, %v140_v19  ;;  %v167_v27 = vmul.f32 %v1016_v17, %v166_v23  ;;  %v753_v0 = vld [vmem:[%s1939_s5 + $0x70] sm:$0xff]  ;;  %v802_v19 = vld [vmem:[%s1939_s5 + $0x1f8] sm:$0xff] }
 0x117   :  { %343 = vmatmul.bf16.vlgmr.msra.gmra.mxu0 %v289_v24  ;;  %372 = vmatmul.bf16.vlgmr.msra.gmra.mxu1 %v289_v24  ;;  %v197_v34 = vmul.f32 %v144_v26, %v1181_v33  ;;  %v220_v33 = vadd.f32 %v1424_v18, %v209_v43  ;;  %v164_v49 = vsel %vm163_vm2, %v1014_v15, %v160_v47  ;;  %v786_v15 = vld [vmem:[%s1939_s5 + $0x178] sm:$0xff]  ;;  %v749_v23 = vld [vmem:[%s1939_s5 + $0x50] sm:$0xff]  ;;  %v800_v43 = vld [vmem:[%s1939_s5 + $0x1e8] sm:$0xff] }
 0x118   :  { %401 = vmatmul.bf16.vlgmr.msra.gmra.mxu2 %v289_v24  ;;  %430 = vmatmul.bf16.vlgmr.msra.gmra.mxu3 %v289_v24  ;;  %v168_v35 = vmul.f32 0.5, %v167_v27  ;;  %v199_v51 = vmul.f32 %v164_v49, %v1179_v32  ;;  %v826_v3 = vpack.c.bf16 %v754_v1, %v753_v0  ;;  %v850_v22 = vpack.c.bf16 %v802_v19, %v801_v16  ;;  %v750_v24 = vld [vmem:[%s1939_s5 + $0x58] sm:$0xff]  ;;  %v765_v26 = vld [vmem:[%s1939_s5 + $0xd0] sm:$0xff]  ;;  %v748_v47 = vld [vmem:[%s1939_s5 + $0x48] sm:$0xff] }
 0x119   :  { %v208_v39 = vmul.f32 %v1417_v5, %v197_v34  ;;  %v824_v29 = vpack.c.bf16 %v750_v24, %v749_v23  ;;  %v764_v49 = vld [vmem:[%s1939_s5 + $0xc8] sm:$0xff]  ;;  %v795_v1 = vld [vmem:[%s1939_s5 + $0x1c0] sm:$0xff]  ;;  %v794_v19 = vld [vmem:[%s1939_s5 + $0x1b8] sm:$0xff] }
 0x11a   :  { %v169_v42 = vsub.f32 1.5, %v168_v35  ;;  %v210_v52 = vmul.f32 %v1417_v5, %v199_v51  ;;  %851 = vmatpush.bf16.msrb.mxu0 %v826_v3  ;;  %938 = vmatpush.bf16.msrb.mxu3 %v850_v22  ;;  %v832_v35 = vpack.c.bf16 %v766_v31, %v765_v26  ;;  %v780_v0 = vld [vmem:[%s1939_s5 + $0x148] sm:$0xff]  ;;  %v742_v22 = vld [vmem:[%s1939_s5 + $0x18] sm:$0xff]  ;;  %v325_v24 = vld [vmem:[%s1940_s4] sm:$0xf] }
 0x11b   :  { %v219_v45 = vadd.f32 %v1424_v18, %v208_v39  ;;  %v799_v39 = vld [vmem:[%s1939_s5 + $0x1e0] sm:$0xff]  ;;  %v758_v27 = vld [vmem:[%s1939_s5 + $0x98] sm:$0xff] }
 0x11c   :  { %v170_v46 = vmul.f32 %v1016_v17, %v169_v42  ;;  %v221_v54 = vadd.f32 %v1424_v18, %v210_v52  ;;  %v841_v42 = vpack.c.bf16 %v784_v38, %v783_v37  ;;  %v782_v52 = vld [vmem:[%s1939_s5 + $0x158] sm:$0xff]  ;;  %v775_v31 = vld [vmem:[%s1939_s5 + $0x120] sm:$0xff]  ;;  %v792_v38 = vld [vmem:[%s1939_s5 + $0x1a8] sm:$0xff] }
 0x11d   :  { %v290_v25 = vpack.c.bf16 %v220_v33, %v219_v45  ;;  %v747_v33 = vld [vmem:[%s1939_s5 + $0x40] sm:$0xff] }
 0x11e   :  { %v174_v48 = vsel %vm173_vm1, %v1016_v17, %v170_v46  ;;  %852 = vmatpush.bf16.msrb.mxu0 %v825_v10  ;;  %v842_v17 = vpack.c.bf16 %v786_v15, %v785_v14  ;;  %v849_v46 = vpack.c.bf16 %v800_v43, %v799_v39  ;;  %v821_v10 = vpack.c.bf16 %v744_v8, %v743_v7  ;;  %v777_v14 = vld [vmem:[%s1939_s5 + $0x130] sm:$0xff]  ;;  %v778_v15 = vld [vmem:[%s1939_s5 + $0x138] sm:$0xff] }
 0x11f   :  { %v200_v50 = vmul.f32 %v174_v48, %v1194_v41  ;;  %v1448_v41 = vpop.eup %1017  ;;  %v823_v48 = vpack.c.bf16 %v748_v47, %v747_v33  ;;  %v1644_v39 = vperm.slane %v325_v24, 0  ;;  %v756_v47 = vld [vmem:[%s1939_s5 + $0x88] sm:$0xff] }
 0x120   :  { %v176_v32 = vmul.f32 %v1448_v41, %v113_v58  ;;  %vm182_vm4 = vweird.f32 %v1448_v41  ;;  %909 = vmatpush.bf16.msrb.mxu2 %v842_v17  ;;  %939 = vmatpush.bf16.msrb.mxu3 %v849_v46  ;;  %v838_v17 = vpack.c.bf16 %v778_v15, %v777_v14  ;;  %v755_v46 = vld [vmem:[%s1939_s5 + $0x80] sm:$0xff] }
 0x121   :  { %v211_v30 = vmul.f32 %v1417_v5, %v200_v50  ;;  %vm1510_vm5 = vmor %vm181_vm3, %vm182_vm4 }
 0x122   :  { %v177_v59 = vmul.f32 %v1448_v41, %v176_v32  ;;  %853 = vmatpush.bf16.msrb.mxu0 %v824_v29  ;;  %v761_v32 = vld [vmem:[%s1939_s5 + $0xb0] sm:$0xff] }
 0x123   :  { %v222_v53 = vadd.f32 %v1424_v18, %v211_v30  ;;  %v781_v30 = vld [vmem:[%s1939_s5 + $0x150] sm:$0xff] }
 0x124   :  { %v178_v63 = vmul.f32 0.5, %v177_v59  ;;  %910 = vmatpush.bf16.msrb.mxu2 %v841_v42  ;;  %v1646_v42 = vperm.slane %v325_v24, 1 }
 0x125   :  { %v291_v55 = vpack.c.bf16 %v222_v53, %v221_v54  ;;  %v797_v53 = vld [vmem:[%s1939_s5 + $0x1d0] sm:$0xff] }
 0x126   :  { %v179_v6 = vsub.f32 1.5, %v178_v63  ;;  %854 = vmatpush.bf16.msrb.mxu0 %v823_v48  ;;  %v848_v58 = vpack.c.bf16 %v798_v56, %v797_v53  ;;  %v779_v63 = vld [vmem:[%s1939_s5 + $0x140] sm:$0xff]  ;;  %v773_v48 = vld [vmem:[%s1939_s5 + $0x110] sm:$0xff]  ;;  %v790_v53 = vld [vmem:[%s1939_s5 + $0x198] sm:$0xff] }
 0x127   :  { %348 = vmatmul.bf16.gmra.mxu0 %v290_v25  ;;  %377 = vmatmul.bf16.gmra.mxu1 %v290_v25 }
 0x128   :  { %406 = vmatmul.bf16.gmra.mxu2 %v290_v25  ;;  %435 = vmatmul.bf16.gmra.mxu3 %v290_v25  ;;  %v180_v20 = vmul.f32 %v1448_v41, %v179_v6  ;;  %v763_v25 = vld [vmem:[%s1939_s5 + $0xc0] sm:$0xff] }
 0x129   :  { %v831_v51 = vpack.c.bf16 %v764_v49, %v763_v25  ;;  %940 = vmatpush.bf16.msrb.mxu3 %v848_v58  ;;  %v827_v25 = vpack.c.bf16 %v756_v47, %v755_v46  ;;  %v774_v49 = vld [vmem:[%s1939_s5 + $0x118] sm:$0xff] }
 0x12a   :  { %v184_v44 = vsel %vm1510_vm5, %v1448_v41, %v180_v20  ;;  %v745_v41 = vld [vmem:[%s1939_s5 + $0x30] sm:$0xff] }
 0x12b   :  { %v201_v54 = vmul.f32 %v184_v44, %v1185_v36  ;;  %v746_v36 = vld [vmem:[%s1939_s5 + $0x38] sm:$0xff]  ;;  %v739_v44 = vld [vmem:[%s1939_s5] sm:$0xff] }
 0x12c   :  { %v822_v59 = vpack.c.bf16 %v746_v36, %v745_v41  ;;  %v1677_v41 = vperm.slane %v325_v24, 2  ;;  %v1679_v36 = vperm.slane %v325_v24, 3 }
 0x12d   :  { %v212_v3 = vmul.f32 %v1417_v5, %v201_v54 }
 0x12e   :  { %855 = vmatpush.bf16.msrb.mxu0 %v822_v59  ;;  %v772_v59 = vld [vmem:[%s1939_s5 + $0x108] sm:$0xff] }
 0x12f   :  { %v223_v16 = vadd.f32 %v1424_v18, %v212_v3 }
 0x132   :  { %856 = vmatpush.bf16.msrb.mxu0 %v821_v10 }
 0x137   :  { %353 = vmatmul.bf16.gmra.mxu0 %v291_v55  ;;  %382 = vmatmul.bf16.gmra.mxu1 %v291_v55 }
 0x138   :  { %411 = vmatmul.bf16.gmra.mxu2 %v291_v55  ;;  %440 = vmatmul.bf16.gmra.mxu3 %v291_v55  ;;  %v840_v55 = vpack.c.bf16 %v782_v52, %v781_v30  ;;  %v836_v52 = vpack.c.bf16 %v774_v49, %v773_v48 }
 0x13a   :  { %911 = vmatpush.bf16.msrb.mxu2 %v840_v55 }
 0x172   :  { %v98_v60 = vpop.xlane.xlu0 %97 }
 0x173   :  { %v106_v61 = vmul.f32 %v98_v60, %v1155_v13  ;;  %v770_v13 = vld [vmem:[%s1939_s5 + $0xf8] sm:$0xff] }
 0x174   :  { %v834_v4 = vpack.c.bf16 %v770_v13, %v769_v2  ;;  %v762_v60 = vld [vmem:[%s1939_s5 + $0xb8] sm:$0xff]  ;;  %v839_v13 = vpack.c.bf16 %v780_v0, %v779_v63  ;;  %v788_v0 = vld [vmem:[%s1939_s5 + $0x188] sm:$0xff] }
 0x175   :  { %v1453_v62 = vadd.f32 1e-05, %v106_v61 }
 0x176   :  { %880 = vmatpush.bf16.msrb.mxu1 %v834_v4  ;;  %v796_v4 = vld [vmem:[%s1939_s5 + $0x1c8] sm:$0xff]  ;;  %912 = vmatpush.bf16.msrb.mxu2 %v839_v13 }
 0x177   :  { %1019 = vrsqrt.f32 %v1453_v62  ;;  %vm191_vm7 = vweird.f32 %v1453_v62  ;;  %v847_v6 = vpack.c.bf16 %v796_v4, %v795_v1 }
 0x179   :  { %941 = vmatpush.bf16.msrb.mxu3 %v847_v6 }
 0x17a   :  { %881 = vmatpush.bf16.msrb.mxu1 %v833_v12  ;;  %913 = vmatpush.bf16.msrb.mxu2 %v838_v17 }
 0x17d   :  { %v1490_v28 = vpop.eup %1019 }
 0x17e   :  { %v186_v21 = vmul.f32 %v1490_v28, %v1453_v62  ;;  %882 = vmatpush.bf16.msrb.mxu1 %v832_v35  ;;  %vm192_vm6 = vweird.f32 %v1490_v28  ;;  %v830_v62 = vpack.c.bf16 %v762_v60, %v761_v32  ;;  %v791_v35 = vld [vmem:[%s1939_s5 + $0x1a0] sm:$0xff] }
 0x17f   :  { %vm193_vm8 = vmor %vm191_vm7, %vm192_vm6  ;;  %v845_v43 = vpack.c.bf16 %v792_v38, %v791_v35  ;;  %v771_v32 = vld [vmem:[%s1939_s5 + $0x100] sm:$0xff] }
 0x180   :  { %v187_v34 = vmul.f32 %v1490_v28, %v186_v21  ;;  %v741_v21 = vld [vmem:[%s1939_s5 + $0x10] sm:$0xff]  ;;  %v787_v60 = vld [vmem:[%s1939_s5 + $0x180] sm:$0xff]  ;;  %v835_v63 = vpack.c.bf16 %v772_v59, %v771_v32 }
 0x181   :  { %v820_v26 = vpack.c.bf16 %v742_v22, %v741_v21  ;;  %v843_v1 = vpack.c.bf16 %v788_v0, %v787_v60 }
 0x182   :  { %v188_v45 = vmul.f32 0.5, %v187_v34  ;;  %883 = vmatpush.bf16.msrb.mxu1 %v831_v51  ;;  %v776_v34 = vld [vmem:[%s1939_s5 + $0x128] sm:$0xff] }
 0x183   :  { %v837_v37 = vpack.c.bf16 %v776_v34, %v775_v31  ;;  %857 = vmatpush.bf16.msrb.mxu0 %v820_v26 }
 0x184   :  { %v189_v50 = vsub.f32 1.5, %v188_v45  ;;  %v740_v45 = vld [vmem:[%s1939_s5 + $0x8] sm:$0xff] }
 0x185   :  { %v819_v33 = vpack.c.bf16 %v740_v45, %v739_v44  ;;  %914 = vmatpush.bf16.msrb.mxu2 %v837_v37 }
 0x186   :  { %v190_v57 = vmul.f32 %v1490_v28, %v189_v50  ;;  %884 = vmatpush.bf16.msrb.mxu1 %v830_v62  ;;  %v789_v50 = vld [vmem:[%s1939_s5 + $0x190] sm:$0xff] }
 0x187   :  { %v844_v56 = vpack.c.bf16 %v790_v53, %v789_v50  ;;  %858 = vmatpush.bf16.msrb.mxu0 %v819_v33 }
 0x188   :  { %v194_v61 = vsel %vm193_vm8, %v1490_v28, %v190_v57 }
 0x189   :  { %v202_v2 = vmul.f32 %v194_v61, %v1397_v40  ;;  %v759_v40 = vld [vmem:[%s1939_s5 + $0xa0] sm:$0xff]  ;;  %915 = vmatpush.bf16.msrb.mxu2 %v836_v52 }
 0x18a   :  { %v829_v12 = vpack.c.bf16 %v760_v11, %v759_v40 }
 0x18b   :  { %v213_v9 = vmul.f32 %v1417_v5, %v202_v2  ;;  %v793_v5 = vld [vmem:[%s1939_s5 + $0x1b0] sm:$0xff] }
 0x18c   :  { %885 = vmatpush.bf16.msrb.mxu1 %v829_v12  ;;  %v846_v20 = vpack.c.bf16 %v794_v19, %v793_v5 }
 0x18d   :  { %v224_v28 = vadd.f32 %v1424_v18, %v213_v9  ;;  %v757_v18 = vld [vmem:[%s1939_s5 + $0x90] sm:$0xff]  ;;  %916 = vmatpush.bf16.msrb.mxu2 %v835_v63 }
 0x18e   :  { %942 = vmatpush.bf16.msrb.mxu3 %v846_v20  ;;  %v828_v29 = vpack.c.bf16 %v758_v27, %v757_v18 }
 0x18f   :  { %v292_v23 = vpack.c.bf16 %v224_v28, %v223_v16 }
 0x190   :  { %886 = vmatpush.bf16.msrb.mxu1 %v828_v29 }
 0x191   :  { %358 = vmatmul.bf16.gmra.mxu0 %v292_v23  ;;  %387 = vmatmul.bf16.gmra.mxu1 %v292_v23 }
 0x192   :  { %416 = vmatmul.bf16.gmra.mxu2 %v292_v23  ;;  %445 = vmatmul.bf16.gmra.mxu3 %v292_v23 }
 0x193   :  { %943 = vmatpush.bf16.msrb.mxu3 %v845_v43 }
 0x194   :  { %v344_v51 = vpop.f32.mrf.mxu0  ;;  %v373_v30 = vpop.f32.mrf.mxu1  ;;  %887 = vmatpush.bf16.msrb.mxu1 %v827_v25 }
 0x195   :  { %v345_v54 = vadd.f32 %v344_v51, %v1644_v39  ;;  %v1674_v55 = vadd.f32 %v373_v30, %v1646_v42 }
 0x197   :  { %v483_v57 = vmul.f32 0.044715, %v345_v54  ;;  %v484_v58 = vmul.f32 0.044715, %v1674_v55  ;;  %944 = vmatpush.bf16.msrb.mxu3 %v844_v56  ;;  %v451_v25 = vmul.f32 0.5, %v345_v54  ;;  %v452_v51 = vmul.f32 0.5, %v1674_v55 }
 0x199   :  { %v515_v61 = vmul.f32 %v483_v57, %v345_v54  ;;  %v516_v62 = vmul.f32 %v484_v58, %v1674_v55 }
 0x19b   :  { %v402_v2 = vpop.f32.mrf.mxu2  ;;  %v431_v3 = vpop.f32.mrf.mxu3  ;;  %v547_v13 = vmul.f32 %v515_v61, %v345_v54  ;;  %v548_v4 = vmul.f32 %v516_v62, %v1674_v55  ;;  %945 = vmatpush.bf16.msrb.mxu3 %v843_v1 }
 0x19c   :  { %v403_v6 = vadd.f32 %v402_v2, %v1677_v41  ;;  %v432_v7 = vadd.f32 %v431_v3, %v1679_v36  ;;  %v346_v8 = vpop.f32.mrf.mxu0  ;;  %v375_v40 = vpop.f32.mrf.mxu1 }
 0x19d   :  { %v347_v9 = vadd.f32 %v346_v8, %v1644_v39  ;;  %v376_v10 = vadd.f32 %v375_v40, %v1646_v42  ;;  %v579_v11 = vadd.f32 %v547_v13, %v345_v54  ;;  %v580_v12 = vadd.f32 %v548_v4, %v1674_v55 }
 0x19e   :  { %v485_v14 = vmul.f32 0.044715, %v403_v6  ;;  %v486_v15 = vmul.f32 0.044715, %v432_v7  ;;  %v1707_v58 = vmul.f32 0.5, %v403_v6  ;;  %v1709_v32 = vmul.f32 0.5, %v432_v7 }
 0x19f   :  { %v487_v5 = vmul.f32 0.044715, %v347_v9  ;;  %v488_v16 = vmul.f32 0.044715, %v376_v10  ;;  %v611_v19 = vmul.f32 0.7978846, %v579_v11 }
 0x1a0   :  { %v517_v28 = vmul.f32 %v485_v14, %v403_v6  ;;  %v518_v17 = vmul.f32 %v486_v15, %v432_v7  ;;  %v612_v20 = vmul.f32 0.7978846, %v580_v12  ;;  %v455_v54 = vmul.f32 0.5, %v347_v9 }
 0x1a1   :  { %v519_v21 = vmul.f32 %v487_v5, %v347_v9  ;;  %v520_v22 = vmul.f32 %v488_v16, %v376_v10  ;;  %1021 = vtanh.f32 %v611_v19  ;;  %v456_v1 = vmul.f32 0.5, %v376_v10 }
 0x1a2   :  { %v549_v18 = vmul.f32 %v517_v28, %v403_v6  ;;  %v550_v23 = vmul.f32 %v518_v17, %v432_v7  ;;  %1023 = vtanh.f32 %v612_v20 }
 0x1a3   :  { %v404_v24 = vpop.f32.mrf.mxu2  ;;  %v433_v26 = vpop.f32.mrf.mxu3  ;;  %v551_v27 = vmul.f32 %v519_v21, %v347_v9  ;;  %v552_v29 = vmul.f32 %v520_v22, %v376_v10 }
 0x1a4   :  { %v405_v31 = vadd.f32 %v404_v24, %v1677_v41  ;;  %v434_v34 = vadd.f32 %v433_v26, %v1679_v36  ;;  %v349_v35 = vpop.f32.mrf.mxu0  ;;  %v378_v37 = vpop.f32.mrf.mxu1  ;;  %v581_v38 = vadd.f32 %v549_v18, %v403_v6  ;;  %v582_v46 = vadd.f32 %v550_v23, %v432_v7 }
 0x1a5   :  { %v350_v43 = vadd.f32 %v349_v35, %v1644_v39  ;;  %v583_v44 = vadd.f32 %v551_v27, %v347_v9  ;;  %v584_v45 = vadd.f32 %v552_v29, %v376_v10  ;;  %v1704_v49 = vadd.f32 %v378_v37, %v1646_v42 }
 0x1a6   :  { %v489_v33 = vmul.f32 0.044715, %v405_v31  ;;  %v490_v47 = vmul.f32 0.044715, %v434_v34  ;;  %v613_v56 = vmul.f32 0.7978846, %v581_v38 }
 0x1a7   :  { %v491_v48 = vmul.f32 0.044715, %v350_v43  ;;  %v615_v50 = vmul.f32 0.7978846, %v583_v44  ;;  %v616_v53 = vmul.f32 0.7978846, %v584_v45  ;;  %v1022_v57 = vpop.eup %1021 }
 0x1a8   :  { %v521_v30 = vmul.f32 %v489_v33, %v405_v31  ;;  %v522_v52 = vmul.f32 %v490_v47, %v434_v34  ;;  %v614_v59 = vmul.f32 0.7978846, %v582_v46  ;;  %v1024_v60 = vpop.eup %1023  ;;  %v1711_v55 = vmul.f32 0.5, %v405_v31 }
 0x1a9   :  { %1025 = vtanh.f32 %v615_v50  ;;  %v523_v2 = vmul.f32 %v491_v48, %v350_v43  ;;  %v492_v3 = vmul.f32 0.044715, %v1704_v49  ;;  %v675_v6 = vadd.f32 1.0, %v1022_v57 }
 0x1aa   :  { %1027 = vtanh.f32 %v616_v53  ;;  %v553_v61 = vmul.f32 %v521_v30, %v405_v31  ;;  %v554_v62 = vmul.f32 %v522_v52, %v434_v34  ;;  %v1714_v8 = vmul.f32 0.5, %v434_v34 }
 0x1ab   :  { %v407_v63 = vpop.f32.mrf.mxu2  ;;  %v436_v0 = vpop.f32.mrf.mxu3  ;;  %1029 = vtanh.f32 %v613_v56  ;;  %v676_v10 = vadd.f32 1.0, %v1024_v60  ;;  %v1722_v14 = vmul.f32 0.5, %v350_v43  ;;  %v555_v15 = vmul.f32 %v523_v2, %v350_v43 }
 0x1ac   :  { %v351_v13 = vpop.f32.mrf.mxu0  ;;  %v380_v4 = vpop.f32.mrf.mxu1  ;;  %v585_v7 = vadd.f32 %v553_v61, %v405_v31  ;;  %v586_v11 = vadd.f32 %v554_v62, %v434_v34  ;;  %1031 = vtanh.f32 %v614_v59  ;;  %v524_v22 = vmul.f32 %v492_v3, %v1704_v49 }
 0x1ad   :  { %v1717_v40 = vadd.f32 %v351_v13, %v1644_v39  ;;  %v1720_v9 = vadd.f32 %v380_v4, %v1646_v42  ;;  %v587_v21 = vadd.f32 %v555_v15, %v350_v43  ;;  %v1728_v23 = vadd.f32 %v407_v63, %v1677_v41 }
 0x1ae   :  { %v617_v12 = vmul.f32 0.7978846, %v585_v7  ;;  %v618_v17 = vmul.f32 0.7978846, %v586_v11  ;;  %v707_v27 = vmul.f32 %v675_v6, %v451_v25  ;;  %v1732_v34 = vmul.f32 0.5, %v1704_v49 }
 0x1af   :  { %v1026_v5 = vpop.eup %1025  ;;  %v495_v16 = vmul.f32 0.044715, %v1717_v40  ;;  %v496_v28 = vmul.f32 0.044715, %v1720_v9  ;;  %v619_v31 = vmul.f32 0.7978846, %v587_v21  ;;  %v708_v43 = vmul.f32 %v676_v10, %v452_v51 }
 0x1b0   :  { %v1028_v19 = vpop.eup %1027  ;;  %v679_v20 = vadd.f32 1.0, %v1026_v5  ;;  %1033 = vtanh.f32 %v617_v12  ;;  %v556_v30 = vmul.f32 %v524_v22, %v1704_v49  ;;  %v493_v52 = vmul.f32 0.044715, %v1728_v23 }
 0x1b1   :  { %v1030_v18 = vpop.eup %1029  ;;  %v680_v24 = vadd.f32 1.0, %v1028_v19  ;;  %1035 = vtanh.f32 %v618_v17  ;;  %v527_v26 = vmul.f32 %v495_v16, %v1717_v40  ;;  %v528_v25 = vmul.f32 %v496_v28, %v1720_v9 }
 0x1b2   :  { %v711_v29 = vmul.f32 %v679_v20, %v455_v54  ;;  %v1032_v35 = vpop.eup %1031  ;;  %v677_v45 = vadd.f32 1.0, %v1030_v18  ;;  %v1740_v53 = vadd.f32 %v436_v0, %v1679_v36  ;;  %1037 = vtanh.f32 %v619_v31 }
 0x1b3   :  { %v409_v37 = vpop.f32.mrf.mxu2  ;;  %v438_v38 = vpop.f32.mrf.mxu3  ;;  %v712_v44 = vmul.f32 %v680_v24, %v456_v1  ;;  %v559_v46 = vmul.f32 %v527_v26, %v1717_v40  ;;  %v678_v51 = vadd.f32 1.0, %v1032_v35  ;;  %v560_v13 = vmul.f32 %v528_v25, %v1720_v9 }
 0x1b4   :  { %v410_v33 = vadd.f32 %v409_v37, %v1677_v41  ;;  %v354_v47 = vpop.f32.mrf.mxu0  ;;  %v383_v48 = vpop.f32.mrf.mxu1  ;;  %v803_v50 = vpack.c.bf16 %v711_v29, %v707_v27  ;;  %v1743_v60 = vadd.f32 %v438_v38, %v1679_v36  ;;  %v709_v1 = vmul.f32 %v677_v45, %v1707_v58 }
 0x1b5   :  { %v804_v56 = vpack.c.bf16 %v712_v44, %v708_v43  ;;  %v591_v54 = vadd.f32 %v559_v46, %v1717_v40  ;;  %v1747_v62 = vadd.f32 %v354_v47, %v1644_v39  ;;  %v1750_v63 = vadd.f32 %v383_v48, %v1646_v42 }
 0x1b6   :  { %v1034_v57 = vpop.eup %1033  ;;  %v497_v59 = vmul.f32 0.044715, %v410_v33  ;;  %859 = vmatmul.bf16.vlgmr.msrb.gmra.mxu0 %v803_v50  ;;  %v588_v4 = vadd.f32 %v556_v30, %v1704_v49  ;;  %v710_v7 = vmul.f32 %v678_v51, %v1709_v32  ;;  %v525_v11 = vmul.f32 %v493_v52, %v1728_v23 }
 0x1b7   :  { %v1036_v61 = vpop.eup %1035  ;;  %888 = vmatmul.bf16.vlgmr.msrb.gmra.mxu1 %v804_v56  ;;  %v681_v0 = vadd.f32 1.0, %v1034_v57  ;;  %v623_v3 = vmul.f32 0.7978846, %v591_v54  ;;  %v592_v15 = vadd.f32 %v560_v13, %v1720_v9  ;;  %v494_v58 = vmul.f32 0.044715, %v1740_v53 }
 0x1b8   :  { %v682_v2 = vadd.f32 1.0, %v1036_v61  ;;  %v529_v10 = vmul.f32 %v497_v59, %v410_v33  ;;  %v620_v5 = vmul.f32 0.7978846, %v588_v4  ;;  %v557_v49 = vmul.f32 %v525_v11, %v1728_v23 }
 0x1b9   :  { %v713_v6 = vmul.f32 %v681_v0, %v1711_v55  ;;  %1039 = vtanh.f32 %v623_v3  ;;  %v1038_v55 = vpop.eup %1037  ;;  %v498_v32 = vmul.f32 0.044715, %v1743_v60  ;;  %v463_v22 = vmul.f32 0.5, %v1717_v40 }
 0x1ba   :  { %v714_v12 = vmul.f32 %v682_v2, %v1714_v8  ;;  %v561_v19 = vmul.f32 %v529_v10, %v410_v33  ;;  %v624_v8 = vmul.f32 0.7978846, %v592_v15  ;;  %v464_v26 = vmul.f32 0.5, %v1720_v9 }
 0x1bb   :  { %v412_v16 = vpop.f32.mrf.mxu2  ;;  %v441_v28 = vpop.f32.mrf.mxu3  ;;  %v805_v17 = vpack.c.bf16 %v713_v6, %v709_v1  ;;  %1041 = vtanh.f32 %v620_v5  ;;  %v1769_v27 = vmul.f32 0.5, %v1728_v23  ;;  %v499_v29 = vmul.f32 0.044715, %v1747_v62 }
 0x1bc   :  { %v356_v20 = vpop.f32.mrf.mxu0  ;;  %v806_v21 = vpack.c.bf16 %v714_v12, %v710_v7  ;;  %v385_v24 = vpop.f32.mrf.mxu1  ;;  %v500_v31 = vmul.f32 0.044715, %v1750_v63  ;;  %1043 = vtanh.f32 %v624_v8  ;;  %v589_v40 = vadd.f32 %v557_v49, %v1728_v23 }
 0x1bd   :  { %v1765_v18 = vadd.f32 %v356_v20, %v1644_v39  ;;  %917 = vmatmul.bf16.vlgmr.msrb.gmra.mxu2 %v805_v17  ;;  %v683_v37 = vadd.f32 1.0, %v1038_v55  ;;  %v465_v38 = vmul.f32 0.5, %v410_v33  ;;  %v593_v43 = vadd.f32 %v561_v19, %v410_v33 }
 0x1be   :  { %946 = vmatmul.bf16.vlgmr.msrb.gmra.mxu3 %v806_v21  ;;  %v1776_v9 = vadd.f32 %v385_v24, %v1646_v42  ;;  %v621_v45 = vmul.f32 0.7978846, %v589_v40  ;;  %v526_v46 = vmul.f32 %v494_v58, %v1740_v53  ;;  %v530_v47 = vmul.f32 %v498_v32, %v1743_v60 }
 0x1bf   :  { %v503_v35 = vmul.f32 0.044715, %v1765_v18  ;;  %v1040_v44 = vpop.eup %1039  ;;  %v1781_v48 = vadd.f32 %v412_v16, %v1677_v41  ;;  %v1784_v50 = vadd.f32 %v441_v28, %v1679_v36  ;;  %v625_v25 = vmul.f32 0.7978846, %v593_v43 }
 0x1c0   :  { %v687_v23 = vadd.f32 1.0, %v1040_v44  ;;  %1045 = vtanh.f32 %v621_v45  ;;  %v558_v33 = vmul.f32 %v526_v46, %v1740_v53  ;;  %v562_v30 = vmul.f32 %v530_v47, %v1743_v60 }
 0x1c1   :  { %v531_v52 = vmul.f32 %v499_v29, %v1747_v62  ;;  %v1042_v56 = vpop.eup %1041  ;;  %v715_v59 = vmul.f32 %v683_v37, %v1722_v14  ;;  %1047 = vtanh.f32 %v625_v25  ;;  %v535_v61 = vmul.f32 %v503_v35, %v1765_v18 }
 0x1c2   :  { %v719_v54 = vmul.f32 %v687_v23, %v463_v22  ;;  %v1044_v0 = vpop.eup %1043  ;;  %v504_v1 = vmul.f32 0.044715, %v1776_v9  ;;  %v684_v3 = vadd.f32 1.0, %v1042_v56  ;;  %v590_v13 = vadd.f32 %v558_v33, %v1740_v53 }
 0x1c3   :  { %v414_v51 = vpop.f32.mrf.mxu2  ;;  %v443_v57 = vpop.f32.mrf.mxu3  ;;  %v688_v6 = vadd.f32 1.0, %v1044_v0  ;;  %v594_v7 = vadd.f32 %v562_v30, %v1743_v60  ;;  %v563_v11 = vmul.f32 %v531_v52, %v1747_v62  ;;  %v501_v14 = vmul.f32 0.044715, %v1781_v48 }
 0x1c4   :  { %v1793_v2 = vadd.f32 %v414_v51, %v1677_v41  ;;  %v807_v4 = vpack.c.bf16 %v719_v54, %v715_v59  ;;  %v1800_v10 = vadd.f32 %v443_v57, %v1679_v36  ;;  %v716_v12 = vmul.f32 %v684_v3, %v1732_v34 }
 0x1c5   :  { %v622_v15 = vmul.f32 0.7978846, %v590_v13  ;;  %v720_v5 = vmul.f32 %v688_v6, %v464_v26  ;;  %v626_v58 = vmul.f32 0.7978846, %v594_v7  ;;  %v567_v16 = vmul.f32 %v535_v61, %v1765_v18 }
 0x1c6   :  { %864 = vmatmul.bf16.gmra.mxu0 %v807_v4  ;;  %v595_v28 = vadd.f32 %v563_v11, %v1747_v62  ;;  %v1046_v17 = vpop.eup %1045  ;;  %v505_v49 = vmul.f32 0.044715, %v1793_v2  ;;  %v532_v19 = vmul.f32 %v500_v31, %v1750_v63  ;;  %v536_v55 = vmul.f32 %v504_v1, %v1776_v9 }
 0x1c7   :  { %1049 = vtanh.f32 %v622_v15  ;;  %v1048_v32 = vpop.eup %1047  ;;  %v808_v20 = vpack.c.bf16 %v720_v5, %v716_v12  ;;  %v685_v21 = vadd.f32 1.0, %v1046_v17  ;;  %v599_v34 = vadd.f32 %v567_v16, %v1765_v18 }
 0x1c8   :  { %1051 = vtanh.f32 %v626_v58  ;;  %v689_v22 = vadd.f32 1.0, %v1048_v32  ;;  %v627_v8 = vmul.f32 0.7978846, %v595_v28  ;;  %v564_v24 = vmul.f32 %v532_v19, %v1750_v63 }
 0x1c9   :  { %v568_v26 = vmul.f32 %v536_v55, %v1776_v9  ;;  %v502_v29 = vmul.f32 0.044715, %v1784_v50  ;;  %v506_v40 = vmul.f32 0.044715, %v1800_v10  ;;  %893 = vmatmul.bf16.gmra.mxu1 %v808_v20  ;;  %v717_v31 = vmul.f32 %v685_v21, %v1769_v27 }
 0x1ca   :  { %v631_v35 = vmul.f32 0.7978846, %v599_v34  ;;  %v721_v37 = vmul.f32 %v689_v22, %v465_v38  ;;  %1053 = vtanh.f32 %v627_v8  ;;  %v596_v43 = vadd.f32 %v564_v24, %v1750_v63 }
 0x1cb   :  { %v600_v44 = vadd.f32 %v568_v26, %v1776_v9  ;;  %v533_v45 = vmul.f32 %v501_v14, %v1781_v48  ;;  %v537_v46 = vmul.f32 %v505_v49, %v1793_v2  ;;  %v462_v25 = vmul.f32 0.5, %v1740_v53 }
 0x1cc   :  { %1055 = vtanh.f32 %v631_v35  ;;  %v809_v23 = vpack.c.bf16 %v721_v37, %v717_v31  ;;  %v628_v33 = vmul.f32 0.7978846, %v596_v43  ;;  %v534_v51 = vmul.f32 %v502_v29, %v1784_v50 }
 0x1cd   :  { %v1050_v47 = vpop.eup %1049  ;;  %v632_v30 = vmul.f32 0.7978846, %v600_v44  ;;  %v565_v38 = vmul.f32 %v533_v45, %v1781_v48  ;;  %v569_v56 = vmul.f32 %v537_v46, %v1793_v2  ;;  %v466_v57 = vmul.f32 0.5, %v1743_v60 }
 0x1ce   :  { %v1052_v52 = vpop.eup %1051  ;;  %v686_v27 = vadd.f32 1.0, %v1050_v47  ;;  %922 = vmatmul.bf16.gmra.mxu2 %v809_v23  ;;  %1057 = vtanh.f32 %v628_v33  ;;  %v538_v54 = vmul.f32 %v506_v40, %v1800_v10  ;;  %v467_v61 = vmul.f32 0.5, %v1747_v62 }
 0x1cf   :  { %v690_v59 = vadd.f32 1.0, %v1052_v52  ;;  %1059 = vtanh.f32 %v632_v30  ;;  %v597_v53 = vadd.f32 %v565_v38, %v1781_v48  ;;  %v601_v0 = vadd.f32 %v569_v56, %v1793_v2 }
 0x1d0   :  { %v1054_v1 = vpop.eup %1053  ;;  %v718_v3 = vmul.f32 %v686_v27, %v462_v25  ;;  %v566_v4 = vmul.f32 %v534_v51, %v1784_v50  ;;  %v570_v6 = vmul.f32 %v538_v54, %v1800_v10  ;;  %v471_v60 = vmul.f32 0.5, %v1765_v18 }
 0x1d1   :  { %v722_v13 = vmul.f32 %v690_v59, %v466_v57  ;;  %v691_v11 = vadd.f32 1.0, %v1054_v1  ;;  %v629_v14 = vmul.f32 0.7978846, %v597_v53  ;;  %v633_v12 = vmul.f32 0.7978846, %v601_v0 }
 0x1d2   :  { %v1056_v7 = vpop.eup %1055  ;;  %v598_v5 = vadd.f32 %v566_v4, %v1784_v50  ;;  %v602_v58 = vadd.f32 %v570_v6, %v1800_v10  ;;  %v468_v18 = vmul.f32 0.5, %v1750_v63  ;;  %v472_v21 = vmul.f32 0.5, %v1776_v9 }
 0x1d3   :  { %v810_v15 = vpack.c.bf16 %v722_v13, %v718_v3  ;;  %v695_v62 = vadd.f32 1.0, %v1056_v7  ;;  %v723_v16 = vmul.f32 %v691_v11, %v467_v61  ;;  %1061 = vtanh.f32 %v629_v14 }
 0x1d4   :  { %v1058_v28 = vpop.eup %1057  ;;  %1063 = vtanh.f32 %v633_v12  ;;  %v630_v49 = vmul.f32 0.7978846, %v598_v5  ;;  %v634_v19 = vmul.f32 0.7978846, %v602_v58  ;;  %v469_v31 = vmul.f32 0.5, %v1781_v48 }
 0x1d5   :  { %951 = vmatmul.bf16.gmra.mxu3 %v810_v15  ;;  %v727_v17 = vmul.f32 %v695_v62, %v471_v60  ;;  %v1060_v55 = vpop.eup %1059  ;;  %v692_v32 = vadd.f32 1.0, %v1058_v28  ;;  %v473_v35 = vmul.f32 0.5, %v1793_v2  ;;  %v470_v46 = vmul.f32 0.5, %v1784_v50 }
 0x1d6   :  { %v696_v34 = vadd.f32 1.0, %v1060_v55  ;;  %1065 = vtanh.f32 %v630_v49  ;;  %v474_v47 = vmul.f32 0.5, %v1800_v10 }
 0x1d7   :  { %v811_v20 = vpack.c.bf16 %v727_v17, %v723_v16  ;;  %1067 = vtanh.f32 %v634_v19  ;;  %v724_v22 = vmul.f32 %v692_v32, %v468_v18 }
 0x1d8   :  { %v728_v8 = vmul.f32 %v696_v34, %v472_v21 }
 0x1d9   :  { %869 = vmatmul.bf16.gmra.mxu0 %v811_v20  ;;  %v1062_v24 = vpop.eup %1061 }
 0x1da   :  { %v1064_v26 = vpop.eup %1063  ;;  %v812_v29 = vpack.c.bf16 %v728_v8, %v724_v22  ;;  %v693_v40 = vadd.f32 1.0, %v1062_v24 }
 0x1db   :  { %v697_v37 = vadd.f32 1.0, %v1064_v26 }
 0x1dc   :  { %v1066_v63 = vpop.eup %1065  ;;  %898 = vmatmul.bf16.gmra.mxu1 %v812_v29  ;;  %v725_v44 = vmul.f32 %v693_v40, %v469_v31 }
 0x1dd   :  { %v1068_v43 = vpop.eup %1067  ;;  %v729_v9 = vmul.f32 %v697_v37, %v473_v35  ;;  %v694_v45 = vadd.f32 1.0, %v1066_v63 }
 0x1de   :  { %v698_v23 = vadd.f32 1.0, %v1068_v43 }
 0x1df   :  { %v813_v25 = vpack.c.bf16 %v729_v9, %v725_v44  ;;  %v726_v33 = vmul.f32 %v694_v45, %v470_v46 }
 0x1e0   :  { %v730_v30 = vmul.f32 %v698_v23, %v474_v47 }
 0x1e1   :  { %927 = vmatmul.bf16.gmra.mxu2 %v813_v25 }
 0x1e2   :  { %v814_v52 = vpack.c.bf16 %v730_v30, %v726_v33 }
 0x1e5   :  { %956 = vmatmul.bf16.gmra.mxu3 %v814_v52 }
 0x20e   :  { %v359_v48 = vpop.f32.mrf.mxu0  ;;  %v388_v2 = vpop.f32.mrf.mxu1 }
 0x20f   :  { %v1839_v27 = vadd.f32 %v359_v48, %v1644_v39  ;;  %v1842_v38 = vadd.f32 %v388_v2, %v1646_v42 }
 0x211   :  { %v507_v56 = vmul.f32 0.044715, %v1839_v27  ;;  %v508_v50 = vmul.f32 0.044715, %v1842_v38  ;;  %v475_v30 = vmul.f32 0.5, %v1839_v27  ;;  %v476_v2 = vmul.f32 0.5, %v1842_v38 }
 0x213   :  { %v539_v10 = vmul.f32 %v507_v56, %v1839_v27  ;;  %v540_v51 = vmul.f32 %v508_v50, %v1842_v38 }
 0x215   :  { %v417_v57 = vpop.f32.mrf.mxu2  ;;  %v446_v59 = vpop.f32.mrf.mxu3  ;;  %v571_v54 = vmul.f32 %v539_v10, %v1839_v27  ;;  %v572_v61 = vmul.f32 %v540_v51, %v1842_v38 }
 0x216   :  { %v1851_v53 = vadd.f32 %v417_v57, %v1677_v41  ;;  %v1854_v0 = vadd.f32 %v446_v59, %v1679_v36  ;;  %v361_v1 = vpop.f32.mrf.mxu0  ;;  %v390_v3 = vpop.f32.mrf.mxu1 }
 0x217   :  { %v362_v13 = vadd.f32 %v361_v1, %v1644_v39  ;;  %v391_v4 = vadd.f32 %v390_v3, %v1646_v42  ;;  %v603_v6 = vadd.f32 %v571_v54, %v1839_v27  ;;  %v604_v11 = vadd.f32 %v572_v61, %v1842_v38 }
 0x218   :  { %v509_v7 = vmul.f32 0.044715, %v1851_v53  ;;  %v510_v60 = vmul.f32 0.044715, %v1854_v0 }
 0x219   :  { %v511_v14 = vmul.f32 0.044715, %v362_v13  ;;  %v512_v12 = vmul.f32 0.044715, %v391_v4  ;;  %v635_v58 = vmul.f32 0.7978846, %v603_v6 }
 0x21a   :  { %v541_v15 = vmul.f32 %v509_v7, %v1851_v53  ;;  %v542_v62 = vmul.f32 %v510_v60, %v1854_v0  ;;  %v636_v39 = vmul.f32 0.7978846, %v604_v11  ;;  %v479_v52 = vmul.f32 0.5, %v362_v13 }
 0x21b   :  { %v543_v5 = vmul.f32 %v511_v14, %v362_v13  ;;  %v544_v16 = vmul.f32 %v512_v12, %v391_v4  ;;  %1069 = vtanh.f32 %v635_v58  ;;  %v480_v56 = vmul.f32 0.5, %v391_v4 }
 0x21c   :  { %v573_v42 = vmul.f32 %v541_v15, %v1851_v53  ;;  %v574_v28 = vmul.f32 %v542_v62, %v1854_v0  ;;  %1071 = vtanh.f32 %v636_v39  ;;  %v477_v60 = vmul.f32 0.5, %v1851_v53 }
 0x21d   :  { %v419_v17 = vpop.f32.mrf.mxu2  ;;  %v448_v49 = vpop.f32.mrf.mxu3  ;;  %v575_v19 = vmul.f32 %v543_v5, %v362_v13  ;;  %v576_v55 = vmul.f32 %v544_v16, %v391_v4  ;;  %v478_v11 = vmul.f32 0.5, %v1854_v0 }
 0x21e   :  { %v420_v18 = vadd.f32 %v419_v17, %v1677_v41  ;;  %v449_v32 = vadd.f32 %v448_v49, %v1679_v36  ;;  %v605_v20 = vadd.f32 %v573_v42, %v1851_v53  ;;  %v606_v22 = vadd.f32 %v574_v28, %v1854_v0  ;;  %v1877_v0 = vld [vmem:[%s1941_s6] ss:$0 sm:$0xff] }
 0x21f   :  { %v607_v21 = vadd.f32 %v575_v19, %v362_v13  ;;  %v608_v34 = vadd.f32 %v576_v55, %v391_v4 }
 0x220   :  { %v513_v8 = vmul.f32 0.044715, %v420_v18  ;;  %v514_v24 = vmul.f32 0.044715, %v449_v32  ;;  %v637_v31 = vmul.f32 0.7978846, %v605_v20 }
 0x221   :  { %v639_v26 = vmul.f32 0.7978846, %v607_v21  ;;  %v640_v29 = vmul.f32 0.7978846, %v608_v34  ;;  %v638_v37 = vmul.f32 0.7978846, %v606_v22  ;;  %v1070_v63 = vpop.eup %1069 }
 0x222   :  { %v545_v40 = vmul.f32 %v513_v8, %v420_v18  ;;  %v546_v35 = vmul.f32 %v514_v24, %v449_v32  ;;  %v1072_v43 = vpop.eup %1071  ;;  %v699_v45 = vadd.f32 1.0, %v1070_v63  ;;  %v481_v38 = vmul.f32 0.5, %v420_v18 }
 0x223   :  { %1073 = vtanh.f32 %v639_v26  ;;  %v700_v25 = vadd.f32 1.0, %v1072_v43  ;;  %v482_v14 = vmul.f32 0.5, %v449_v32 }
 0x224   :  { %1075 = vtanh.f32 %v640_v29  ;;  %v577_v41 = vmul.f32 %v545_v40, %v420_v18  ;;  %v578_v36 = vmul.f32 %v546_v35, %v449_v32  ;;  %v731_v51 = vmul.f32 %v699_v45, %v475_v30  ;;  %v1086_v35 = vld [vmem:[%s1935_s0 + $0x8] sm:$0xff] }
 0x225   :  { %1077 = vtanh.f32 %v637_v31  ;;  %v732_v54 = vmul.f32 %v700_v25, %v476_v2  ;;  %v1087_v25 = vld [vmem:[%s1935_s0 + $0x10] sm:$0xff] }
 0x226   :  { %v609_v44 = vadd.f32 %v577_v41, %v420_v18  ;;  %v610_v9 = vadd.f32 %v578_v36, %v449_v32  ;;  %1079 = vtanh.f32 %v638_v37  ;;  %v1085_v32 = vld [vmem:[%s1935_s0] sm:$0xff] }
 0x228   :  { %v641_v46 = vmul.f32 0.7978846, %v609_v44  ;;  %v642_v47 = vmul.f32 0.7978846, %v610_v9 }
 0x229   :  { %v1074_v23 = vpop.eup %1073 }
 0x22a   :  { %v1076_v33 = vpop.eup %1075  ;;  %v703_v48 = vadd.f32 1.0, %v1074_v23  ;;  %1081 = vtanh.f32 %v641_v46 }
 0x22b   :  { %v704_v50 = vadd.f32 1.0, %v1076_v33  ;;  %1083 = vtanh.f32 %v642_v47  ;;  %v1078_v10 = vpop.eup %1077 }
 0x22c   :  { %v735_v57 = vmul.f32 %v703_v48, %v479_v52  ;;  %v1080_v59 = vpop.eup %1079  ;;  %v701_v6 = vadd.f32 1.0, %v1078_v10  ;;  %v1088_v10 = vld [vmem:[%s1935_s0 + $0x18] sm:$0xff] }
 0x22d   :  { %v736_v61 = vmul.f32 %v704_v50, %v480_v56  ;;  %v702_v27 = vadd.f32 1.0, %v1080_v59 }
 0x22e   :  { %v815_v1 = vpack.c.bf16 %v735_v57, %v731_v51  ;;  %v733_v15 = vmul.f32 %v701_v6, %v477_v60 }
 0x22f   :  { %v816_v3 = vpack.c.bf16 %v736_v61, %v732_v54  ;;  %v734_v5 = vmul.f32 %v702_v27, %v478_v11  ;;  %v1089_v27 = vld [vmem:[%s1935_s0 + $0x20] sm:$0xff] }
 0x230   :  { %v1082_v7 = vpop.eup %1081  ;;  %874 = vmatmul.bf16.gmra.mxu0 %v815_v1 }
 0x231   :  { %v1084_v13 = vpop.eup %1083  ;;  %903 = vmatmul.bf16.gmra.mxu1 %v816_v3  ;;  %v705_v4 = vadd.f32 1.0, %v1082_v7 }
 0x232   :  { %v706_v12 = vadd.f32 1.0, %v1084_v13 }
 0x233   :  { %v737_v62 = vmul.f32 %v705_v4, %v481_v38  ;;  %v860_v42 = vpop.f32.mrf.mxu0 }
 0x234   :  { %v738_v58 = vmul.f32 %v706_v12, %v482_v14  ;;  %v889_v28 = vpop.f32.mrf.mxu1 }
 0x235   :  { %v817_v16 = vpack.c.bf16 %v737_v62, %v733_v15  ;;  %v890_v17 = vadd.f32 %v889_v28, %v860_v42  ;;  %v1090_v15 = vld [vmem:[%s1935_s0 + $0x28] sm:$0xff] }
 0x236   :  { %v818_v39 = vpack.c.bf16 %v738_v58, %v734_v5 }
 0x237   :  { %932 = vmatmul.bf16.gmra.mxu2 %v817_v16 }
 0x238   :  { %961 = vmatmul.bf16.gmra.mxu3 %v818_v39 }
 0x23b   :  { %v862_v55 = vpop.f32.mrf.mxu0 }
 0x23c   :  { %v891_v18 = vpop.f32.mrf.mxu1 }
 0x23d   :  { %v892_v34 = vadd.f32 %v891_v18, %v862_v55  ;;  %v1091_v55 = vld [vmem:[%s1935_s0 + $0x30] sm:$0xff] }
 0x240   :  { %v918_v49 = vpop.f32.mrf.mxu2 }
 0x241   :  { %v919_v19 = vadd.f32 %v918_v49, %v890_v17  ;;  %v947_v53 = vpop.f32.mrf.mxu3 }
 0x243   :  { %v948_v20 = vadd.f32 %v947_v53, %v919_v19  ;;  %v865_v40 = vpop.f32.mrf.mxu0 }
 0x245   :  { %v967_v21 = vadd.f32 %v1085_v32, %v948_v20 }
 0x246   :  { %v894_v31 = vpop.f32.mrf.mxu1 }
 0x247   :  { %v979_v22 = vadd.f32 %v1877_v0, %v967_v21  ;;  %v895_v63 = vadd.f32 %v894_v31, %v865_v40 }
 0x248   :  { %v920_v8 = vpop.f32.mrf.mxu2 }
 0x249   :  { %987 = vst [vmem:[%s1942_s7] sm:$0xff] %v979_v22  ;;  %v921_v24 = vadd.f32 %v920_v8, %v892_v34  ;;  %v949_v26 = vpop.f32.mrf.mxu3 }
 0x24b   :  { %v950_v29 = vadd.f32 %v949_v26, %v921_v24  ;;  %v867_v43 = vpop.f32.mrf.mxu0  ;;  %v1092_v24 = vld [vmem:[%s1935_s0 + $0x38] sm:$0xff] }
 0x24d   :  { %v968_v37 = vadd.f32 %v1086_v35, %v950_v29 }
 0x24e   :  { %v896_v44 = vpop.f32.mrf.mxu1 }
 0x24f   :  { %v980_v41 = vadd.f32 %v1877_v0, %v968_v37  ;;  %v897_v23 = vadd.f32 %v896_v44, %v867_v43 }
 0x251   :  { %988 = vst [vmem:[%s1942_s7 + $0x8] sm:$0xff] %v980_v41  ;;  %v923_v36 = vpop.f32.mrf.mxu2 }
 0x252   :  { %v924_v9 = vadd.f32 %v923_v36, %v895_v63 }
 0x256   :  { %v870_v48 = vpop.f32.mrf.mxu0 }
 0x258   :  { %v952_v45 = vpop.f32.mrf.mxu3 }
 0x259   :  { %v953_v46 = vadd.f32 %v952_v45, %v924_v9  ;;  %v925_v47 = vpop.f32.mrf.mxu2  ;;  %v899_v2 = vpop.f32.mrf.mxu1 }
 0x25a   :  { %v926_v52 = vadd.f32 %v925_v47, %v897_v23  ;;  %v900_v57 = vadd.f32 %v899_v2, %v870_v48 }
 0x25b   :  { %v969_v33 = vadd.f32 %v1087_v25, %v953_v46 }
 0x25d   :  { %v981_v30 = vadd.f32 %v1877_v0, %v969_v33 }
 0x25e   :  { %v872_v3 = vpop.f32.mrf.mxu0 }
 0x25f   :  { %989 = vst [vmem:[%s1942_s7 + $0x10] sm:$0xff] %v981_v30 }
 0x260   :  { %v954_v56 = vpop.f32.mrf.mxu3 }
 0x261   :  { %v955_v50 = vadd.f32 %v954_v56, %v926_v52  ;;  %v901_v6 = vpop.f32.mrf.mxu1 }
 0x262   :  { %v902_v60 = vadd.f32 %v901_v6, %v872_v3 }
 0x263   :  { %v970_v51 = vadd.f32 %v1088_v10, %v955_v50 }
 0x264   :  { %v928_v54 = vpop.f32.mrf.mxu2 }
 0x265   :  { %v982_v59 = vadd.f32 %v1877_v0, %v970_v51  ;;  %v929_v61 = vadd.f32 %v928_v54, %v900_v57 }
 0x267   :  { %990 = vst [vmem:[%s1942_s7 + $0x18] sm:$0xff] %v982_v59 }
 0x268   :  { %v957_v1 = vpop.f32.mrf.mxu3 }
 0x269   :  { %v958_v7 = vadd.f32 %v957_v1, %v929_v61 }
 0x26b   :  { %v971_v13 = vadd.f32 %v1089_v27, %v958_v7 }
 0x26c   :  { %v930_v4 = vpop.f32.mrf.mxu2 }
 0x26d   :  { %v983_v38 = vadd.f32 %v1877_v0, %v971_v13  ;;  %v931_v11 = vadd.f32 %v930_v4, %v902_v60 }
 0x26f   :  { %991 = vst [vmem:[%s1942_s7 + $0x20] sm:$0xff] %v983_v38 }
 0x270   :  { %v959_v14 = vpop.f32.mrf.mxu3 }
 0x271   :  { %v960_v12 = vadd.f32 %v959_v14, %v931_v11 }
 0x273   :  { %v972_v62 = vadd.f32 %v1090_v15, %v960_v12 }
 0x275   :  { %v984_v5 = vadd.f32 %v1877_v0, %v972_v62 }
 0x277   :  { %992 = vst [vmem:[%s1942_s7 + $0x28] sm:$0xff] %v984_v5 }
 0x2ad   :  { %v875_v58 = vpop.f32.mrf.mxu0 }
 0x2ae   :  { %v904_v16 = vpop.f32.mrf.mxu1 }
 0x2af   :  { %v905_v39 = vadd.f32 %v904_v16, %v875_v58 }
 0x2b5   :  { %v877_v19 = vpop.f32.mrf.mxu0 }
 0x2b6   :  { %v906_v53 = vpop.f32.mrf.mxu1 }
 0x2b7   :  { %v907_v20 = vadd.f32 %v906_v53, %v877_v19 }
 0x2ba   :  { %v933_v42 = vpop.f32.mrf.mxu2 }
 0x2bb   :  { %v934_v28 = vadd.f32 %v933_v42, %v905_v39  ;;  %v962_v17 = vpop.f32.mrf.mxu3 }
 0x2bd   :  { %v963_v49 = vadd.f32 %v962_v17, %v934_v28 }
 0x2bf   :  { %v973_v18 = vadd.f32 %v1091_v55, %v963_v49 }
 0x2c1   :  { %v985_v32 = vadd.f32 %v1877_v0, %v973_v18 }
 0x2c2   :  { %v935_v21 = vpop.f32.mrf.mxu2 }
 0x2c3   :  { %993 = vst [vmem:[%s1942_s7 + $0x30] sm:$0xff] %v985_v32  ;;  %v936_v34 = vadd.f32 %v935_v21, %v907_v20  ;;  %v964_v22 = vpop.f32.mrf.mxu3 }
 0x2c5   :  { %v965_v8 = vadd.f32 %v964_v22, %v936_v34 }
 0x2c7   :  { %v974_v26 = vadd.f32 %v1092_v24, %v965_v8 }
 0x2c9   :  { %v986_v29 = vadd.f32 %v1877_v0, %v974_v26 }
 0x2cb   :  { %994 = vst [vmem:[%s1942_s7 + $0x38] sm:$0xff] %v986_v29 }

</bundles_post_ra>
